<compile_context>
chip_gen: v5e
topology: v5e:2x2
jax: 0.10.0
libtpu: 0.0.40
codegen_flags: <defaults>
</compile_context>

<pallas_src>
import functools

import jax
import jax.numpy as jnp
from jax.experimental import pallas as pl
from jax.experimental.pallas import tpu as pltpu

NEG_SLOPE = 0.01             # F.leaky_relu default
BN_EPS = 1e-5                # BatchNorm default eps


def _round_up(x, m):
  return ((x + m - 1) // m) * m


def _vmem_budget_bytes():
  """Generation-aware scoped-VMEM budget (headroom below physical VMEM)."""
  try:
    info = pltpu.get_tpu_info()
    cap = getattr(info, "vmem_capacity_bytes", None)
    if cap:
      # ~3/4 of physical: ~48 MiB on v7x (64 MiB/TC), 96 MiB on v5e/v6e (128).
      return int(min(max(cap * 3 // 4, 32 * 1024 * 1024), 96 * 1024 * 1024))
  except Exception:
    pass
  return 32 * 1024 * 1024     # safe fallback on any generation


_VMEM_LIMIT = _vmem_budget_bytes()


def _choose_tiles(n):
  """Return (n_padded, tile_m, tile_k) for the [N, N] propagation matmul."""
  npad = _round_up(max(n, 1), 128)
  if npad <= 1024:
    # Small graphs: single K block, but >= 2 row blocks when possible so the
    # "parallel" axis shards across v7x's two TensorCores and DMA pipelines.
    tile_m = npad // 2 if npad >= 256 else npad
    return npad, tile_m, npad
  # Large graphs: big bf16 A^T tiles (fewer ~0.35us grid steps, long DMAs).
  big = _VMEM_LIMIT >= 80 * 1024 * 1024     # v5e/v6e (128 MiB physical VMEM)
  tile_m = 2048 if big else 1024
  npad = _round_up(n, tile_m)
  tile_k = tile_m
  for cand in (4096, 2048):
    # 2 buffers x bf16 tile must stay well inside the scoped budget.
    if npad % cand == 0 and (2 * cand * tile_m * 2) <= _VMEM_LIMIT // 2:
      tile_k = cand
      break
  return npad, tile_m, tile_k


def _mosaic_params(*dims):
  return pltpu.CompilerParams(dimension_semantics=dims,
                              vmem_limit_bytes=_VMEM_LIMIT)


# ----------------------------------------------------------------------------
# Pallas kernels
# ----------------------------------------------------------------------------
def _make_linear_kernel(scaled):
  """Row-tiled dense transform Z = (X @ W) [* row_scale]."""
  def kernel(*refs):
    if scaled:
      x_ref, w_ref, s_ref, o_ref = refs
    else:
      x_ref, w_ref, o_ref = refs
    y = jnp.dot(x_ref[...], w_ref[...], preferred_element_type=jnp.float32)
    if scaled:
      y = y * s_ref[...]
    o_ref[...] = y.astype(o_ref.dtype)
  return kernel


def linear_rows(x, w, *, tile_m, out_dtype, row_scale=None):
  n, cin = x.shape
  cout = w.shape[1]
  in_specs = [pl.BlockSpec((tile_m, cin), lambda i: (i, 0)),
              pl.BlockSpec((cin, cout), lambda i: (0, 0))]
  args = [x, w]
  if row_scale is not None:
    in_specs.append(pl.BlockSpec((tile_m, 1), lambda i: (i, 0)))
    args.append(row_scale)
  return pl.pallas_call(
      _make_linear_kernel(row_scale is not None),
      out_shape=jax.ShapeDtypeStruct((n, cout), out_dtype),
      grid=(n // tile_m,),
      in_specs=in_specs,
      out_specs=pl.BlockSpec((tile_m, cout), lambda i: (i, 0)),
      compiler_params=_mosaic_params("parallel"),
  )(*args)


def _make_prop_kernel(*, selfloop, post_w, root, bn, act):
  """Fused GNN layer over streamed A^T tiles.

  out = valid * act( BN( rowscale*(A^T @ Z [+ Z_self]) [@ W] + b [+ H @ Wr] ) )
  """
  def kernel(*refs):
    it = iter(refs)
    p_ref = next(it)                       # (tile_m, tile_k) bf16 A^T tile
    z_ref = next(it)                       # (tile_k, cz) bf16 streamed features
    zs_ref = next(it) if selfloop else None  # (tile_m, cz) GCN self-loop rows
    rs_ref = next(it)                      # (tile_m, 1) fp32 row normalisation
    w_ref = next(it) if post_w else None   # (cz, cout) post-aggregation W
    if root:
      hr_ref = next(it)                    # (tile_m, ch) bf16 root features
      wr_ref = next(it)                    # (ch, cout) SAGE root weight
    b_ref = next(it)                       # (1, cout)
    if bn:
      g_ref, be_ref, mu_ref, va_ref = next(it), next(it), next(it), next(it)
    v_ref = next(it)                       # (tile_m, 1) valid-row mask
    o_ref = next(it)
    acc_ref = next(it)

    k = pl.program_id(1)

    @pl.when(k == 0)
    def _init():
      acc_ref[...] = jnp.zeros(acc_ref.shape, jnp.float32)

    # dominant N x N propagation matmul: bf16 operands, fp32 accumulation
    acc_ref[...] += jnp.dot(p_ref[...], z_ref[...],
                            preferred_element_type=jnp.float32)

    @pl.when(k == pl.num_programs(1) - 1)
    def _finalize():
      y = acc_ref[...]
      if selfloop:                       # GCN self-loop term (column-scaled Z)
        y = y + zs_ref[...].astype(jnp.float32)
      y = y * rs_ref[...]                # D^-1/2 (GCN) or 1/indeg (SAGE mean)
      if post_w:                         # feature transform after aggregation
        y = jnp.dot(y, w_ref[...], preferred_element_type=jnp.float32)
      y = y + b_ref[...]
      if root:                           # SAGEConv root term H @ W_r
        y = y + jnp.dot(hr_ref[...], wr_ref[...],
                        preferred_element_type=jnp.float32)
      if bn:                             # eval-mode BatchNorm (running stats)
        inv = jax.lax.rsqrt(va_ref[...] + BN_EPS)
        y = (y - mu_ref[...]) * inv * g_ref[...] + be_ref[...]
      if act:                            # leaky_relu
        y = jnp.where(y >= 0.0, y, NEG_SLOPE * y)
      y = y * v_ref[...]                 # zero padded rows explicitly
      o_ref[...] = y.astype(o_ref.dtype)

  return kernel


def prop_layer(at, z, rowscale, bias, *, z_self=None, w_post=None,
               h_root=None, w_root=None, bn=None, act, valid,
               tile_m, tile_k, out_dtype=jnp.bfloat16):
  """Tiled fused propagation layer over a (row-block, K-block) grid."""
  npad = at.shape[0]
  cz = z.shape[1]
  if w_post is not None:
    cout = w_post.shape[1]
  elif w_root is not None:
    cout = w_root.shape[1]
  else:
    cout = cz
  n_i, n_k = npad // tile_m, npad // tile_k

  in_specs = [pl.BlockSpec((tile_m, tile_k), lambda i, k: (i, k)),
              pl.BlockSpec((tile_k, cz), lambda i, k: (k, 0))]
  args = [at, z]
  if z_self is not None:
    in_specs.append(pl.BlockSpec((tile_m, cz), lambda i, k: (i, 0)))
    args.append(z_self)
  in_specs.append(pl.BlockSpec((tile_m, 1), lambda i, k: (i, 0)))
  args.append(rowscale)
  if w_post is not None:
    in_specs.append(pl.BlockSpec((cz, cout), lambda i, k: (0, 0)))
    args.append(w_post)
  if h_root is not None:
    ch = h_root.shape[1]
    in_specs.append(pl.BlockSpec((tile_m, ch), lambda i, k: (i, 0)))
    args.append(h_root)
    in_specs.append(pl.BlockSpec((ch, cout), lambda i, k: (0, 0)))
    args.append(w_root)
  in_specs.append(pl.BlockSpec((1, cout), lambda i, k: (0, 0)))
  args.append(bias)
  if bn is not None:
    for p in bn:   # gamma, beta, running_mean, running_var
      in_specs.append(pl.BlockSpec((1, cout), lambda i, k: (0, 0)))
      args.append(p)
  in_specs.append(pl.BlockSpec((tile_m, 1), lambda i, k: (i, 0)))
  args.append(valid)

  kernel = _make_prop_kernel(selfloop=z_self is not None,
                             post_w=w_post is not None,
                             root=h_root is not None,
                             bn=bn is not None, act=act)
  return pl.pallas_call(
      kernel,
      out_shape=jax.ShapeDtypeStruct((npad, cout), out_dtype),
      grid=(n_i, n_k),
      in_specs=in_specs,
      out_specs=pl.BlockSpec((tile_m, cout), lambda i, k: (i, 0)),
      scratch_shapes=[pltpu.VMEM((tile_m, cz), jnp.float32)],
      compiler_params=_mosaic_params("parallel", "arbitrary"),
  )(*args)


def _tail_kernel(s_ref, h_ref, src_ref, tgt_ref, o_ref, acc_ref):
  """Fused global_add_pool (S @ H) + link dot + sigmoid, lane-dense output."""
  k = pl.program_id(0)

  @pl.when(k == 0)
  def _init():
    acc_ref[...] = jnp.zeros(acc_ref.shape, jnp.float32)

  acc_ref[...] += jnp.dot(s_ref[...], h_ref[...],
                          preferred_element_type=jnp.float32)

  @pl.when(k == pl.num_programs(0) - 1)
  def _finalize():
    emb = acc_ref[...]                                        # (G_pad, C)
    src = jnp.dot(src_ref[...], emb, preferred_element_type=jnp.float32)
    tgt = jnp.dot(tgt_ref[...], emb, preferred_element_type=jnp.float32)
    prod = src * tgt                                          # (L_pad, C)
    ones = jnp.ones((1, prod.shape[1]), jnp.float32)
    # contract the channel dim of both operands -> lane-dense (1, L_pad) row
    d = jax.lax.dot_general(ones, prod,
                            dimension_numbers=(((1,), (1,)), ((), ())),
                            preferred_element_type=jnp.float32)
    o_ref[...] = 1.0 / (1.0 + jnp.exp(-d))


def pool_and_link(S, H, src_sel, tgt_sel, *, tile_k):
  g_pad, npad = S.shape
  c = H.shape[1]
  l_pad = src_sel.shape[0]
  return pl.pallas_call(
      _tail_kernel,
      out_shape=jax.ShapeDtypeStruct((1, l_pad), jnp.float32),
      grid=(npad // tile_k,),
      in_specs=[pl.BlockSpec((g_pad, tile_k), lambda k: (0, k)),
                pl.BlockSpec((tile_k, c), lambda k: (k, 0)),
                pl.BlockSpec((l_pad, g_pad), lambda k: (0, 0)),
                pl.BlockSpec((l_pad, g_pad), lambda k: (0, 0))],
      out_specs=pl.BlockSpec((1, l_pad), lambda k: (0, 0)),
      scratch_shapes=[pltpu.VMEM((g_pad, c), jnp.float32)],
      compiler_params=_mosaic_params("arbitrary"),
  )(S, H, src_sel, tgt_sel)


# ----------------------------------------------------------------------------
# Parameter init (deterministic, synthetic)
# ----------------------------------------------------------------------------
def _glorot(key, shape):
  fan_in, fan_out = shape
  lim = (6.0 / (fan_in + fan_out)) ** 0.5
  return jax.random.uniform(key, shape, jnp.float32, -lim, lim)


def _bn_params(c):
  gamma = (1.0 + 0.01 * jnp.arange(c, dtype=jnp.float32)).reshape(1, c)
  beta = (0.02 * jnp.arange(c, dtype=jnp.float32)).reshape(1, c)
  mean = (0.01 * jnp.arange(c, dtype=jnp.float32)).reshape(1, c)
  var = (1.0 + 0.05 * jnp.arange(c, dtype=jnp.float32)).reshape(1, c)
  return gamma, beta, mean, var


def init_params(key, in_channels, hidden_channels, out_channels):
  h, h2, h4 = hidden_channels, hidden_channels // 2, hidden_channels // 4
  ks = jax.random.split(key, 8)
  return {
      # GCNConv(in, h)
      "w1": _glorot(ks[0], (in_channels, h)),
      "b1": jnp.zeros((1, h), jnp.float32),
      "bn1": _bn_params(h),
      # SAGEConv(h, h//2): lin_l (neighbors, bias) + lin_r (root, no bias)
      "w2_l": _glorot(ks[1], (h, h2)),
      "w2_r": _glorot(ks[2], (h, h2)),
      "b2": jnp.zeros((1, h2), jnp.float32),
      "bn2": _bn_params(h2),
      # GCNConv(h//2, h//4)
      "w3": _glorot(ks[3], (h2, h4)),
      "b3": jnp.zeros((1, h4), jnp.float32),
      "bn3": _bn_params(h4),
      # GCNConv(h//4, out)
      "w4": _glorot(ks[4], (h4, out_channels)),
      "b4": jnp.zeros((1, out_channels), jnp.float32),
  }


# ----------------------------------------------------------------------------
# SEALModel forward
# TODO(synk): dense O(N^2) adjacency is still materialised (once, bf16); a
# sparse / segment-sum (scalar-prefetch) formulation is the structural fix for
# very large graphs.
# ----------------------------------------------------------------------------
def seal_forward(params, x, edge_index, batch, link_indices, num_graphs):
  n = x.shape[0]
  if batch is None or batch.size == 0 or batch.shape[0] != n:
    batch = jnp.arange(n, dtype=jnp.int32)
    num_graphs = n

  npad, tile_m, tile_k = _choose_tiles(n)
  pad_n = npad - n

  # Single dense bf16 A^T (rows = targets, cols = sources); entries are
  # exactly 0/1 so bf16 is exact.  Degree normalisation stays in fp32 vectors
  # and is folded into the kernels - no fp32 N^2 pre-pass, no second matrix.
  src_e = edge_index[0].astype(jnp.int32)
  tgt_e = edge_index[1].astype(jnp.int32)
  at = jnp.zeros((npad, npad), jnp.bfloat16).at[tgt_e, src_e].set(1.0)

  valid = (jnp.arange(npad) < n).astype(jnp.float32)[:, None]     # (npad, 1)
  indeg = jnp.sum(at, axis=1, dtype=jnp.float32)[:, None]         # (npad, 1)
  deg_gcn = indeg + valid                                         # A + I degree
  dis = jnp.where(deg_gcn > 0.0, jax.lax.rsqrt(deg_gcn), 0.0)     # D^-1/2
  sage_rs = 1.0 / jnp.maximum(indeg, 1.0)                         # mean-agg scale

  x_pad = jnp.pad(x.astype(jnp.float32), ((0, pad_n), (0, 0)))
  x_scaled = (x_pad * dis).astype(jnp.bfloat16)   # column factor folded into X

  # conv1 (GCN in->hid): aggregate the narrow raw features (N x N matmul
  # width = in_channels), apply W1 + bias + bn1 + leaky_relu in the epilogue.
  # dropout = identity in eval mode.
  h = prop_layer(at, x_scaled, dis, params["b1"], z_self=x_scaled,
                 w_post=params["w1"], bn=params["bn1"], act=True,
                 valid=valid, tile_m=tile_m, tile_k=tile_k,
                 out_dtype=jnp.bfloat16)

  # conv2 (SAGE mean hid->hid/2): pre-transform Z = H @ W_l (narrower stream);
  # root term H @ W_r fused into the epilogue (H row-block + resident W_r).
  z2 = linear_rows(h, params["w2_l"], tile_m=tile_m, out_dtype=jnp.bfloat16)
  h = prop_layer(at, z2, sage_rs, params["b2"], h_root=h,
                 w_root=params["w2_r"], bn=params["bn2"], act=True,
                 valid=valid, tile_m=tile_m, tile_k=tile_k,
                 out_dtype=jnp.bfloat16)

  # conv3 (GCN hid/2->hid/4): pre-transform with the D^-1/2 column factor
  # folded into the small linear (Z' = (H @ W3) * dis per row).
  z3 = linear_rows(h, params["w3"], tile_m=tile_m, out_dtype=jnp.bfloat16,
                   row_scale=dis)
  h = prop_layer(at, z3, dis, params["b3"], z_self=z3, bn=params["bn3"],
                 act=True, valid=valid, tile_m=tile_m, tile_k=tile_k,
                 out_dtype=jnp.bfloat16)

  # conv4 (GCN hid/4->out): no BN / activation; fp32 output for the tail.
  z4 = linear_rows(h, params["w4"], tile_m=tile_m, out_dtype=jnp.bfloat16,
                   row_scale=dis)
  h = prop_layer(at, z4, dis, params["b4"], z_self=z4, bn=None, act=False,
                 valid=valid, tile_m=tile_m, tile_k=tile_k,
                 out_dtype=jnp.float32)

  # fused tail: global_add_pool (S @ H) + link dot + sigmoid.
  g_pad = _round_up(max(int(num_graphs), 1), 8)
  batch_pad = jnp.pad(batch.astype(jnp.int32), (0, pad_n), constant_values=-1)
  s = (batch_pad[None, :] ==
       jnp.arange(g_pad, dtype=jnp.int32)[:, None]).astype(jnp.bfloat16)

  n_links = link_indices.shape[1]
  l_pad = _round_up(n_links, 128)   # lane-dense score output

  def one_hot_links(idx):
    oh = (idx[:, None] ==
          jnp.arange(g_pad, dtype=jnp.int32)[None, :]).astype(jnp.float32)
    return jnp.pad(oh, ((0, l_pad - n_links), (0, 0)))

  src_sel = one_hot_links(link_indices[0].astype(jnp.int32))
  tgt_sel = one_hot_links(link_indices[1].astype(jnp.int32))

  scores = pool_and_link(s, h, src_sel, tgt_sel, tile_k=tile_k)
  return scores[0, :n_links]


# ----------------------------------------------------------------------------
# Pure-JAX fp32 reference (dense propagation matrices) for a cross-check
# ----------------------------------------------------------------------------
def dense_adj(edge_index, num_nodes):
  src, tgt = edge_index[0], edge_index[1]
  a = jnp.zeros((num_nodes, num_nodes), jnp.float32)
  return a.at[src, tgt].set(1.0)


def gcn_propagation(a):
  n = a.shape[0]
  a_tilde = a + jnp.eye(n, dtype=jnp.float32)
  deg = jnp.sum(a_tilde, axis=0)
  dis = jnp.where(deg > 0, jax.lax.rsqrt(deg), 0.0)
  return dis[:, None] * a_tilde.T * dis[None, :]


def sage_mean_propagation(a):
  indeg = jnp.sum(a, axis=0)
  return a.T / jnp.maximum(indeg, 1.0)[:, None]


def seal_reference(params, x, edge_index, batch, link_indices, num_graphs):
  n = x.shape[0]
  a = dense_adj(edge_index, n)
  pg = gcn_propagation(a)
  ps = sage_mean_propagation(a)

  def bn(y, p):
    g, b_, m, v = p
    return (y - m) * jax.lax.rsqrt(v + BN_EPS) * g + b_

  lrelu = lambda y: jnp.where(y >= 0.0, y, NEG_SLOPE * y)
  h = lrelu(bn(pg @ x @ params["w1"] + params["b1"], params["bn1"]))
  h = lrelu(bn(ps @ h @ params["w2_l"] + h @ params["w2_r"] + params["b2"],
               params["bn2"]))
  h = lrelu(bn(pg @ h @ params["w3"] + params["b3"], params["bn3"]))
  h = pg @ h @ params["w4"] + params["b4"]
  s = (batch[None, :] ==
       jnp.arange(num_graphs, dtype=jnp.int32)[:, None]).astype(jnp.float32)
  emb = s @ h
  src, tgt = emb[link_indices[0]], emb[link_indices[1]]
  return jax.nn.sigmoid(jnp.sum(src * tgt, axis=1))


# ----------------------------------------------------------------------------
# Example run
# ----------------------------------------------------------------------------
if __name__ == "__main__":
  IN_CHANNELS = 8
  HIDDEN_CHANNELS = 32
  OUT_CHANNELS = 8
  NODES_PER_GRAPH = 20
  NUM_GRAPHS = 8
  N = NODES_PER_GRAPH * NUM_GRAPHS  # 160 nodes -> npad 256 -> 2 row blocks

  key = jax.random.PRNGKey(0)
  k_param, k_x = jax.random.split(key)

  params = init_params(k_param, IN_CHANNELS, HIDDEN_CHANNELS, OUT_CHANNELS)
  x = jax.random.normal(k_x, (N, IN_CHANNELS), jnp.float32)

  # deterministic bidirectional ring inside each small graph
  src, tgt = [], []
  for g in range(NUM_GRAPHS):
    base = g * NODES_PER_GRAPH
    for i in range(NODES_PER_GRAPH):
      u, v = base + i, base + (i + 1) % NODES_PER_GRAPH
      src += [u, v]
      tgt += [v, u]
  edge_index = jnp.array([src, tgt], dtype=jnp.int32)

  batch = jnp.repeat(jnp.arange(NUM_GRAPHS, dtype=jnp.int32), NODES_PER_GRAPH)
  link_indices = jnp.array([[0, 1, 2, 3, 4], [1, 2, 3, 4, 5]], dtype=jnp.int32)

  fwd = jax.jit(functools.partial(seal_forward, num_graphs=NUM_GRAPHS))
  link_pred = fwd(params, x, edge_index, batch, link_indices)
  link_pred = jax.block_until_ready(link_pred)

  assert link_pred.shape == (5,)
  assert bool(jnp.all(jnp.isfinite(link_pred)))
  assert bool(jnp.all((link_pred >= 0.0) & (link_pred <= 1.0)))

  # cross-check vs a pure-JAX fp32 reference (kernels stream bf16 operands)
  ref = seal_reference(params, x, edge_index, batch, link_indices, NUM_GRAPHS)
  assert bool(jnp.max(jnp.abs(link_pred - ref)) < 0.1)

  print("KERNEL_OK")
</pallas_src>

<mosaic_0001>
module attributes {stable_mosaic.version = 11 : i64} {
  func.func @kernel(%arg0: i32, %arg1: i32, %arg2: memref<128x256xbf16, #tpu.memory_space<vmem>>, %arg3: memref<256x8xbf16, #tpu.memory_space<vmem>>, %arg4: memref<128x8xbf16, #tpu.memory_space<vmem>>, %arg5: memref<128x1xf32, #tpu.memory_space<vmem>>, %arg6: memref<8x32xf32, #tpu.memory_space<vmem>>, %arg7: memref<1x32xf32, #tpu.memory_space<vmem>>, %arg8: memref<1x32xf32, #tpu.memory_space<vmem>>, %arg9: memref<1x32xf32, #tpu.memory_space<vmem>>, %arg10: memref<1x32xf32, #tpu.memory_space<vmem>>, %arg11: memref<1x32xf32, #tpu.memory_space<vmem>>, %arg12: memref<128x1xf32, #tpu.memory_space<vmem>>, %arg13: memref<128x32xbf16, #tpu.memory_space<vmem>>, %arg14: memref<128x8xf32, #tpu.memory_space<vmem>>) attributes {dimension_semantics = [#tpu.dimension_semantics<parallel>, #tpu.dimension_semantics<arbitrary>], iteration_bounds = array<i64: 2, 1>, scalar_prefetch = 0 : i64, scratch_operands = 1 : i64, tpu.core_type = #tpu.core_type<tc>, window_params = [{transform_indices = @transform_0, window_bounds = array<i64: 128, 256>}, {transform_indices = @transform_1, window_bounds = array<i64: 256, 8>}, {transform_indices = @transform_2, window_bounds = array<i64: 128, 8>}, {transform_indices = @transform_3, window_bounds = array<i64: 128, 1>}, {pipeline_mode = #tpu.pipeline_mode<synchronous>, transform_indices = @transform_4, window_bounds = array<i64: 8, 32>}, {pipeline_mode = #tpu.pipeline_mode<synchronous>, transform_indices = @transform_5, window_bounds = array<i64: 1, 32>}, {pipeline_mode = #tpu.pipeline_mode<synchronous>, transform_indices = @transform_6, window_bounds = array<i64: 1, 32>}, {pipeline_mode = #tpu.pipeline_mode<synchronous>, transform_indices = @transform_7, window_bounds = array<i64: 1, 32>}, {pipeline_mode = #tpu.pipeline_mode<synchronous>, transform_indices = @transform_8, window_bounds = array<i64: 1, 32>}, {pipeline_mode = #tpu.pipeline_mode<synchronous>, transform_indices = @transform_9, window_bounds = array<i64: 1, 32>}, {transform_indices = @transform_10, window_bounds = array<i64: 128, 1>}, {transform_indices = @transform_11, window_bounds = array<i64: 128, 32>}]} {
    %c0_i32 = arith.constant 0 : i32
    %0 = arith.cmpi eq, %arg1, %c0_i32 : i32
    %1 = arith.extui %0 : i1 to i32
    %c0_i32_0 = arith.constant 0 : i32
    %2 = arith.cmpi ne, %1, %c0_i32_0 : i32
    scf.if %2 {
      %cst_10 = arith.constant 0.000000e+00 : f32
      %12 = vector.broadcast %cst_10 : f32 to vector<128x8xf32>
      %c0_11 = arith.constant 0 : index
      %c0_12 = arith.constant 0 : index
      %13 = vector.load %arg14[%c0_11, %c0_12] : memref<128x8xf32, #tpu.memory_space<vmem>>, vector<128x8xf32>
      tpu.vector_store %arg14[%c0_11, %c0_12], %12 {strides = array<i32>} : memref<128x8xf32, #tpu.memory_space<vmem>>, vector<128x8xf32>,
    } else {
    }
    %c0 = arith.constant 0 : index
    %c0_1 = arith.constant 0 : index
    %3 = vector.load %arg14[%c0, %c0_1] : memref<128x8xf32, #tpu.memory_space<vmem>>, vector<128x8xf32>
    %c0_2 = arith.constant 0 : index
    %c0_3 = arith.constant 0 : index
    %4 = vector.load %arg2[%c0_2, %c0_3] : memref<128x256xbf16, #tpu.memory_space<vmem>>, vector<128x256xbf16>
    %c0_4 = arith.constant 0 : index
    %c0_5 = arith.constant 0 : index
    %5 = vector.load %arg3[%c0_4, %c0_5] : memref<256x8xbf16, #tpu.memory_space<vmem>>, vector<256x8xbf16>
    %cst = arith.constant dense<0.000000e+00> : vector<128x8xf32>
    %6 = tpu.matmul %4, %5, %cst {dimension_numbers = #tpu.dot_dimension_numbers<[1], [0], [0], [1], [0, 0, 1, 1], [], []>} : vector<128x256xbf16>, vector<256x8xbf16>, vector<128x8xf32> -> vector<128x8xf32>
    %7 = arith.addf %3, %6 : vector<128x8xf32>
    %c0_6 = arith.constant 0 : index
    %c0_7 = arith.constant 0 : index
    %8 = vector.load %arg14[%c0_6, %c0_7] : memref<128x8xf32, #tpu.memory_space<vmem>>, vector<128x8xf32>
    tpu.vector_store %arg14[%c0_6, %c0_7], %7 {strides = array<i32>} : memref<128x8xf32, #tpu.memory_space<vmem>>, vector<128x8xf32>,
    %c0_i32_8 = arith.constant 0 : i32
    %9 = arith.cmpi eq, %arg1, %c0_i32_8 : i32
    %10 = arith.extui %9 : i1 to i32
    %c0_i32_9 = arith.constant 0 : i32
    %11 = arith.cmpi ne, %10, %c0_i32_9 : i32
    scf.if %11 {
      %c0_10 = arith.constant 0 : index
      %c0_11 = arith.constant 0 : index
      %12 = vector.load %arg14[%c0_10, %c0_11] : memref<128x8xf32, #tpu.memory_space<vmem>>, vector<128x8xf32>
      %c0_12 = arith.constant 0 : index
      %c0_13 = arith.constant 0 : index
      %13 = vector.load %arg4[%c0_12, %c0_13] : memref<128x8xbf16, #tpu.memory_space<vmem>>, vector<128x8xbf16>
      %14 = arith.extf %13 : vector<128x8xbf16> to vector<128x8xf32>
      %15 = arith.addf %12, %14 : vector<128x8xf32>
      %c0_14 = arith.constant 0 : index
      %c0_15 = arith.constant 0 : index
      %16 = vector.load %arg5[%c0_14, %c0_15] : memref<128x1xf32, #tpu.memory_space<vmem>>, vector<128x1xf32>
      %17 = vector.broadcast %16 : vector<128x1xf32> to vector<128x8xf32>
      %18 = arith.mulf %15, %17 : vector<128x8xf32>
      %c0_16 = arith.constant 0 : index
      %c0_17 = arith.constant 0 : index
      %19 = vector.load %arg6[%c0_16, %c0_17] : memref<8x32xf32, #tpu.memory_space<vmem>>, vector<8x32xf32>
      %cst_18 = arith.constant dense<0.000000e+00> : vector<128x32xf32>
      %20 = tpu.matmul %18, %19, %cst_18 {dimension_numbers = #tpu.dot_dimension_numbers<[1], [0], [0], [1], [0, 0, 1, 1], [], []>} : vector<128x8xf32>, vector<8x32xf32>, vector<128x32xf32> -> vector<128x32xf32>
      %c0_19 = arith.constant 0 : index
      %c0_20 = arith.constant 0 : index
      %21 = vector.load %arg7[%c0_19, %c0_20] : memref<1x32xf32, #tpu.memory_space<vmem>>, vector<1x32xf32>
      %22 = vector.broadcast %21 : vector<1x32xf32> to vector<128x32xf32>
      %23 = arith.addf %20, %22 : vector<128x32xf32>
      %c0_21 = arith.constant 0 : index
      %c0_22 = arith.constant 0 : index
      %24 = vector.load %arg11[%c0_21, %c0_22] : memref<1x32xf32, #tpu.memory_space<vmem>>, vector<1x32xf32>
      %cst_23 = arith.constant 9.99999974E-6 : f32
      %25 = vector.broadcast %cst_23 : f32 to vector<1x32xf32>
      %26 = arith.addf %24, %25 : vector<1x32xf32>
      %27 = math.rsqrt %26 : vector<1x32xf32>
      %c0_24 = arith.constant 0 : index
      %c0_25 = arith.constant 0 : index
      %28 = vector.load %arg10[%c0_24, %c0_25] : memref<1x32xf32, #tpu.memory_space<vmem>>, vector<1x32xf32>
      %29 = vector.broadcast %28 : vector<1x32xf32> to vector<128x32xf32>
      %30 = arith.subf %23, %29 : vector<128x32xf32>
      %31 = vector.broadcast %27 : vector<1x32xf32> to vector<128x32xf32>
      %32 = arith.mulf %30, %31 : vector<128x32xf32>
      %c0_26 = arith.constant 0 : index
      %c0_27 = arith.constant 0 : index
      %33 = vector.load %arg8[%c0_26, %c0_27] : memref<1x32xf32, #tpu.memory_space<vmem>>, vector<1x32xf32>
      %34 = vector.broadcast %33 : vector<1x32xf32> to vector<128x32xf32>
      %35 = arith.mulf %32, %34 : vector<128x32xf32>
      %c0_28 = arith.constant 0 : index
      %c0_29 = arith.constant 0 : index
      %36 = vector.load %arg9[%c0_28, %c0_29] : memref<1x32xf32, #tpu.memory_space<vmem>>, vector<1x32xf32>
      %37 = vector.broadcast %36 : vector<1x32xf32> to vector<128x32xf32>
      %38 = arith.addf %35, %37 : vector<128x32xf32>
      %cst_30 = arith.constant 0.000000e+00 : f32
      %39 = vector.broadcast %cst_30 : f32 to vector<128x32xf32>
      %40 = arith.cmpf oge, %38, %39 : vector<128x32xf32>
      %cst_31 = arith.constant 0.00999999977 : f32
      %41 = vector.broadcast %cst_31 : f32 to vector<128x32xf32>
      %42 = arith.mulf %41, %38 : vector<128x32xf32>
      %43 = arith.select %40, %38, %42 : vector<128x32xi1>, vector<128x32xf32>
      %c0_32 = arith.constant 0 : index
      %c0_33 = arith.constant 0 : index
      %44 = vector.load %arg12[%c0_32, %c0_33] : memref<128x1xf32, #tpu.memory_space<vmem>>, vector<128x1xf32>
      %45 = vector.broadcast %44 : vector<128x1xf32> to vector<128x32xf32>
      %46 = arith.mulf %43, %45 : vector<128x32xf32>
      %47 = arith.truncf %46 : vector<128x32xf32> to vector<128x32xbf16>
      %c0_34 = arith.constant 0 : index
      %c0_35 = arith.constant 0 : index
      %48 = vector.load %arg13[%c0_34, %c0_35] : memref<128x32xbf16, #tpu.memory_space<vmem>>, vector<128x32xbf16>
      tpu.vector_store %arg13[%c0_34, %c0_35], %47 {strides = array<i32>} : memref<128x32xbf16, #tpu.memory_space<vmem>>, vector<128x32xbf16>,
    } else {
    }
    return
  }
  func.func @transform_0(%arg0: i32, %arg1: i32) -> (i32, i32) {
    %c0_i32 = arith.constant 0 : i32
    return %arg0, %arg1 : i32, i32
  }
  func.func @transform_1(%arg0: i32, %arg1: i32) -> (i32, i32) {
    %c0_i32 = arith.constant 0 : i32
    %c0_i32_0 = arith.constant 0 : i32
    return %arg1, %c0_i32 : i32, i32
  }
  func.func @transform_2(%arg0: i32, %arg1: i32) -> (i32, i32) {
    %c0_i32 = arith.constant 0 : i32
    %c0_i32_0 = arith.constant 0 : i32
    return %arg0, %c0_i32 : i32, i32
  }
  func.func @transform_3(%arg0: i32, %arg1: i32) -> (i32, i32) {
    %c0_i32 = arith.constant 0 : i32
    %c0_i32_0 = arith.constant 0 : i32
    return %arg0, %c0_i32 : i32, i32
  }
  func.func @transform_4(%arg0: i32, %arg1: i32) -> (i32, i32) {
    %c0_i32 = arith.constant 0 : i32
    %c0_i32_0 = arith.constant 0 : i32
    %c0_i32_1 = arith.constant 0 : i32
    return %c0_i32, %c0_i32_0 : i32, i32
  }
  func.func @transform_5(%arg0: i32, %arg1: i32) -> (i32, i32) {
    %c0_i32 = arith.constant 0 : i32
    %c0_i32_0 = arith.constant 0 : i32
    %c0_i32_1 = arith.constant 0 : i32
    return %c0_i32, %c0_i32_0 : i32, i32
  }
  func.func @transform_6(%arg0: i32, %arg1: i32) -> (i32, i32) {
    %c0_i32 = arith.constant 0 : i32
    %c0_i32_0 = arith.constant 0 : i32
    %c0_i32_1 = arith.constant 0 : i32
    return %c0_i32, %c0_i32_0 : i32, i32
  }
  func.func @transform_7(%arg0: i32, %arg1: i32) -> (i32, i32) {
    %c0_i32 = arith.constant 0 : i32
    %c0_i32_0 = arith.constant 0 : i32
    %c0_i32_1 = arith.constant 0 : i32
    return %c0_i32, %c0_i32_0 : i32, i32
  }
  func.func @transform_8(%arg0: i32, %arg1: i32) -> (i32, i32) {
    %c0_i32 = arith.constant 0 : i32
    %c0_i32_0 = arith.constant 0 : i32
    %c0_i32_1 = arith.constant 0 : i32
    return %c0_i32, %c0_i32_0 : i32, i32
  }
  func.func @transform_9(%arg0: i32, %arg1: i32) -> (i32, i32) {
    %c0_i32 = arith.constant 0 : i32
    %c0_i32_0 = arith.constant 0 : i32
    %c0_i32_1 = arith.constant 0 : i32
    return %c0_i32, %c0_i32_0 : i32, i32
  }
  func.func @transform_10(%arg0: i32, %arg1: i32) -> (i32, i32) {
    %c0_i32 = arith.constant 0 : i32
    %c0_i32_0 = arith.constant 0 : i32
    return %arg0, %c0_i32 : i32, i32
  }
  func.func @transform_11(%arg0: i32, %arg1: i32) -> (i32, i32) {
    %c0_i32 = arith.constant 0 : i32
    %c0_i32_0 = arith.constant 0 : i32
    return %arg0, %c0_i32 : i32, i32
  }
}

module attributes {stable_mosaic.version = 11 : i64} {
  func.func @kernel(%arg0: i32, %arg1: memref<128x32xbf16, #tpu.memory_space<vmem>>, %arg2: memref<32x16xf32, #tpu.memory_space<vmem>>, %arg3: memref<128x16xbf16, #tpu.memory_space<vmem>>) attributes {dimension_semantics = [#tpu.dimension_semantics<parallel>], iteration_bounds = array<i64: 2>, scalar_prefetch = 0 : i64, scratch_operands = 0 : i64, tpu.core_type = #tpu.core_type<tc>, window_params = [{transform_indices = @transform_0, window_bounds = array<i64: 128, 32>}, {pipeline_mode = #tpu.pipeline_mode<synchronous>, transform_indices = @transform_1, window_bounds = array<i64: 32, 16>}, {transform_indices = @transform_2, window_bounds = array<i64: 128, 16>}]} {
    %c0 = arith.constant 0 : index
    %c0_0 = arith.constant 0 : index
    %0 = vector.load %arg1[%c0, %c0_0] : memref<128x32xbf16, #tpu.memory_space<vmem>>, vector<128x32xbf16>
    %c0_1 = arith.constant 0 : index
    %c0_2 = arith.constant 0 : index
    %1 = vector.load %arg2[%c0_1, %c0_2] : memref<32x16xf32, #tpu.memory_space<vmem>>, vector<32x16xf32>
    %cst = arith.constant dense<0.000000e+00> : vector<128x16xf32>
    %2 = tpu.matmul %0, %1, %cst {dimension_numbers = #tpu.dot_dimension_numbers<[1], [0], [0], [1], [0, 0, 1, 1], [], []>} : vector<128x32xbf16>, vector<32x16xf32>, vector<128x16xf32> -> vector<128x16xf32>
    %3 = arith.truncf %2 : vector<128x16xf32> to vector<128x16xbf16>
    %c0_3 = arith.constant 0 : index
    %c0_4 = arith.constant 0 : index
    %4 = vector.load %arg3[%c0_3, %c0_4] : memref<128x16xbf16, #tpu.memory_space<vmem>>, vector<128x16xbf16>
    tpu.vector_store %arg3[%c0_3, %c0_4], %3 {strides = array<i32>} : memref<128x16xbf16, #tpu.memory_space<vmem>>, vector<128x16xbf16>,
    return
  }
  func.func @transform_0(%arg0: i32) -> (i32, i32) {
    %c0_i32 = arith.constant 0 : i32
    %c0_i32_0 = arith.constant 0 : i32
    return %arg0, %c0_i32 : i32, i32
  }
  func.func @transform_1(%arg0: i32) -> (i32, i32) {
    %c0_i32 = arith.constant 0 : i32
    %c0_i32_0 = arith.constant 0 : i32
    %c0_i32_1 = arith.constant 0 : i32
    return %c0_i32, %c0_i32_0 : i32, i32
  }
  func.func @transform_2(%arg0: i32) -> (i32, i32) {
    %c0_i32 = arith.constant 0 : i32
    %c0_i32_0 = arith.constant 0 : i32
    return %arg0, %c0_i32 : i32, i32
  }
}

module attributes {stable_mosaic.version = 11 : i64} {
  func.func @kernel(%arg0: i32, %arg1: i32, %arg2: memref<128x256xbf16, #tpu.memory_space<vmem>>, %arg3: memref<256x16xbf16, #tpu.memory_space<vmem>>, %arg4: memref<128x1xf32, #tpu.memory_space<vmem>>, %arg5: memref<128x32xbf16, #tpu.memory_space<vmem>>, %arg6: memref<32x16xf32, #tpu.memory_space<vmem>>, %arg7: memref<1x16xf32, #tpu.memory_space<vmem>>, %arg8: memref<1x16xf32, #tpu.memory_space<vmem>>, %arg9: memref<1x16xf32, #tpu.memory_space<vmem>>, %arg10: memref<1x16xf32, #tpu.memory_space<vmem>>, %arg11: memref<1x16xf32, #tpu.memory_space<vmem>>, %arg12: memref<128x1xf32, #tpu.memory_space<vmem>>, %arg13: memref<128x16xbf16, #tpu.memory_space<vmem>>, %arg14: memref<128x16xf32, #tpu.memory_space<vmem>>) attributes {dimension_semantics = [#tpu.dimension_semantics<parallel>, #tpu.dimension_semantics<arbitrary>], iteration_bounds = array<i64: 2, 1>, scalar_prefetch = 0 : i64, scratch_operands = 1 : i64, tpu.core_type = #tpu.core_type<tc>, window_params = [{transform_indices = @transform_0, window_bounds = array<i64: 128, 256>}, {transform_indices = @transform_1, window_bounds = array<i64: 256, 16>}, {transform_indices = @transform_2, window_bounds = array<i64: 128, 1>}, {transform_indices = @transform_3, window_bounds = array<i64: 128, 32>}, {pipeline_mode = #tpu.pipeline_mode<synchronous>, transform_indices = @transform_4, window_bounds = array<i64: 32, 16>}, {pipeline_mode = #tpu.pipeline_mode<synchronous>, transform_indices = @transform_5, window_bounds = array<i64: 1, 16>}, {pipeline_mode = #tpu.pipeline_mode<synchronous>, transform_indices = @transform_6, window_bounds = array<i64: 1, 16>}, {pipeline_mode = #tpu.pipeline_mode<synchronous>, transform_indices = @transform_7, window_bounds = array<i64: 1, 16>}, {pipeline_mode = #tpu.pipeline_mode<synchronous>, transform_indices = @transform_8, window_bounds = array<i64: 1, 16>}, {pipeline_mode = #tpu.pipeline_mode<synchronous>, transform_indices = @transform_9, window_bounds = array<i64: 1, 16>}, {transform_indices = @transform_10, window_bounds = array<i64: 128, 1>}, {transform_indices = @transform_11, window_bounds = array<i64: 128, 16>}]} {
    %c0_i32 = arith.constant 0 : i32
    %0 = arith.cmpi eq, %arg1, %c0_i32 : i32
    %1 = arith.extui %0 : i1 to i32
    %c0_i32_0 = arith.constant 0 : i32
    %2 = arith.cmpi ne, %1, %c0_i32_0 : i32
    scf.if %2 {
      %cst_10 = arith.constant 0.000000e+00 : f32
      %12 = vector.broadcast %cst_10 : f32 to vector<128x16xf32>
      %c0_11 = arith.constant 0 : index
      %c0_12 = arith.constant 0 : index
      %13 = vector.load %arg14[%c0_11, %c0_12] : memref<128x16xf32, #tpu.memory_space<vmem>>, vector<128x16xf32>
      tpu.vector_store %arg14[%c0_11, %c0_12], %12 {strides = array<i32>} : memref<128x16xf32, #tpu.memory_space<vmem>>, vector<128x16xf32>,
    } else {
    }
    %c0 = arith.constant 0 : index
    %c0_1 = arith.constant 0 : index
    %3 = vector.load %arg14[%c0, %c0_1] : memref<128x16xf32, #tpu.memory_space<vmem>>, vector<128x16xf32>
    %c0_2 = arith.constant 0 : index
    %c0_3 = arith.constant 0 : index
    %4 = vector.load %arg2[%c0_2, %c0_3] : memref<128x256xbf16, #tpu.memory_space<vmem>>, vector<128x256xbf16>
    %c0_4 = arith.constant 0 : index
    %c0_5 = arith.constant 0 : index
    %5 = vector.load %arg3[%c0_4, %c0_5] : memref<256x16xbf16, #tpu.memory_space<vmem>>, vector<256x16xbf16>
    %cst = arith.constant dense<0.000000e+00> : vector<128x16xf32>
    %6 = tpu.matmul %4, %5, %cst {dimension_numbers = #tpu.dot_dimension_numbers<[1], [0], [0], [1], [0, 0, 1, 1], [], []>} : vector<128x256xbf16>, vector<256x16xbf16>, vector<128x16xf32> -> vector<128x16xf32>
    %7 = arith.addf %3, %6 : vector<128x16xf32>
    %c0_6 = arith.constant 0 : index
    %c0_7 = arith.constant 0 : index
    %8 = vector.load %arg14[%c0_6, %c0_7] : memref<128x16xf32, #tpu.memory_space<vmem>>, vector<128x16xf32>
    tpu.vector_store %arg14[%c0_6, %c0_7], %7 {strides = array<i32>} : memref<128x16xf32, #tpu.memory_space<vmem>>, vector<128x16xf32>,
    %c0_i32_8 = arith.constant 0 : i32
    %9 = arith.cmpi eq, %arg1, %c0_i32_8 : i32
    %10 = arith.extui %9 : i1 to i32
    %c0_i32_9 = arith.constant 0 : i32
    %11 = arith.cmpi ne, %10, %c0_i32_9 : i32
    scf.if %11 {
      %c0_10 = arith.constant 0 : index
      %c0_11 = arith.constant 0 : index
      %12 = vector.load %arg14[%c0_10, %c0_11] : memref<128x16xf32, #tpu.memory_space<vmem>>, vector<128x16xf32>
      %c0_12 = arith.constant 0 : index
      %c0_13 = arith.constant 0 : index
      %13 = vector.load %arg4[%c0_12, %c0_13] : memref<128x1xf32, #tpu.memory_space<vmem>>, vector<128x1xf32>
      %14 = vector.broadcast %13 : vector<128x1xf32> to vector<128x16xf32>
      %15 = arith.mulf %12, %14 : vector<128x16xf32>
      %c0_14 = arith.constant 0 : index
      %c0_15 = arith.constant 0 : index
      %16 = vector.load %arg7[%c0_14, %c0_15] : memref<1x16xf32, #tpu.memory_space<vmem>>, vector<1x16xf32>
      %17 = vector.broadcast %16 : vector<1x16xf32> to vector<128x16xf32>
      %18 = arith.addf %15, %17 : vector<128x16xf32>
      %c0_16 = arith.constant 0 : index
      %c0_17 = arith.constant 0 : index
      %19 = vector.load %arg5[%c0_16, %c0_17] : memref<128x32xbf16, #tpu.memory_space<vmem>>, vector<128x32xbf16>
      %c0_18 = arith.constant 0 : index
      %c0_19 = arith.constant 0 : index
      %20 = vector.load %arg6[%c0_18, %c0_19] : memref<32x16xf32, #tpu.memory_space<vmem>>, vector<32x16xf32>
      %cst_20 = arith.constant dense<0.000000e+00> : vector<128x16xf32>
      %21 = tpu.matmul %19, %20, %cst_20 {dimension_numbers = #tpu.dot_dimension_numbers<[1], [0], [0], [1], [0, 0, 1, 1], [], []>} : vector<128x32xbf16>, vector<32x16xf32>, vector<128x16xf32> -> vector<128x16xf32>
      %22 = arith.addf %18, %21 : vector<128x16xf32>
      %c0_21 = arith.constant 0 : index
      %c0_22 = arith.constant 0 : index
      %23 = vector.load %arg11[%c0_21, %c0_22] : memref<1x16xf32, #tpu.memory_space<vmem>>, vector<1x16xf32>
      %cst_23 = arith.constant 9.99999974E-6 : f32
      %24 = vector.broadcast %cst_23 : f32 to vector<1x16xf32>
      %25 = arith.addf %23, %24 : vector<1x16xf32>
      %26 = math.rsqrt %25 : vector<1x16xf32>
      %c0_24 = arith.constant 0 : index
      %c0_25 = arith.constant 0 : index
      %27 = vector.load %arg10[%c0_24, %c0_25] : memref<1x16xf32, #tpu.memory_space<vmem>>, vector<1x16xf32>
      %28 = vector.broadcast %27 : vector<1x16xf32> to vector<128x16xf32>
      %29 = arith.subf %22, %28 : vector<128x16xf32>
      %30 = vector.broadcast %26 : vector<1x16xf32> to vector<128x16xf32>
      %31 = arith.mulf %29, %30 : vector<128x16xf32>
      %c0_26 = arith.constant 0 : index
      %c0_27 = arith.constant 0 : index
      %32 = vector.load %arg8[%c0_26, %c0_27] : memref<1x16xf32, #tpu.memory_space<vmem>>, vector<1x16xf32>
      %33 = vector.broadcast %32 : vector<1x16xf32> to vector<128x16xf32>
      %34 = arith.mulf %31, %33 : vector<128x16xf32>
      %c0_28 = arith.constant 0 : index
      %c0_29 = arith.constant 0 : index
      %35 = vector.load %arg9[%c0_28, %c0_29] : memref<1x16xf32, #tpu.memory_space<vmem>>, vector<1x16xf32>
      %36 = vector.broadcast %35 : vector<1x16xf32> to vector<128x16xf32>
      %37 = arith.addf %34, %36 : vector<128x16xf32>
      %cst_30 = arith.constant 0.000000e+00 : f32
      %38 = vector.broadcast %cst_30 : f32 to vector<128x16xf32>
      %39 = arith.cmpf oge, %37, %38 : vector<128x16xf32>
      %cst_31 = arith.constant 0.00999999977 : f32
      %40 = vector.broadcast %cst_31 : f32 to vector<128x16xf32>
      %41 = arith.mulf %40, %37 : vector<128x16xf32>
      %42 = arith.select %39, %37, %41 : vector<128x16xi1>, vector<128x16xf32>
      %c0_32 = arith.constant 0 : index
      %c0_33 = arith.constant 0 : index
      %43 = vector.load %arg12[%c0_32, %c0_33] : memref<128x1xf32, #tpu.memory_space<vmem>>, vector<128x1xf32>
      %44 = vector.broadcast %43 : vector<128x1xf32> to vector<128x16xf32>
      %45 = arith.mulf %42, %44 : vector<128x16xf32>
      %46 = arith.truncf %45 : vector<128x16xf32> to vector<128x16xbf16>
      %c0_34 = arith.constant 0 : index
      %c0_35 = arith.constant 0 : index
      %47 = vector.load %arg13[%c0_34, %c0_35] : memref<128x16xbf16, #tpu.memory_space<vmem>>, vector<128x16xbf16>
      tpu.vector_store %arg13[%c0_34, %c0_35], %46 {strides = array<i32>} : memref<128x16xbf16, #tpu.memory_space<vmem>>, vector<128x16xbf16>,
    } else {
    }
    return
  }
  func.func @transform_0(%arg0: i32, %arg1: i32) -> (i32, i32) {
    %c0_i32 = arith.constant 0 : i32
    return %arg0, %arg1 : i32, i32
  }
  func.func @transform_1(%arg0: i32, %arg1: i32) -> (i32, i32) {
    %c0_i32 = arith.constant 0 : i32
    %c0_i32_0 = arith.constant 0 : i32
    return %arg1, %c0_i32 : i32, i32
  }
  func.func @transform_2(%arg0: i32, %arg1: i32) -> (i32, i32) {
    %c0_i32 = arith.constant 0 : i32
    %c0_i32_0 = arith.constant 0 : i32
    return %arg0, %c0_i32 : i32, i32
  }
  func.func @transform_3(%arg0: i32, %arg1: i32) -> (i32, i32) {
    %c0_i32 = arith.constant 0 : i32
    %c0_i32_0 = arith.constant 0 : i32
    return %arg0, %c0_i32 : i32, i32
  }
  func.func @transform_4(%arg0: i32, %arg1: i32) -> (i32, i32) {
    %c0_i32 = arith.constant 0 : i32
    %c0_i32_0 = arith.constant 0 : i32
    %c0_i32_1 = arith.constant 0 : i32
    return %c0_i32, %c0_i32_0 : i32, i32
  }
  func.func @transform_5(%arg0: i32, %arg1: i32) -> (i32, i32) {
    %c0_i32 = arith.constant 0 : i32
    %c0_i32_0 = arith.constant 0 : i32
    %c0_i32_1 = arith.constant 0 : i32
    return %c0_i32, %c0_i32_0 : i32, i32
  }
  func.func @transform_6(%arg0: i32, %arg1: i32) -> (i32, i32) {
    %c0_i32 = arith.constant 0 : i32
    %c0_i32_0 = arith.constant 0 : i32
    %c0_i32_1 = arith.constant 0 : i32
    return %c0_i32, %c0_i32_0 : i32, i32
  }
  func.func @transform_7(%arg0: i32, %arg1: i32) -> (i32, i32) {
    %c0_i32 = arith.constant 0 : i32
    %c0_i32_0 = arith.constant 0 : i32
    %c0_i32_1 = arith.constant 0 : i32
    return %c0_i32, %c0_i32_0 : i32, i32
  }
  func.func @transform_8(%arg0: i32, %arg1: i32) -> (i32, i32) {
    %c0_i32 = arith.constant 0 : i32
    %c0_i32_0 = arith.constant 0 : i32
    %c0_i32_1 = arith.constant 0 : i32
    return %c0_i32, %c0_i32_0 : i32, i32
  }
  func.func @transform_9(%arg0: i32, %arg1: i32) -> (i32, i32) {
    %c0_i32 = arith.constant 0 : i32
    %c0_i32_0 = arith.constant 0 : i32
    %c0_i32_1 = arith.constant 0 : i32
    return %c0_i32, %c0_i32_0 : i32, i32
  }
  func.func @transform_10(%arg0: i32, %arg1: i32) -> (i32, i32) {
    %c0_i32 = arith.constant 0 : i32
    %c0_i32_0 = arith.constant 0 : i32
    return %arg0, %c0_i32 : i32, i32
  }
  func.func @transform_11(%arg0: i32, %arg1: i32) -> (i32, i32) {
    %c0_i32 = arith.constant 0 : i32
    %c0_i32_0 = arith.constant 0 : i32
    return %arg0, %c0_i32 : i32, i32
  }
}

module attributes {stable_mosaic.version = 11 : i64} {
  func.func @kernel(%arg0: i32, %arg1: memref<128x16xbf16, #tpu.memory_space<vmem>>, %arg2: memref<16x8xf32, #tpu.memory_space<vmem>>, %arg3: memref<128x1xf32, #tpu.memory_space<vmem>>, %arg4: memref<128x8xbf16, #tpu.memory_space<vmem>>) attributes {dimension_semantics = [#tpu.dimension_semantics<parallel>], iteration_bounds = array<i64: 2>, scalar_prefetch = 0 : i64, scratch_operands = 0 : i64, tpu.core_type = #tpu.core_type<tc>, window_params = [{transform_indices = @transform_0, window_bounds = array<i64: 128, 16>}, {pipeline_mode = #tpu.pipeline_mode<synchronous>, transform_indices = @transform_1, window_bounds = array<i64: 16, 8>}, {transform_indices = @transform_2, window_bounds = array<i64: 128, 1>}, {transform_indices = @transform_3, window_bounds = array<i64: 128, 8>}]} {
    %c0 = arith.constant 0 : index
    %c0_0 = arith.constant 0 : index
    %0 = vector.load %arg1[%c0, %c0_0] : memref<128x16xbf16, #tpu.memory_space<vmem>>, vector<128x16xbf16>
    %c0_1 = arith.constant 0 : index
    %c0_2 = arith.constant 0 : index
    %1 = vector.load %arg2[%c0_1, %c0_2] : memref<16x8xf32, #tpu.memory_space<vmem>>, vector<16x8xf32>
    %cst = arith.constant dense<0.000000e+00> : vector<128x8xf32>
    %2 = tpu.matmul %0, %1, %cst {dimension_numbers = #tpu.dot_dimension_numbers<[1], [0], [0], [1], [0, 0, 1, 1], [], []>} : vector<128x16xbf16>, vector<16x8xf32>, vector<128x8xf32> -> vector<128x8xf32>
    %c0_3 = arith.constant 0 : index
    %c0_4 = arith.constant 0 : index
    %3 = vector.load %arg3[%c0_3, %c0_4] : memref<128x1xf32, #tpu.memory_space<vmem>>, vector<128x1xf32>
    %4 = vector.broadcast %3 : vector<128x1xf32> to vector<128x8xf32>
    %5 = arith.mulf %2, %4 : vector<128x8xf32>
    %6 = arith.truncf %5 : vector<128x8xf32> to vector<128x8xbf16>
    %c0_5 = arith.constant 0 : index
    %c0_6 = arith.constant 0 : index
    %7 = vector.load %arg4[%c0_5, %c0_6] : memref<128x8xbf16, #tpu.memory_space<vmem>>, vector<128x8xbf16>
    tpu.vector_store %arg4[%c0_5, %c0_6], %6 {strides = array<i32>} : memref<128x8xbf16, #tpu.memory_space<vmem>>, vector<128x8xbf16>,
    return
  }
  func.func @transform_0(%arg0: i32) -> (i32, i32) {
    %c0_i32 = arith.constant 0 : i32
    %c0_i32_0 = arith.constant 0 : i32
    return %arg0, %c0_i32 : i32, i32
  }
  func.func @transform_1(%arg0: i32) -> (i32, i32) {
    %c0_i32 = arith.constant 0 : i32
    %c0_i32_0 = arith.constant 0 : i32
    %c0_i32_1 = arith.constant 0 : i32
    return %c0_i32, %c0_i32_0 : i32, i32
  }
  func.func @transform_2(%arg0: i32) -> (i32, i32) {
    %c0_i32 = arith.constant 0 : i32
    %c0_i32_0 = arith.constant 0 : i32
    return %arg0, %c0_i32 : i32, i32
  }
  func.func @transform_3(%arg0: i32) -> (i32, i32) {
    %c0_i32 = arith.constant 0 : i32
    %c0_i32_0 = arith.constant 0 : i32
    return %arg0, %c0_i32 : i32, i32
  }
}

module attributes {stable_mosaic.version = 11 : i64} {
  func.func @kernel(%arg0: i32, %arg1: i32, %arg2: memref<128x256xbf16, #tpu.memory_space<vmem>>, %arg3: memref<256x8xbf16, #tpu.memory_space<vmem>>, %arg4: memref<128x8xbf16, #tpu.memory_space<vmem>>, %arg5: memref<128x1xf32, #tpu.memory_space<vmem>>, %arg6: memref<1x8xf32, #tpu.memory_space<vmem>>, %arg7: memref<1x8xf32, #tpu.memory_space<vmem>>, %arg8: memref<1x8xf32, #tpu.memory_space<vmem>>, %arg9: memref<1x8xf32, #tpu.memory_space<vmem>>, %arg10: memref<1x8xf32, #tpu.memory_space<vmem>>, %arg11: memref<128x1xf32, #tpu.memory_space<vmem>>, %arg12: memref<128x8xbf16, #tpu.memory_space<vmem>>, %arg13: memref<128x8xf32, #tpu.memory_space<vmem>>) attributes {dimension_semantics = [#tpu.dimension_semantics<parallel>, #tpu.dimension_semantics<arbitrary>], iteration_bounds = array<i64: 2, 1>, scalar_prefetch = 0 : i64, scratch_operands = 1 : i64, tpu.core_type = #tpu.core_type<tc>, window_params = [{transform_indices = @transform_0, window_bounds = array<i64: 128, 256>}, {transform_indices = @transform_1, window_bounds = array<i64: 256, 8>}, {transform_indices = @transform_2, window_bounds = array<i64: 128, 8>}, {transform_indices = @transform_3, window_bounds = array<i64: 128, 1>}, {pipeline_mode = #tpu.pipeline_mode<synchronous>, transform_indices = @transform_4, window_bounds = array<i64: 1, 8>}, {pipeline_mode = #tpu.pipeline_mode<synchronous>, transform_indices = @transform_5, window_bounds = array<i64: 1, 8>}, {pipeline_mode = #tpu.pipeline_mode<synchronous>, transform_indices = @transform_6, window_bounds = array<i64: 1, 8>}, {pipeline_mode = #tpu.pipeline_mode<synchronous>, transform_indices = @transform_7, window_bounds = array<i64: 1, 8>}, {pipeline_mode = #tpu.pipeline_mode<synchronous>, transform_indices = @transform_8, window_bounds = array<i64: 1, 8>}, {transform_indices = @transform_9, window_bounds = array<i64: 128, 1>}, {transform_indices = @transform_10, window_bounds = array<i64: 128, 8>}]} {
    %c0_i32 = arith.constant 0 : i32
    %0 = arith.cmpi eq, %arg1, %c0_i32 : i32
    %1 = arith.extui %0 : i1 to i32
    %c0_i32_0 = arith.constant 0 : i32
    %2 = arith.cmpi ne, %1, %c0_i32_0 : i32
    scf.if %2 {
      %cst_10 = arith.constant 0.000000e+00 : f32
      %12 = vector.broadcast %cst_10 : f32 to vector<128x8xf32>
      %c0_11 = arith.constant 0 : index
      %c0_12 = arith.constant 0 : index
      %13 = vector.load %arg13[%c0_11, %c0_12] : memref<128x8xf32, #tpu.memory_space<vmem>>, vector<128x8xf32>
      tpu.vector_store %arg13[%c0_11, %c0_12], %12 {strides = array<i32>} : memref<128x8xf32, #tpu.memory_space<vmem>>, vector<128x8xf32>,
    } else {
    }
    %c0 = arith.constant 0 : index
    %c0_1 = arith.constant 0 : index
    %3 = vector.load %arg13[%c0, %c0_1] : memref<128x8xf32, #tpu.memory_space<vmem>>, vector<128x8xf32>
    %c0_2 = arith.constant 0 : index
    %c0_3 = arith.constant 0 : index
    %4 = vector.load %arg2[%c0_2, %c0_3] : memref<128x256xbf16, #tpu.memory_space<vmem>>, vector<128x256xbf16>
    %c0_4 = arith.constant 0 : index
    %c0_5 = arith.constant 0 : index
    %5 = vector.load %arg3[%c0_4, %c0_5] : memref<256x8xbf16, #tpu.memory_space<vmem>>, vector<256x8xbf16>
    %cst = arith.constant dense<0.000000e+00> : vector<128x8xf32>
    %6 = tpu.matmul %4, %5, %cst {dimension_numbers = #tpu.dot_dimension_numbers<[1], [0], [0], [1], [0, 0, 1, 1], [], []>} : vector<128x256xbf16>, vector<256x8xbf16>, vector<128x8xf32> -> vector<128x8xf32>
    %7 = arith.addf %3, %6 : vector<128x8xf32>
    %c0_6 = arith.constant 0 : index
    %c0_7 = arith.constant 0 : index
    %8 = vector.load %arg13[%c0_6, %c0_7] : memref<128x8xf32, #tpu.memory_space<vmem>>, vector<128x8xf32>
    tpu.vector_store %arg13[%c0_6, %c0_7], %7 {strides = array<i32>} : memref<128x8xf32, #tpu.memory_space<vmem>>, vector<128x8xf32>,
    %c0_i32_8 = arith.constant 0 : i32
    %9 = arith.cmpi eq, %arg1, %c0_i32_8 : i32
    %10 = arith.extui %9 : i1 to i32
    %c0_i32_9 = arith.constant 0 : i32
    %11 = arith.cmpi ne, %10, %c0_i32_9 : i32
    scf.if %11 {
      %c0_10 = arith.constant 0 : index
      %c0_11 = arith.constant 0 : index
      %12 = vector.load %arg13[%c0_10, %c0_11] : memref<128x8xf32, #tpu.memory_space<vmem>>, vector<128x8xf32>
      %c0_12 = arith.constant 0 : index
      %c0_13 = arith.constant 0 : index
      %13 = vector.load %arg4[%c0_12, %c0_13] : memref<128x8xbf16, #tpu.memory_space<vmem>>, vector<128x8xbf16>
      %14 = arith.extf %13 : vector<128x8xbf16> to vector<128x8xf32>
      %15 = arith.addf %12, %14 : vector<128x8xf32>
      %c0_14 = arith.constant 0 : index
      %c0_15 = arith.constant 0 : index
      %16 = vector.load %arg5[%c0_14, %c0_15] : memref<128x1xf32, #tpu.memory_space<vmem>>, vector<128x1xf32>
      %17 = vector.broadcast %16 : vector<128x1xf32> to vector<128x8xf32>
      %18 = arith.mulf %15, %17 : vector<128x8xf32>
      %c0_16 = arith.constant 0 : index
      %c0_17 = arith.constant 0 : index
      %19 = vector.load %arg6[%c0_16, %c0_17] : memref<1x8xf32, #tpu.memory_space<vmem>>, vector<1x8xf32>
      %20 = vector.broadcast %19 : vector<1x8xf32> to vector<128x8xf32>
      %21 = arith.addf %18, %20 : vector<128x8xf32>
      %c0_18 = arith.constant 0 : index
      %c0_19 = arith.constant 0 : index
      %22 = vector.load %arg10[%c0_18, %c0_19] : memref<1x8xf32, #tpu.memory_space<vmem>>, vector<1x8xf32>
      %cst_20 = arith.constant 9.99999974E-6 : f32
      %23 = vector.broadcast %cst_20 : f32 to vector<1x8xf32>
      %24 = arith.addf %22, %23 : vector<1x8xf32>
      %25 = math.rsqrt %24 : vector<1x8xf32>
      %c0_21 = arith.constant 0 : index
      %c0_22 = arith.constant 0 : index
      %26 = vector.load %arg9[%c0_21, %c0_22] : memref<1x8xf32, #tpu.memory_space<vmem>>, vector<1x8xf32>
      %27 = vector.broadcast %26 : vector<1x8xf32> to vector<128x8xf32>
      %28 = arith.subf %21, %27 : vector<128x8xf32>
      %29 = vector.broadcast %25 : vector<1x8xf32> to vector<128x8xf32>
      %30 = arith.mulf %28, %29 : vector<128x8xf32>
      %c0_23 = arith.constant 0 : index
      %c0_24 = arith.constant 0 : index
      %31 = vector.load %arg7[%c0_23, %c0_24] : memref<1x8xf32, #tpu.memory_space<vmem>>, vector<1x8xf32>
      %32 = vector.broadcast %31 : vector<1x8xf32> to vector<128x8xf32>
      %33 = arith.mulf %30, %32 : vector<128x8xf32>
      %c0_25 = arith.constant 0 : index
      %c0_26 = arith.constant 0 : index
      %34 = vector.load %arg8[%c0_25, %c0_26] : memref<1x8xf32, #tpu.memory_space<vmem>>, vector<1x8xf32>
      %35 = vector.broadcast %34 : vector<1x8xf32> to vector<128x8xf32>
      %36 = arith.addf %33, %35 : vector<128x8xf32>
      %cst_27 = arith.constant 0.000000e+00 : f32
      %37 = vector.broadcast %cst_27 : f32 to vector<128x8xf32>
      %38 = arith.cmpf oge, %36, %37 : vector<128x8xf32>
      %cst_28 = arith.constant 0.00999999977 : f32
      %39 = vector.broadcast %cst_28 : f32 to vector<128x8xf32>
      %40 = arith.mulf %39, %36 : vector<128x8xf32>
      %41 = arith.select %38, %36, %40 : vector<128x8xi1>, vector<128x8xf32>
      %c0_29 = arith.constant 0 : index
      %c0_30 = arith.constant 0 : index
      %42 = vector.load %arg11[%c0_29, %c0_30] : memref<128x1xf32, #tpu.memory_space<vmem>>, vector<128x1xf32>
      %43 = vector.broadcast %42 : vector<128x1xf32> to vector<128x8xf32>
      %44 = arith.mulf %41, %43 : vector<128x8xf32>
      %45 = arith.truncf %44 : vector<128x8xf32> to vector<128x8xbf16>
      %c0_31 = arith.constant 0 : index
      %c0_32 = arith.constant 0 : index
      %46 = vector.load %arg12[%c0_31, %c0_32] : memref<128x8xbf16, #tpu.memory_space<vmem>>, vector<128x8xbf16>
      tpu.vector_store %arg12[%c0_31, %c0_32], %45 {strides = array<i32>} : memref<128x8xbf16, #tpu.memory_space<vmem>>, vector<128x8xbf16>,
    } else {
    }
    return
  }
  func.func @transform_0(%arg0: i32, %arg1: i32) -> (i32, i32) {
    %c0_i32 = arith.constant 0 : i32
    return %arg0, %arg1 : i32, i32
  }
  func.func @transform_1(%arg0: i32, %arg1: i32) -> (i32, i32) {
    %c0_i32 = arith.constant 0 : i32
    %c0_i32_0 = arith.constant 0 : i32
    return %arg1, %c0_i32 : i32, i32
  }
  func.func @transform_2(%arg0: i32, %arg1: i32) -> (i32, i32) {
    %c0_i32 = arith.constant 0 : i32
    %c0_i32_0 = arith.constant 0 : i32
    return %arg0, %c0_i32 : i32, i32
  }
  func.func @transform_3(%arg0: i32, %arg1: i32) -> (i32, i32) {
    %c0_i32 = arith.constant 0 : i32
    %c0_i32_0 = arith.constant 0 : i32
    return %arg0, %c0_i32 : i32, i32
  }
  func.func @transform_4(%arg0: i32, %arg1: i32) -> (i32, i32) {
    %c0_i32 = arith.constant 0 : i32
    %c0_i32_0 = arith.constant 0 : i32
    %c0_i32_1 = arith.constant 0 : i32
    return %c0_i32, %c0_i32_0 : i32, i32
  }
  func.func @transform_5(%arg0: i32, %arg1: i32) -> (i32, i32) {
    %c0_i32 = arith.constant 0 : i32
    %c0_i32_0 = arith.constant 0 : i32
    %c0_i32_1 = arith.constant 0 : i32
    return %c0_i32, %c0_i32_0 : i32, i32
  }
  func.func @transform_6(%arg0: i32, %arg1: i32) -> (i32, i32) {
    %c0_i32 = arith.constant 0 : i32
    %c0_i32_0 = arith.constant 0 : i32
    %c0_i32_1 = arith.constant 0 : i32
    return %c0_i32, %c0_i32_0 : i32, i32
  }
  func.func @transform_7(%arg0: i32, %arg1: i32) -> (i32, i32) {
    %c0_i32 = arith.constant 0 : i32
    %c0_i32_0 = arith.constant 0 : i32
    %c0_i32_1 = arith.constant 0 : i32
    return %c0_i32, %c0_i32_0 : i32, i32
  }
  func.func @transform_8(%arg0: i32, %arg1: i32) -> (i32, i32) {
    %c0_i32 = arith.constant 0 : i32
    %c0_i32_0 = arith.constant 0 : i32
    %c0_i32_1 = arith.constant 0 : i32
    return %c0_i32, %c0_i32_0 : i32, i32
  }
  func.func @transform_9(%arg0: i32, %arg1: i32) -> (i32, i32) {
    %c0_i32 = arith.constant 0 : i32
    %c0_i32_0 = arith.constant 0 : i32
    return %arg0, %c0_i32 : i32, i32
  }
  func.func @transform_10(%arg0: i32, %arg1: i32) -> (i32, i32) {
    %c0_i32 = arith.constant 0 : i32
    %c0_i32_0 = arith.constant 0 : i32
    return %arg0, %c0_i32 : i32, i32
  }
}

module attributes {stable_mosaic.version = 11 : i64} {
  func.func @kernel(%arg0: i32, %arg1: memref<128x8xbf16, #tpu.memory_space<vmem>>, %arg2: memref<8x8xf32, #tpu.memory_space<vmem>>, %arg3: memref<128x1xf32, #tpu.memory_space<vmem>>, %arg4: memref<128x8xbf16, #tpu.memory_space<vmem>>) attributes {dimension_semantics = [#tpu.dimension_semantics<parallel>], iteration_bounds = array<i64: 2>, scalar_prefetch = 0 : i64, scratch_operands = 0 : i64, tpu.core_type = #tpu.core_type<tc>, window_params = [{transform_indices = @transform_0, window_bounds = array<i64: 128, 8>}, {pipeline_mode = #tpu.pipeline_mode<synchronous>, transform_indices = @transform_1, window_bounds = array<i64: 8, 8>}, {transform_indices = @transform_2, window_bounds = array<i64: 128, 1>}, {transform_indices = @transform_3, window_bounds = array<i64: 128, 8>}]} {
    %c0 = arith.constant 0 : index
    %c0_0 = arith.constant 0 : index
    %0 = vector.load %arg1[%c0, %c0_0] : memref<128x8xbf16, #tpu.memory_space<vmem>>, vector<128x8xbf16>
    %c0_1 = arith.constant 0 : index
    %c0_2 = arith.constant 0 : index
    %1 = vector.load %arg2[%c0_1, %c0_2] : memref<8x8xf32, #tpu.memory_space<vmem>>, vector<8x8xf32>
    %cst = arith.constant dense<0.000000e+00> : vector<128x8xf32>
    %2 = tpu.matmul %0, %1, %cst {dimension_numbers = #tpu.dot_dimension_numbers<[1], [0], [0], [1], [0, 0, 1, 1], [], []>} : vector<128x8xbf16>, vector<8x8xf32>, vector<128x8xf32> -> vector<128x8xf32>
    %c0_3 = arith.constant 0 : index
    %c0_4 = arith.constant 0 : index
    %3 = vector.load %arg3[%c0_3, %c0_4] : memref<128x1xf32, #tpu.memory_space<vmem>>, vector<128x1xf32>
    %4 = vector.broadcast %3 : vector<128x1xf32> to vector<128x8xf32>
    %5 = arith.mulf %2, %4 : vector<128x8xf32>
    %6 = arith.truncf %5 : vector<128x8xf32> to vector<128x8xbf16>
    %c0_5 = arith.constant 0 : index
    %c0_6 = arith.constant 0 : index
    %7 = vector.load %arg4[%c0_5, %c0_6] : memref<128x8xbf16, #tpu.memory_space<vmem>>, vector<128x8xbf16>
    tpu.vector_store %arg4[%c0_5, %c0_6], %6 {strides = array<i32>} : memref<128x8xbf16, #tpu.memory_space<vmem>>, vector<128x8xbf16>,
    return
  }
  func.func @transform_0(%arg0: i32) -> (i32, i32) {
    %c0_i32 = arith.constant 0 : i32
    %c0_i32_0 = arith.constant 0 : i32
    return %arg0, %c0_i32 : i32, i32
  }
  func.func @transform_1(%arg0: i32) -> (i32, i32) {
    %c0_i32 = arith.constant 0 : i32
    %c0_i32_0 = arith.constant 0 : i32
    %c0_i32_1 = arith.constant 0 : i32
    return %c0_i32, %c0_i32_0 : i32, i32
  }
  func.func @transform_2(%arg0: i32) -> (i32, i32) {
    %c0_i32 = arith.constant 0 : i32
    %c0_i32_0 = arith.constant 0 : i32
    return %arg0, %c0_i32 : i32, i32
  }
  func.func @transform_3(%arg0: i32) -> (i32, i32) {
    %c0_i32 = arith.constant 0 : i32
    %c0_i32_0 = arith.constant 0 : i32
    return %arg0, %c0_i32 : i32, i32
  }
}

module attributes {stable_mosaic.version = 11 : i64} {
  func.func @kernel(%arg0: i32, %arg1: i32, %arg2: memref<128x256xbf16, #tpu.memory_space<vmem>>, %arg3: memref<256x8xbf16, #tpu.memory_space<vmem>>, %arg4: memref<128x8xbf16, #tpu.memory_space<vmem>>, %arg5: memref<128x1xf32, #tpu.memory_space<vmem>>, %arg6: memref<1x8xf32, #tpu.memory_space<vmem>>, %arg7: memref<128x1xf32, #tpu.memory_space<vmem>>, %arg8: memref<128x8xf32, #tpu.memory_space<vmem>>, %arg9: memref<128x8xf32, #tpu.memory_space<vmem>>) attributes {dimension_semantics = [#tpu.dimension_semantics<parallel>, #tpu.dimension_semantics<arbitrary>], iteration_bounds = array<i64: 2, 1>, scalar_prefetch = 0 : i64, scratch_operands = 1 : i64, tpu.core_type = #tpu.core_type<tc>, window_params = [{transform_indices = @transform_0, window_bounds = array<i64: 128, 256>}, {transform_indices = @transform_1, window_bounds = array<i64: 256, 8>}, {transform_indices = @transform_2, window_bounds = array<i64: 128, 8>}, {transform_indices = @transform_3, window_bounds = array<i64: 128, 1>}, {pipeline_mode = #tpu.pipeline_mode<synchronous>, transform_indices = @transform_4, window_bounds = array<i64: 1, 8>}, {transform_indices = @transform_5, window_bounds = array<i64: 128, 1>}, {transform_indices = @transform_6, window_bounds = array<i64: 128, 8>}]} {
    %c0_i32 = arith.constant 0 : i32
    %0 = arith.cmpi eq, %arg1, %c0_i32 : i32
    %1 = arith.extui %0 : i1 to i32
    %c0_i32_0 = arith.constant 0 : i32
    %2 = arith.cmpi ne, %1, %c0_i32_0 : i32
    scf.if %2 {
      %cst_10 = arith.constant 0.000000e+00 : f32
      %12 = vector.broadcast %cst_10 : f32 to vector<128x8xf32>
      %c0_11 = arith.constant 0 : index
      %c0_12 = arith.constant 0 : index
      %13 = vector.load %arg9[%c0_11, %c0_12] : memref<128x8xf32, #tpu.memory_space<vmem>>, vector<128x8xf32>
      tpu.vector_store %arg9[%c0_11, %c0_12], %12 {strides = array<i32>} : memref<128x8xf32, #tpu.memory_space<vmem>>, vector<128x8xf32>,
    } else {
    }
    %c0 = arith.constant 0 : index
    %c0_1 = arith.constant 0 : index
    %3 = vector.load %arg9[%c0, %c0_1] : memref<128x8xf32, #tpu.memory_space<vmem>>, vector<128x8xf32>
    %c0_2 = arith.constant 0 : index
    %c0_3 = arith.constant 0 : index
    %4 = vector.load %arg2[%c0_2, %c0_3] : memref<128x256xbf16, #tpu.memory_space<vmem>>, vector<128x256xbf16>
    %c0_4 = arith.constant 0 : index
    %c0_5 = arith.constant 0 : index
    %5 = vector.load %arg3[%c0_4, %c0_5] : memref<256x8xbf16, #tpu.memory_space<vmem>>, vector<256x8xbf16>
    %cst = arith.constant dense<0.000000e+00> : vector<128x8xf32>
    %6 = tpu.matmul %4, %5, %cst {dimension_numbers = #tpu.dot_dimension_numbers<[1], [0], [0], [1], [0, 0, 1, 1], [], []>} : vector<128x256xbf16>, vector<256x8xbf16>, vector<128x8xf32> -> vector<128x8xf32>
    %7 = arith.addf %3, %6 : vector<128x8xf32>
    %c0_6 = arith.constant 0 : index
    %c0_7 = arith.constant 0 : index
    %8 = vector.load %arg9[%c0_6, %c0_7] : memref<128x8xf32, #tpu.memory_space<vmem>>, vector<128x8xf32>
    tpu.vector_store %arg9[%c0_6, %c0_7], %7 {strides = array<i32>} : memref<128x8xf32, #tpu.memory_space<vmem>>, vector<128x8xf32>,
    %c0_i32_8 = arith.constant 0 : i32
    %9 = arith.cmpi eq, %arg1, %c0_i32_8 : i32
    %10 = arith.extui %9 : i1 to i32
    %c0_i32_9 = arith.constant 0 : i32
    %11 = arith.cmpi ne, %10, %c0_i32_9 : i32
    scf.if %11 {
      %c0_10 = arith.constant 0 : index
      %c0_11 = arith.constant 0 : index
      %12 = vector.load %arg9[%c0_10, %c0_11] : memref<128x8xf32, #tpu.memory_space<vmem>>, vector<128x8xf32>
      %c0_12 = arith.constant 0 : index
      %c0_13 = arith.constant 0 : index
      %13 = vector.load %arg4[%c0_12, %c0_13] : memref<128x8xbf16, #tpu.memory_space<vmem>>, vector<128x8xbf16>
      %14 = arith.extf %13 : vector<128x8xbf16> to vector<128x8xf32>
      %15 = arith.addf %12, %14 : vector<128x8xf32>
      %c0_14 = arith.constant 0 : index
      %c0_15 = arith.constant 0 : index
      %16 = vector.load %arg5[%c0_14, %c0_15] : memref<128x1xf32, #tpu.memory_space<vmem>>, vector<128x1xf32>
      %17 = vector.broadcast %16 : vector<128x1xf32> to vector<128x8xf32>
      %18 = arith.mulf %15, %17 : vector<128x8xf32>
      %c0_16 = arith.constant 0 : index
      %c0_17 = arith.constant 0 : index
      %19 = vector.load %arg6[%c0_16, %c0_17] : memref<1x8xf32, #tpu.memory_space<vmem>>, vector<1x8xf32>
      %20 = vector.broadcast %19 : vector<1x8xf32> to vector<128x8xf32>
      %21 = arith.addf %18, %20 : vector<128x8xf32>
      %c0_18 = arith.constant 0 : index
      %c0_19 = arith.constant 0 : index
      %22 = vector.load %arg7[%c0_18, %c0_19] : memref<128x1xf32, #tpu.memory_space<vmem>>, vector<128x1xf32>
      %23 = vector.broadcast %22 : vector<128x1xf32> to vector<128x8xf32>
      %24 = arith.mulf %21, %23 : vector<128x8xf32>
      %c0_20 = arith.constant 0 : index
      %c0_21 = arith.constant 0 : index
      %25 = vector.load %arg8[%c0_20, %c0_21] : memref<128x8xf32, #tpu.memory_space<vmem>>, vector<128x8xf32>
      tpu.vector_store %arg8[%c0_20, %c0_21], %24 {strides = array<i32>} : memref<128x8xf32, #tpu.memory_space<vmem>>, vector<128x8xf32>,
    } else {
    }
    return
  }
  func.func @transform_0(%arg0: i32, %arg1: i32) -> (i32, i32) {
    %c0_i32 = arith.constant 0 : i32
    return %arg0, %arg1 : i32, i32
  }
  func.func @transform_1(%arg0: i32, %arg1: i32) -> (i32, i32) {
    %c0_i32 = arith.constant 0 : i32
    %c0_i32_0 = arith.constant 0 : i32
    return %arg1, %c0_i32 : i32, i32
  }
  func.func @transform_2(%arg0: i32, %arg1: i32) -> (i32, i32) {
    %c0_i32 = arith.constant 0 : i32
    %c0_i32_0 = arith.constant 0 : i32
    return %arg0, %c0_i32 : i32, i32
  }
  func.func @transform_3(%arg0: i32, %arg1: i32) -> (i32, i32) {
    %c0_i32 = arith.constant 0 : i32
    %c0_i32_0 = arith.constant 0 : i32
    return %arg0, %c0_i32 : i32, i32
  }
  func.func @transform_4(%arg0: i32, %arg1: i32) -> (i32, i32) {
    %c0_i32 = arith.constant 0 : i32
    %c0_i32_0 = arith.constant 0 : i32
    %c0_i32_1 = arith.constant 0 : i32
    return %c0_i32, %c0_i32_0 : i32, i32
  }
  func.func @transform_5(%arg0: i32, %arg1: i32) -> (i32, i32) {
    %c0_i32 = arith.constant 0 : i32
    %c0_i32_0 = arith.constant 0 : i32
    return %arg0, %c0_i32 : i32, i32
  }
  func.func @transform_6(%arg0: i32, %arg1: i32) -> (i32, i32) {
    %c0_i32 = arith.constant 0 : i32
    %c0_i32_0 = arith.constant 0 : i32
    return %arg0, %c0_i32 : i32, i32
  }
}

module attributes {stable_mosaic.version = 11 : i64} {
  func.func @_tail_kernel(%arg0: i32, %arg1: memref<8x256xbf16, #tpu.memory_space<vmem>>, %arg2: memref<256x8xf32, #tpu.memory_space<vmem>>, %arg3: memref<128x8xf32, #tpu.memory_space<vmem>>, %arg4: memref<128x8xf32, #tpu.memory_space<vmem>>, %arg5: memref<1x128xf32, #tpu.memory_space<vmem>>, %arg6: memref<8x8xf32, #tpu.memory_space<vmem>>) attributes {dimension_semantics = [#tpu.dimension_semantics<arbitrary>], iteration_bounds = array<i64: 1>, scalar_prefetch = 0 : i64, scratch_operands = 1 : i64, tpu.core_type = #tpu.core_type<tc>, window_params = [{transform_indices = @transform_0, window_bounds = array<i64: 8, 256>}, {transform_indices = @transform_1, window_bounds = array<i64: 256, 8>}, {pipeline_mode = #tpu.pipeline_mode<synchronous>, transform_indices = @transform_2, window_bounds = array<i64: 128, 8>}, {pipeline_mode = #tpu.pipeline_mode<synchronous>, transform_indices = @transform_3, window_bounds = array<i64: 128, 8>}, {pipeline_mode = #tpu.pipeline_mode<synchronous>, transform_indices = @transform_4, window_bounds = array<i64: 1, 128>}]} {
    %c0_i32 = arith.constant 0 : i32
    %0 = arith.cmpi eq, %arg0, %c0_i32 : i32
    %1 = arith.extui %0 : i1 to i32
    %c0_i32_0 = arith.constant 0 : i32
    %2 = arith.cmpi ne, %1, %c0_i32_0 : i32
    scf.if %2 {
      %cst_10 = arith.constant 0.000000e+00 : f32
      %12 = vector.broadcast %cst_10 : f32 to vector<8x8xf32>
      %c0_11 = arith.constant 0 : index
      %c0_12 = arith.constant 0 : index
      %13 = vector.load %arg6[%c0_11, %c0_12] : memref<8x8xf32, #tpu.memory_space<vmem>>, vector<8x8xf32>
      tpu.vector_store %arg6[%c0_11, %c0_12], %12 {strides = array<i32>} : memref<8x8xf32, #tpu.memory_space<vmem>>, vector<8x8xf32>,
    } else {
    }
    %c0 = arith.constant 0 : index
    %c0_1 = arith.constant 0 : index
    %3 = vector.load %arg6[%c0, %c0_1] : memref<8x8xf32, #tpu.memory_space<vmem>>, vector<8x8xf32>
    %c0_2 = arith.constant 0 : index
    %c0_3 = arith.constant 0 : index
    %4 = vector.load %arg1[%c0_2, %c0_3] : memref<8x256xbf16, #tpu.memory_space<vmem>>, vector<8x256xbf16>
    %c0_4 = arith.constant 0 : index
    %c0_5 = arith.constant 0 : index
    %5 = vector.load %arg2[%c0_4, %c0_5] : memref<256x8xf32, #tpu.memory_space<vmem>>, vector<256x8xf32>
    %cst = arith.constant dense<0.000000e+00> : vector<8x8xf32>
    %6 = tpu.matmul %4, %5, %cst {dimension_numbers = #tpu.dot_dimension_numbers<[1], [0], [0], [1], [0, 0, 1, 1], [], []>} : vector<8x256xbf16>, vector<256x8xf32>, vector<8x8xf32> -> vector<8x8xf32>
    %7 = arith.addf %3, %6 : vector<8x8xf32>
    %c0_6 = arith.constant 0 : index
    %c0_7 = arith.constant 0 : index
    %8 = vector.load %arg6[%c0_6, %c0_7] : memref<8x8xf32, #tpu.memory_space<vmem>>, vector<8x8xf32>
    tpu.vector_store %arg6[%c0_6, %c0_7], %7 {strides = array<i32>} : memref<8x8xf32, #tpu.memory_space<vmem>>, vector<8x8xf32>,
    %c0_i32_8 = arith.constant 0 : i32
    %9 = arith.cmpi eq, %arg0, %c0_i32_8 : i32
    %10 = arith.extui %9 : i1 to i32
    %c0_i32_9 = arith.constant 0 : i32
    %11 = arith.cmpi ne, %10, %c0_i32_9 : i32
    scf.if %11 {
      %c0_10 = arith.constant 0 : index
      %c0_11 = arith.constant 0 : index
      %12 = vector.load %arg6[%c0_10, %c0_11] : memref<8x8xf32, #tpu.memory_space<vmem>>, vector<8x8xf32>
      %c0_12 = arith.constant 0 : index
      %c0_13 = arith.constant 0 : index
      %13 = vector.load %arg3[%c0_12, %c0_13] : memref<128x8xf32, #tpu.memory_space<vmem>>, vector<128x8xf32>
      %cst_14 = arith.constant dense<0.000000e+00> : vector<128x8xf32>
      %14 = tpu.matmul %13, %12, %cst_14 {dimension_numbers = #tpu.dot_dimension_numbers<[1], [0], [0], [1], [0, 0, 1, 1], [], []>} : vector<128x8xf32>, vector<8x8xf32>, vector<128x8xf32> -> vector<128x8xf32>
      %c0_15 = arith.constant 0 : index
      %c0_16 = arith.constant 0 : index
      %15 = vector.load %arg4[%c0_15, %c0_16] : memref<128x8xf32, #tpu.memory_space<vmem>>, vector<128x8xf32>
      %cst_17 = arith.constant dense<0.000000e+00> : vector<128x8xf32>
      %16 = tpu.matmul %15, %12, %cst_17 {dimension_numbers = #tpu.dot_dimension_numbers<[1], [0], [0], [1], [0, 0, 1, 1], [], []>} : vector<128x8xf32>, vector<8x8xf32>, vector<128x8xf32> -> vector<128x8xf32>
      %17 = arith.mulf %14, %16 : vector<128x8xf32>
      %cst_18 = arith.constant 1.000000e+00 : f32
      %18 = vector.broadcast %cst_18 : f32 to vector<1x8xf32>
      %cst_19 = arith.constant dense<0.000000e+00> : vector<1x128xf32>
      %19 = tpu.matmul %18, %17, %cst_19 {dimension_numbers = #tpu.dot_dimension_numbers<[1], [1], [0], [0], [0, 0, 1, 0], [], []>} : vector<1x8xf32>, vector<128x8xf32>, vector<1x128xf32> -> vector<1x128xf32>
      %cst_20 = arith.constant 0.000000e+00 : f32
      %20 = vector.broadcast %cst_20 : f32 to vector<1x128xf32>
      %21 = arith.subf %20, %19 : vector<1x128xf32>
      %22 = math.exp %21 : vector<1x128xf32>
      %cst_21 = arith.constant 1.000000e+00 : f32
      %23 = vector.broadcast %cst_21 : f32 to vector<1x128xf32>
      %24 = arith.addf %23, %22 : vector<1x128xf32>
      %cst_22 = arith.constant 1.000000e+00 : f32
      %25 = vector.broadcast %cst_22 : f32 to vector<1x128xf32>
      %26 = arith.divf %25, %24 : vector<1x128xf32>
      %c0_23 = arith.constant 0 : index
      %c0_24 = arith.constant 0 : index
      %27 = vector.load %arg5[%c0_23, %c0_24] : memref<1x128xf32, #tpu.memory_space<vmem>>, vector<1x128xf32>
      tpu.vector_store %arg5[%c0_23, %c0_24], %26 {strides = array<i32>} : memref<1x128xf32, #tpu.memory_space<vmem>>, vector<1x128xf32>,
    } else {
    }
    return
  }
  func.func @transform_0(%arg0: i32) -> (i32, i32) {
    %c0_i32 = arith.constant 0 : i32
    %c0_i32_0 = arith.constant 0 : i32
    return %c0_i32, %arg0 : i32, i32
  }
  func.func @transform_1(%arg0: i32) -> (i32, i32) {
    %c0_i32 = arith.constant 0 : i32
    %c0_i32_0 = arith.constant 0 : i32
    return %arg0, %c0_i32 : i32, i32
  }
  func.func @transform_2(%arg0: i32) -> (i32, i32) {
    %c0_i32 = arith.constant 0 : i32
    %c0_i32_0 = arith.constant 0 : i32
    %c0_i32_1 = arith.constant 0 : i32
    return %c0_i32, %c0_i32_0 : i32, i32
  }
  func.func @transform_3(%arg0: i32) -> (i32, i32) {
    %c0_i32 = arith.constant 0 : i32
    %c0_i32_0 = arith.constant 0 : i32
    %c0_i32_1 = arith.constant 0 : i32
    return %c0_i32, %c0_i32_0 : i32, i32
  }
  func.func @transform_4(%arg0: i32) -> (i32, i32) {
    %c0_i32 = arith.constant 0 : i32
    %c0_i32_0 = arith.constant 0 : i32
    %c0_i32_1 = arith.constant 0 : i32
    return %c0_i32, %c0_i32_0 : i32, i32
  }
}

</mosaic_0001>

<bundles_post_ra>
// kernel: seal_forward.9
= control target key start
LH: loop header
LB: loop body
LE: loop exit
PB: predicated region body
PF: predicated region fallthrough
CT: control target
= control target key end

     0   :  { %s480_s9 = smov 0   ;;  %s554_s0 = inlined_call_operand.vmem [shape: bf16[256,32], index: 0, kind: input, shape index: {}]   ;;  %s555_s1 = inlined_call_operand.vmem [shape: f32[32,16], index: 1, kind: input, shape index: {}]   ;;  %s556_s2 = inlined_call_operand.vmem [shape: bf16[256,16], index: 2, kind: output, shape index: {}]  }
   0x1 LB: > { %s378_s10 = sadd.s32 4294967295, %s463_s9   ;;  %p382_p0 = scmp.ge.s32.totalorder %s463_s9, 1  ;;  %s463_s9 = sphi %s480_s9, %s12_s9  }
   0x2   : > { %p113_p1 = scmp.lt.s32.totalorder %s463_s9, 3 }
   0x4   : > { %p114_p2 = pnand %p382_p0, %p113_p1 }
   0x5   : > { %s383_s15 = sshll.u32 (!%p114_p2), %s378_s10, 4 }
   0x6   : > { %117 = sbr.rel (%p114_p2) target bundleno = 181 (0xb5), region = 28  ;;  %p136_p3 = scmp.lt.s32.totalorder (!%p114_p2), %s383_s15, 31 }
   0xb   : > { %v166_v0 = vld [vmem:[%s555_s1 + $0x18] sm:$0xff]  ;;  %v165_v1 = vld [vmem:[%s555_s1 + $0x10] sm:$0xff]  ;;  %v164_v2 = vld [vmem:[%s555_s1 + $0x8] sm:$0xff]  ;;  %s558_s15 = smov (!%p136_p3, %s383_s15), 31  ;;  %vm207_vm0 = vcmask 261120   ;;  %vm305_vm1 = vcmask 125952  }
   0xc   : > { %244 = vmatpush.msra.mxu0 %v166_v0  ;;  %437 = vmatpush.msra.mxu1 %v166_v0  ;;  %v163_v3 = vld [vmem:[%s555_s1] sm:$0xff]  ;;  %s384_s20 = sshll.u32 %s558_s15, 2 }
   0xd   : > { %438 = vmatpush.msra.mxu2 %v166_v0  ;;  %439 = vmatpush.msra.mxu3 %v166_v0  ;;  %s139_s23 = scalar_lea.vmem %s554_s0, %s384_s20  ;;  %s517_s26 = scalar_lea.vmem %s556_s2, %s384_s20 }
   0xe   : > { %245 = vmatpush.msra.mxu0 %v165_v1  ;;  %440 = vmatpush.msra.mxu1 %v165_v1  ;;  %v429_v4 = vld [vmem:[%s139_s23] sm:$0xff]  ;;  %v431_v5 = vld [vmem:[%s139_s23 + $0x10] sm:$0xff]  ;;  %v430_v8 = vld [vmem:[%s139_s23 + $0x8] sm:$0xff] }
   0xf   : > { %441 = vmatpush.msra.mxu2 %v165_v1  ;;  %442 = vmatpush.msra.mxu3 %v165_v1  ;;  %v433_v6 = vld [vmem:[%s139_s23 + $0x20] sm:$0xff]  ;;  %v435_v7 = vld [vmem:[%s139_s23 + $0x30] sm:$0xff]  ;;  %v432_v9 = vld [vmem:[%s139_s23 + $0x18] sm:$0xff] }
  0x10   : > { %246 = vmatpush.msra.mxu0 %v164_v2  ;;  %443 = vmatpush.msra.mxu1 %v164_v2  ;;  %v434_v10 = vld [vmem:[%s139_s23 + $0x28] sm:$0xff]  ;;  %v436_v11 = vld [vmem:[%s139_s23 + $0x38] sm:$0xff] }
  0x11   : > { %444 = vmatpush.msra.mxu2 %v164_v2  ;;  %445 = vmatpush.msra.mxu3 %v164_v2 }
  0x12   : > { %247 = vmatpush.msra.mxu0 %v163_v3  ;;  %446 = vmatpush.msra.mxu1 %v163_v3 }
  0x13   : > { %447 = vmatpush.msra.mxu2 %v163_v3  ;;  %448 = vmatpush.msra.mxu3 %v163_v3 }
  0x14   : > { %419 = vmatmul.msk.bf16.vlgmr.msra.gmra.mxu0 %vm207_vm0, %v429_v4  ;;  %421 = vmatmul.msk.bf16.vlgmr.msra.gmra.mxu1 %vm207_vm0, %v431_v5 }
  0x15   : > { %423 = vmatmul.msk.bf16.vlgmr.msra.gmra.mxu2 %vm207_vm0, %v433_v6  ;;  %425 = vmatmul.msk.bf16.vlgmr.msra.gmra.mxu3 %vm207_vm0, %v435_v7 }
  0x24   : > { %420 = vmatmul.msk.bf16.gmra.mxu0 %vm207_vm0, %v430_v8  ;;  %422 = vmatmul.msk.bf16.gmra.mxu1 %vm207_vm0, %v432_v9 }
  0x25   : > { %424 = vmatmul.msk.bf16.gmra.mxu2 %vm207_vm0, %v434_v10  ;;  %426 = vmatmul.msk.bf16.gmra.mxu3 %vm207_vm0, %v436_v11 }
  0x91   : > { %v249_v12 = vpop.f32.mrf.mxu0  ;;  %v259_v13 = vpop.f32.mrf.mxu1 }
  0x92   : > { %v289_v14 = vpack.c.bf16 %v249_v12, %v249_v12  ;;  %v293_v15 = vpack.c.bf16 %v259_v13, %v259_v13 }
  0x94   : > { %306 = vst.msk [vmem:[%s517_s26] sm:$0xf] %vm305_vm1, %v289_v14 }
  0x95   : > { %310 = vst.msk [vmem:[%s517_s26 + $0x10] sm:$0xf] %vm305_vm1, %v293_v15 }
  0x98   : > { %v269_v16 = vpop.f32.mrf.mxu2  ;;  %v279_v17 = vpop.f32.mrf.mxu3 }
  0x99   : > { %v297_v18 = vpack.c.bf16 %v269_v16, %v269_v16  ;;  %v301_v19 = vpack.c.bf16 %v279_v17, %v279_v17  ;;  %v251_v20 = vpop.f32.mrf.mxu0  ;;  %v261_v21 = vpop.f32.mrf.mxu1 }
  0x9a   : > { %v290_v22 = vpack.c.bf16 %v251_v20, %v251_v20  ;;  %v294_v23 = vpack.c.bf16 %v261_v21, %v261_v21 }
  0x9b   : > { %314 = vst.msk [vmem:[%s517_s26 + $0x20] sm:$0xf] %vm305_vm1, %v297_v18 }
  0x9c   : > { %318 = vst.msk [vmem:[%s517_s26 + $0x30] sm:$0xf] %vm305_vm1, %v301_v19 }
  0x9d   : > { %307 = vst.msk [vmem:[%s517_s26 + $0x4] sm:$0xf] %vm305_vm1, %v290_v22 }
  0x9e   : > { %311 = vst.msk [vmem:[%s517_s26 + $0x14] sm:$0xf] %vm305_vm1, %v294_v23 }
  0xa0   : > { %v271_v24 = vpop.f32.mrf.mxu2  ;;  %v281_v25 = vpop.f32.mrf.mxu3 }
  0xa1   : > { %v298_v26 = vpack.c.bf16 %v271_v24, %v271_v24  ;;  %v302_v27 = vpack.c.bf16 %v281_v25, %v281_v25  ;;  %v254_v28 = vpop.f32.mrf.mxu0  ;;  %v264_v29 = vpop.f32.mrf.mxu1 }
  0xa2   : > { %v291_v30 = vpack.c.bf16 %v254_v28, %v254_v28  ;;  %v295_v31 = vpack.c.bf16 %v264_v29, %v264_v29 }
  0xa3   : > { %315 = vst.msk [vmem:[%s517_s26 + $0x24] sm:$0xf] %vm305_vm1, %v298_v26 }
  0xa4   : > { %319 = vst.msk [vmem:[%s517_s26 + $0x34] sm:$0xf] %vm305_vm1, %v302_v27 }
  0xa5   : > { %308 = vst.msk [vmem:[%s517_s26 + $0x8] sm:$0xf] %vm305_vm1, %v291_v30 }
  0xa6   : > { %312 = vst.msk [vmem:[%s517_s26 + $0x18] sm:$0xf] %vm305_vm1, %v295_v31 }
  0xa8   : > { %v274_v32 = vpop.f32.mrf.mxu2  ;;  %v284_v33 = vpop.f32.mrf.mxu3 }
  0xa9   : > { %v299_v34 = vpack.c.bf16 %v274_v32, %v274_v32  ;;  %v303_v35 = vpack.c.bf16 %v284_v33, %v284_v33  ;;  %v256_v36 = vpop.f32.mrf.mxu0  ;;  %v266_v37 = vpop.f32.mrf.mxu1 }
  0xaa   : > { %v292_v38 = vpack.c.bf16 %v256_v36, %v256_v36  ;;  %v296_v39 = vpack.c.bf16 %v266_v37, %v266_v37 }
  0xab   : > { %316 = vst.msk [vmem:[%s517_s26 + $0x28] sm:$0xf] %vm305_vm1, %v299_v34 }
  0xac   : > { %320 = vst.msk [vmem:[%s517_s26 + $0x38] sm:$0xf] %vm305_vm1, %v303_v35 }
  0xad   : > { %309 = vst.msk [vmem:[%s517_s26 + $0xc] sm:$0xf] %vm305_vm1, %v292_v38 }
  0xae   : > { %313 = vst.msk [vmem:[%s517_s26 + $0x1c] sm:$0xf] %vm305_vm1, %v296_v39 }
  0xb0   : > { %v276_v40 = vpop.f32.mrf.mxu2  ;;  %v286_v41 = vpop.f32.mrf.mxu3 }
  0xb1   : > { %v300_v42 = vpack.c.bf16 %v276_v40, %v276_v40  ;;  %v304_v43 = vpack.c.bf16 %v286_v41, %v286_v41 }
  0xb3   : > { %317 = vst.msk [vmem:[%s517_s26 + $0x2c] sm:$0xf] %vm305_vm1, %v300_v42 }
  0xb4   : > { %321 = vst.msk [vmem:[%s517_s26 + $0x3c] sm:$0xf] %vm305_vm1, %v304_v43 }
  0xb5 PF: > { %s12_s9 = sadd.s32 1, %s463_s9  }
  0xb6   : > { %p9_p4 = scmp.ge.s32.totalorder %s12_s9, 4  }
  0xb8   :  { %11 = sbr.rel (!%p9_p4) target bundleno = 1 (0x1), region = 58 }

// kernel: seal_forward.8
= control target key start
LH: loop header
LB: loop body
LE: loop exit
PB: predicated region body
PF: predicated region fallthrough
CT: control target
= control target key end

     0   :  { %s1977_s17 = smov 0   ;;  %s1979_s18 = smov 0   ;;  %s2400_s0 = inlined_call_operand.vmem [shape: bf16[256,256], index: 0, kind: input, shape index: {}]   ;;  %s2401_s1 = inlined_call_operand.vmem [shape: bf16[256,8], index: 1, kind: input, shape index: {}, may-alias: {1,2}]   ;;  %s2402_s2 = inlined_call_operand.vmem [shape: bf16[256,8], index: 2, kind: input, shape index: {}, may-alias: {1,2}]   ;;  %s2403_s3 = inlined_call_operand.vmem [shape: f32[256,1], index: 3, kind: input, shape index: {}]   ;;  %s2404_s4 = inlined_call_operand.vmem [shape: f32[8,32], index: 4, kind: input, shape index: {}]   ;;  %s2405_s5 = inlined_call_operand.vmem [shape: f32[1,32], index: 5, kind: input, shape index: {}]   ;;  %s2406_s6 = inlined_call_operand.vmem [shape: f32[1,32], index: 6, kind: input, shape index: {}]   ;;  %s2407_s7 = inlined_call_operand.vmem [shape: f32[1,32], index: 7, kind: input, shape index: {}]   ;;  %s2408_s8 = inlined_call_operand.vmem [shape: f32[1,32], index: 8, kind: input, shape index: {}]   ;;  %s2409_s9 = inlined_call_operand.vmem [shape: f32[1,32], index: 9, kind: input, shape index: {}]   ;;  %s2410_s10 = inlined_call_operand.vmem [shape: f32[256,1], index: 10, kind: input, shape index: {}]   ;;  %s2411_s11 = inlined_call_operand.vmem [shape: bf16[256,32], index: 11, kind: output, shape index: {}]  }
   0x1   :  { %s1981_s19 = smov 0  }
   0x2 LB: > { %s33_s20 = sadd.s32 1, %s1909_s18  ;;  %p1609_p0 = scmp.ge.s32.totalorder %s1913_s19, 1  ;;  %s1913_s19 = sphi %s1981_s19, %s21_s19   ;;  %s1909_s18 = sphi %s1979_s18, %s2413_s18   ;;  %s1905_s17 = sphi %s1977_s17, %s2412_s17  }
   0x3   : > { %p35_p1 = scmp.ge.s32.totalorder %s33_s20, 2  ;;  %p402_p2 = scmp.lt.s32.totalorder %s1913_s19, 3 }
   0x5   : > { %s2415_s20 = smov (%p35_p1, %s33_s20), 0  ;;  %p403_p3 = pnand %p1609_p0, %p402_p2 }
   0x6   : > { %s1610_s25 = sshll.u32 (!%p403_p3), %s1905_s17, 4 }
   0x7   : > { %406 = sbr.rel (%p403_p3) target bundleno = 450 (0x1c2), region = 64  ;;  %p469_p4 = scmp.lt.s32.totalorder (!%p403_p3), %s1610_s25, 31 }
   0xc   : > { %v1791_v0 = vld [vmem:[%s2401_s1 + $0x38] sm:$0xff]  ;;  %v1915_v2 = vmov 0   ;;  %v1790_v3 = vld [vmem:[%s2401_s1 + $0x30] sm:$0xff]  ;;  %s2417_s25 = smov (!%p469_p4, %s1610_s25), 31  ;;  %v1789_v5 = vld [vmem:[%s2401_s1 + $0x28] sm:$0xff]  ;;  %vm513_vm0 = vcmask 64512  }
   0xd   : > { %v2001_v1 = vld [vmem:[%s2401_s1 + $0x78] sm:$0xff]  ;;  %1883 = vset.pattern.permute.xlu1 %v1915_v2  ;;  %1882 = vset.pattern.permute.xlu0 %v1915_v2  ;;  %v2010_v4 = vld [vmem:[%s2401_s1 + $0x70] sm:$0xff]  ;;  %s2015_s30 = sshll.u32 %s2417_s25, 3  ;;  %v2032_v8 = vld [vmem:[%s2401_s1 + $0x68] sm:$0xff]  ;;  %s1614_s22 = sshll.u32 %s2417_s25, 2  ;;  %vm1465_vm5 = vcmask 257024  }
   0xe   : > { %770 = vmatpush.bf16.msra.mxu0 %v1791_v0  ;;  %1839 = vmatpush.bf16.msra.mxu3 %v1791_v0  ;;  %s2021_s14 = scalar_lea.vmem %s2403_s3, %s2015_s30  ;;  %v1788_v9 = vld [vmem:[%s2401_s1 + $0x20] sm:$0xff]  ;;  %v1787_v14 = vld [vmem:[%s2401_s1 + $0x18] sm:$0xff]  ;;  %v1786_v16 = vld [vmem:[%s2401_s1 + $0x10] sm:$0xff]  ;;  %s2071_s23 = scalar_lea.vmem %s2400_s0, %s2015_s30 }
   0xf   : > { %819 = vmatpush.bf16.msra.mxu1 %v2001_v1  ;;  %1884 = vset.pattern.permute.xlu2 %v1915_v2  ;;  %v970_v6 = vld [vmem:[%s2021_s14 + $0x10] sm:$0xff]  ;;  %v968_v7 = vld [vmem:[%s2021_s14] sm:$0xff]  ;;  %v971_v12 = vld [vmem:[%s2021_s14 + $0x18] sm:$0xff]  ;;  %s2110_s21 = scalar_lea.vmem %s2410_s10, %s2015_s30  ;;  %s2183_s26 = scalar_lea.vmem %s2402_s2, %s1614_s22 }
  0x10   : > { %996 = vperm.xlu1 %1883, %v970_v6   ;;  %986 = vperm.xlu0 %1882, %v968_v7   ;;  %v2041_v10 = vld [vmem:[%s2401_s1 + $0x60] sm:$0xff]  ;;  %v969_v13 = vld [vmem:[%s2021_s14 + $0x8] sm:$0xff]  ;;  %v2053_v15 = vld [vmem:[%s2401_s1 + $0x58] sm:$0xff]  ;;  %s2279_s24 = scalar_lea.vmem %s2411_s11, %s1614_s22 }
  0x11   : > { %v972_v11 = vld [vmem:[%s2021_s14 + $0x20] sm:$0xff]  ;;  %v973_v17 = vld [vmem:[%s2021_s14 + $0x28] sm:$0xff]  ;;  %v2063_v18 = vld [vmem:[%s2401_s1 + $0x50] sm:$0xff] }
  0x12   : > { %771 = vmatpush.bf16.msra.mxu0 %v1790_v3  ;;  %1840 = vmatpush.bf16.msra.mxu3 %v1790_v3  ;;  %v975_v19 = vld [vmem:[%s2021_s14 + $0x38] sm:$0xff]  ;;  %v974_v20 = vld [vmem:[%s2021_s14 + $0x30] sm:$0xff]  ;;  %v1785_v21 = vld [vmem:[%s2401_s1 + $0x8] sm:$0xff] }
  0x13   : > { %820 = vmatpush.bf16.msra.mxu1 %v2010_v4  ;;  %1006 = vperm.xlu2 %1884, %v972_v11   ;;  %v2080_v22 = vld [vmem:[%s2401_s1 + $0x48] sm:$0xff]  ;;  %v1784_v23 = vld [vmem:[%s2401_s1] sm:$0xff]  ;;  %v978_v32 = vld [vmem:[%s2021_s14 + $0x50] sm:$0xff] }
  0x14   : > { %v1623_v24 = vld [vmem:[%s2071_s23] sm:$0xf]  ;;  %v1769_v25 = vld [vmem:[%s2071_s23 + $0x4] sm:$0xf0]  ;;  %v1768_v30 = vld [vmem:[%s2071_s23 + $0x4] sm:$0xf] }
  0x15   : > { %v1671_v26 = vld [vmem:[%s2071_s23 + $0x60] sm:$0xf]  ;;  %v1781_v27 = vld [vmem:[%s2071_s23 + $0x64] sm:$0xf0]  ;;  %v1625_v31 = vld [vmem:[%s2071_s23 + $0x8] sm:$0xf0]  ;;  %v1624_v34 = vor.u32 %v1769_v25, %v1623_v24 }
  0x16   : > { %772 = vmatpush.bf16.msra.mxu0 %v1789_v5  ;;  %1841 = vmatpush.bf16.msra.mxu3 %v1789_v5  ;;  %v976_v28 = vld [vmem:[%s2021_s14 + $0x40] sm:$0xff]  ;;  %v977_v33 = vld [vmem:[%s2021_s14 + $0x48] sm:$0xff]  ;;  %v1672_v35 = vor.u32 %v1781_v27, %v1671_v26  ;;  %v1628_v36 = vor.u32 %v1768_v30, %v1625_v31  ;;  %v979_v37 = vld [vmem:[%s2021_s14 + $0x58] sm:$0xff] }
  0x17   : > { %821 = vmatpush.bf16.msra.mxu1 %v2032_v8  ;;  %v1792_v29 = vld [vmem:[%s2401_s1 + $0x40] sm:$0xff]  ;;  %v981_v38 = vld [vmem:[%s2021_s14 + $0x68] sm:$0xff]  ;;  %v1631_v40 = vld [vmem:[%s2071_s23 + $0x10] sm:$0xf] }
  0x18   : > { %1001 = vperm.xlu1 %1883, %v971_v12   ;;  %991 = vperm.xlu0 %1882, %v969_v13   ;;  %v980_v39 = vld [vmem:[%s2021_s14 + $0x60] sm:$0xff]  ;;  %v1771_v41 = vld [vmem:[%s2071_s23 + $0x14] sm:$0xf0]  ;;  %v1679_v42 = vld [vmem:[%s2071_s23 + $0x70] sm:$0xf] }
  0x19   : > { %v1783_v43 = vld [vmem:[%s2071_s23 + $0x74] sm:$0xf0]  ;;  %v982_v44 = vld [vmem:[%s2021_s14 + $0x70] sm:$0xff]  ;;  %v1633_v46 = vld [vmem:[%s2071_s23 + $0x18] sm:$0xf0]  ;;  %v1632_v49 = vor.u32 %v1771_v41, %v1631_v40 }
  0x1a   : > { %773 = vmatpush.bf16.msra.mxu0 %v1788_v9  ;;  %1842 = vmatpush.bf16.msra.mxu3 %v1788_v9  ;;  %v1770_v45 = vld [vmem:[%s2071_s23 + $0x14] sm:$0xf]  ;;  %v1337_v47 = vld [vmem:[%s2110_s21] sm:$0xff]  ;;  %v983_v48 = vld [vmem:[%s2021_s14 + $0x78] sm:$0xff]  ;;  %v1680_v50 = vor.u32 %v1783_v43, %v1679_v42 }
  0x1b   : > { %822 = vmatpush.bf16.msra.mxu1 %v2041_v10  ;;  %1011 = vperm.xlu2 %1884, %v973_v17   ;;  %v1636_v51 = vor.u32 %v1770_v45, %v1633_v46  ;;  %v1338_v52 = vld [vmem:[%s2110_s21 + $0x8] sm:$0xff]  ;;  %v1340_v53 = vld [vmem:[%s2110_s21 + $0x18] sm:$0xff]  ;;  %v1339_v54 = vld [vmem:[%s2110_s21 + $0x10] sm:$0xff] }
  0x1c   : > { %v1639_v55 = vld [vmem:[%s2071_s23 + $0x20] sm:$0xf]  ;;  %v1773_v56 = vld [vmem:[%s2071_s23 + $0x24] sm:$0xf0]  ;;  %v1780_v57 = vld [vmem:[%s2071_s23 + $0x64] sm:$0xf] }
  0x1d   : > { %v1673_v58 = vld [vmem:[%s2071_s23 + $0x68] sm:$0xf0]  ;;  %v1341_v59 = vld [vmem:[%s2110_s21 + $0x20] sm:$0xff]  ;;  %v1343_v62 = vld [vmem:[%s2110_s21 + $0x30] sm:$0xff]  ;;  %v1640_v0 = vor.u32 %v1773_v56, %v1639_v55 }
  0x1e   : > { %774 = vmatpush.bf16.msra.mxu0 %v1787_v14  ;;  %1843 = vmatpush.bf16.msra.mxu3 %v1787_v14  ;;  %v1772_v60 = vld [vmem:[%s2071_s23 + $0x24] sm:$0xf]  ;;  %v1641_v61 = vld [vmem:[%s2071_s23 + $0x28] sm:$0xf0]  ;;  %v1344_v3 = vld [vmem:[%s2110_s21 + $0x38] sm:$0xff] }
  0x1f   : > { %823 = vmatpush.bf16.msra.mxu1 %v2053_v15  ;;  %v1342_v63 = vld [vmem:[%s2110_s21 + $0x28] sm:$0xff]  ;;  %v1644_v2 = vor.u32 %v1772_v60, %v1641_v61  ;;  %v1345_v5 = vld [vmem:[%s2110_s21 + $0x40] sm:$0xff]  ;;  %v1647_v6 = vld [vmem:[%s2071_s23 + $0x30] sm:$0xf] }
  0x20   : > { %1021 = vperm.xlu1 %1883, %v975_v19   ;;  %1016 = vperm.xlu0 %1882, %v974_v20   ;;  %v1775_v7 = vld [vmem:[%s2071_s23 + $0x34] sm:$0xf0]  ;;  %v1681_v9 = vld [vmem:[%s2071_s23 + $0x78] sm:$0xf0]  ;;  %v1774_v11 = vld [vmem:[%s2071_s23 + $0x34] sm:$0xf] }
  0x21   : > { %v1649_v12 = vld [vmem:[%s2071_s23 + $0x38] sm:$0xf0]  ;;  %v1349_v13 = vld [vmem:[%s2110_s21 + $0x60] sm:$0xff]  ;;  %v1351_v20 = vld [vmem:[%s2110_s21 + $0x70] sm:$0xff] }
  0x22   : > { %775 = vmatpush.bf16.msra.mxu0 %v1786_v16  ;;  %1844 = vmatpush.bf16.msra.mxu3 %v1786_v16  ;;  %v1348_v14 = vld [vmem:[%s2110_s21 + $0x58] sm:$0xff]  ;;  %v1652_v17 = vor.u32 %v1774_v11, %v1649_v12  ;;  %v1657_v24 = vld [vmem:[%s2071_s23 + $0x48] sm:$0xf0]  ;;  %v1663_v27 = vld [vmem:[%s2071_s23 + $0x50] sm:$0xf] }
  0x23   : > { %824 = vmatpush.bf16.msra.mxu1 %v2063_v18  ;;  %1026 = vperm.xlu2 %1884, %v976_v28   ;;  %v1352_v19 = vld [vmem:[%s2110_s21 + $0x78] sm:$0xff]  ;;  %v1801_v41 = vld [vmem:[%s2183_s26] sm:$0xff]  }
  0x24   : > { %v1779_v28 = vld [vmem:[%s2071_s23 + $0x54] sm:$0xf0]  ;;  %v1665_v30 = vld [vmem:[%s2071_s23 + $0x58] sm:$0xf0]  ;;  %v1802_v46 = vunpack.c.l.bf16 %v1801_v41 }
  0x25   : > { %v1664_v31 = vor.u32 %v1779_v28, %v1663_v27 }
  0x26   : > { %776 = vmatpush.bf16.msra.mxu0 %v1785_v21  ;;  %1845 = vmatpush.bf16.msra.mxu3 %v1785_v21  ;;  %v1655_v21 = vld [vmem:[%s2071_s23 + $0x40] sm:$0xf] }
  0x27   : > { %825 = vmatpush.bf16.msra.mxu1 %v2080_v22 }
  0x28   : > { %1036 = vperm.xlu1 %1883, %v978_v32   ;;  %1031 = vperm.xlu0 %1882, %v977_v33   ;;  %v1916_v33 = vmov 0.0  }
  0x29   : > { %514 = vst.msk [vmem:[#allocation2] sm:$0xff] %vm513_vm0, %v1916_v33 }
  0x2a   : > { %777 = vmatpush.bf16.msra.mxu0 %v1784_v23  ;;  %1846 = vmatpush.bf16.msra.mxu3 %v1784_v23  ;;  %v1776_v23 = vld [vmem:[%s2071_s23 + $0x44] sm:$0xf]  ;;  %515 = vst.msk [vmem:[#allocation2 + $0x8] sm:$0xff] %vm513_vm0, %v1916_v33 }
  0x2b   : > { %826 = vmatpush.bf16.msra.mxu1 %v1792_v29  ;;  %1041 = vperm.xlu2 %1884, %v979_v37   ;;  %v1660_v26 = vor.u32 %v1776_v23, %v1657_v24  ;;  %516 = vst.msk [vmem:[#allocation2 + $0x10] sm:$0xff] %vm513_vm0, %v1916_v33  ;;  %v1833_v24 = vld [vmem:[%s2183_s26 + $0x10] sm:$0xff]  }
  0x2c   : > { %517 = vst.msk [vmem:[#allocation2 + $0x18] sm:$0xff] %vm513_vm0, %v1916_v33 }
  0x2d   : > { %778 = vmatmul.bf16.vlgmr.msra.gmra.mxu0 %v1624_v34  ;;  %808 = vmatmul.bf16.vlgmr.msra.gmra.mxu3 %v1672_v35  ;;  %518 = vst.msk [vmem:[#allocation2 + $0x20] sm:$0xff] %vm513_vm0, %v1916_v33  ;;  %v1080_v34 = vld [vmem:[%s2404_s4] sm:$0xff] }
  0x2e   : > { %1847 = vmatpush.bf16.msrb.mxu3 %v2001_v1  ;;  %827 = vmatmul.bf16.vlgmr.msra.gmra.mxu1 %v1628_v36  ;;  %v1676_v1 = vor.u32 %v1780_v57, %v1673_v58  ;;  %519 = vst.msk [vmem:[#allocation2 + $0x28] sm:$0xff] %vm513_vm0, %v1916_v33  ;;  %v1803_v57 = vunpack.c.h.bf16 %v1801_v41 }
  0x2f   : > { %520 = vst.msk [vmem:[#allocation2 + $0x30] sm:$0xff] %vm513_vm0, %v1916_v33  ;;  %1148 = vmatpush.msra.mxu2 %v1080_v34 }
  0x30   : > { %1051 = vperm.xlu1 %1883, %v981_v38   ;;  %1046 = vperm.xlu0 %1882, %v980_v39   ;;  %521 = vst.msk [vmem:[#allocation2 + $0x38] sm:$0xff] %vm513_vm0, %v1916_v33  ;;  %v530_v36 = vld [vmem:[#allocation2] sm:$0xff] }
  0x31   : > { %522 = vst.msk [vmem:[#allocation2 + $0x40] sm:$0xff] %vm513_vm0, %v1916_v33  ;;  %v531_v43 = vld [vmem:[#allocation2 + $0x8] sm:$0xff] }
  0x32   : > { %1848 = vmatpush.bf16.msrb.mxu3 %v2010_v4  ;;  %v1346_v4 = vld [vmem:[%s2110_s21 + $0x48] sm:$0xff]  ;;  %523 = vst.msk [vmem:[#allocation2 + $0x48] sm:$0xff] %vm513_vm0, %v1916_v33 }
  0x33   : > { %1056 = vperm.xlu2 %1884, %v982_v44   ;;  %524 = vst.msk [vmem:[#allocation2 + $0x50] sm:$0xff] %vm513_vm0, %v1916_v33 }
  0x34   : > { %525 = vst.msk [vmem:[#allocation2 + $0x58] sm:$0xff] %vm513_vm0, %v1916_v33 }
  0x35   : > { %526 = vst.msk [vmem:[#allocation2 + $0x60] sm:$0xff] %vm513_vm0, %v1916_v33  ;;  %v535_v28 = vld [vmem:[#allocation2 + $0x28] sm:$0xff] }
  0x36   : > { %1849 = vmatpush.bf16.msrb.mxu3 %v2032_v8  ;;  %v1782_v8 = vld [vmem:[%s2071_s23 + $0x74] sm:$0xf]  ;;  %527 = vst.msk [vmem:[#allocation2 + $0x68] sm:$0xff] %vm513_vm0, %v1916_v33 }
  0x37   : > { %v1684_v16 = vor.u32 %v1782_v8, %v1681_v9  ;;  %528 = vst.msk [vmem:[#allocation2 + $0x70] sm:$0xff] %vm513_vm0, %v1916_v33 }
  0x38   : > { %1355 = vperm.xlu1 %1883, %v1337_v47   ;;  %1061 = vperm.xlu0 %1882, %v983_v48   ;;  %529 = vst.msk [vmem:[#allocation2 + $0x78] sm:$0xff] %vm513_vm0, %v1916_v33 }
  0x3a   : > { %1850 = vmatpush.bf16.msrb.mxu3 %v2041_v10  ;;  %v1347_v10 = vld [vmem:[%s2110_s21 + $0x50] sm:$0xff] }
  0x3b   : > { %1360 = vperm.xlu2 %1884, %v1338_v52  }
  0x3d   : > { %783 = vmatmul.bf16.gmra.mxu0 %v1632_v49  ;;  %813 = vmatmul.bf16.gmra.mxu3 %v1680_v50 }
  0x3e   : > { %1851 = vmatpush.bf16.msrb.mxu3 %v2053_v15  ;;  %832 = vmatmul.bf16.gmra.mxu1 %v1636_v51  ;;  %v1648_v15 = vor.u32 %v1775_v7, %v1647_v6 }
  0x40   : > { %1370 = vperm.xlu1 %1883, %v1340_v53   ;;  %1365 = vperm.xlu0 %1882, %v1339_v54   ;;  %v532_v54 = vld [vmem:[#allocation2 + $0x10] sm:$0xff] }
  0x42   : > { %1852 = vmatpush.bf16.msrb.mxu3 %v2063_v18  ;;  %v1350_v18 = vld [vmem:[%s2110_s21 + $0x68] sm:$0xff] }
  0x43   : > { %1375 = vperm.xlu2 %1884, %v1341_v59  }
  0x46   : > { %1853 = vmatpush.bf16.msrb.mxu3 %v2080_v22  ;;  %v1777_v22 = vld [vmem:[%s2071_s23 + $0x44] sm:$0xf0] }
  0x47   : > { %v1656_v25 = vor.u32 %v1777_v22, %v1655_v21 }
  0x48   : > { %1385 = vperm.xlu1 %1883, %v1343_v62   ;;  %1380 = vperm.xlu0 %1882, %v1342_v63   ;;  %v1832_v63 = vld [vmem:[%s2183_s26 + $0x8] sm:$0xff]  }
  0x4a   : > { %1854 = vmatpush.bf16.msrb.mxu3 %v1792_v29  ;;  %v1778_v29 = vld [vmem:[%s2071_s23 + $0x54] sm:$0xf] }
  0x4b   : > { %1390 = vperm.xlu2 %1884, %v1344_v3   ;;  %v1668_v32 = vor.u32 %v1778_v29, %v1665_v30 }
  0x4d   : > { %788 = vmatmul.bf16.gmra.mxu0 %v1640_v0  ;;  %857 = vmatmul.bf16.vlgmr.msrb.gmra.mxu3 %v1676_v1 }
  0x4e   : > { %837 = vmatmul.bf16.gmra.mxu1 %v1644_v2  ;;  %1855 = vmatpush.msra.mxu3 %v1080_v34  ;;  %v533_v2 = vld [vmem:[#allocation2 + $0x18] sm:$0xff] }
  0x50   : > { %1400 = vperm.xlu1 %1883, %v1346_v4   ;;  %1395 = vperm.xlu0 %1882, %v1345_v5   ;;  %v1806_v5 = vunpack.c.l.bf16 %v1832_v63 }
  0x53   : > { %1405 = vperm.xlu2 %1884, %v1347_v10  }
  0x58   : > { %1415 = vperm.xlu1 %1883, %v1349_v13   ;;  %1410 = vperm.xlu0 %1882, %v1348_v14   ;;  %v534_v13 = vld [vmem:[#allocation2 + $0x20] sm:$0xff] }
  0x5b   : > { %1420 = vperm.xlu2 %1884, %v1350_v18  }
  0x5d   : > { %793 = vmatmul.bf16.gmra.mxu0 %v1648_v15  ;;  %862 = vmatmul.bf16.gmra.mxu3 %v1684_v16  ;;  %v1807_v16 = vunpack.c.h.bf16 %v1832_v63 }
  0x5e   : > { %842 = vmatmul.bf16.gmra.mxu1 %v1652_v17 }
  0x60   : > { %1430 = vperm.xlu1 %1883, %v1352_v19   ;;  %1425 = vperm.xlu0 %1882, %v1351_v20   ;;  %v542_v19 = vld [vmem:[#allocation2 + $0x60] sm:$0xff] }
  0x6d   : > { %798 = vmatmul.bf16.gmra.mxu0 %v1656_v25  ;;  %v1007_v33 = vpop.permute.xlu2 %1006 }
  0x6e   : > { %847 = vmatmul.bf16.gmra.mxu1 %v1660_v26 }
  0x7d   : > { %803 = vmatmul.bf16.gmra.mxu0 %v1664_v31  ;;  %v1810_v31 = vunpack.c.l.bf16 %v1833_v24 }
  0x7e   : > { %852 = vmatmul.bf16.gmra.mxu1 %v1668_v32 }
  0x82   : > { %v987_v48 = vpop.permute.xlu0 %986  ;;  %v997_v7 = vpop.permute.xlu1 %996 }
  0x8a   : > { %v992_v62 = vpop.permute.xlu0 %991  ;;  %v1002_v22 = vpop.permute.xlu1 %1001 }
  0xaa   : > { %v779_v35 = vpop.f32.mrf.mxu0 }
  0xab   : > { %v828_v37 = vpop.f32.mrf.mxu1 }
  0xac   : > { %v829_v38 = vadd.f32 %v828_v37, %v779_v35  ;;  %v1017_v35 = vpop.permute.xlu0 %1016 }
  0xae   : > { %v868_v39 = vadd.f32 %v829_v38, %v530_v36  ;;  %v543_v36 = vld [vmem:[#allocation2 + $0x68] sm:$0xff] }
  0xb0   : > { %885 = vst.msk [vmem:[#allocation2] sm:$0xff] %vm513_vm0, %v868_v39  ;;  %v809_v40 = vpop.f32.mrf.mxu3 }
  0xb2   : > { %v781_v42 = vpop.f32.mrf.mxu0 }
  0xb3   : > { %v830_v44 = vpop.f32.mrf.mxu1 }
  0xb4   : > { %v831_v45 = vadd.f32 %v830_v44, %v781_v42 }
  0xb6   : > { %v869_v47 = vadd.f32 %v831_v45, %v531_v43  ;;  %v536_v43 = vld [vmem:[#allocation2 + $0x30] sm:$0xff] }
  0xb7   : > { %v904_v49 = vld [vmem:[#allocation2] sm:$0xff] }
  0xb8   : > { %886 = vst.msk [vmem:[#allocation2 + $0x8] sm:$0xff] %vm513_vm0, %v869_v47  ;;  %v811_v50 = vpop.f32.mrf.mxu3  ;;  %v952_v51 = vadd.f32 %v1802_v46, %v904_v49  ;;  %v1811_v46 = vunpack.c.h.bf16 %v1833_v24  ;;  %v544_v49 = vld [vmem:[#allocation2 + $0x70] sm:$0xff] }
  0xba   : > { %v784_v52 = vpop.f32.mrf.mxu0  ;;  %v1064_v53 = vmul.f32 %v987_v48, %v952_v51 }
  0xbb   : > { %v833_v55 = vpop.f32.mrf.mxu1 }
  0xbc   : > { %v834_v56 = vadd.f32 %v833_v55, %v784_v52  ;;  %1749 = vmatmul.msk.f32.vlgmr.msra.gmra.mxu2 %vm513_vm0, %v1064_v53  ;;  %v2208_v55 = vpop.permute.xlu0 %1031 }
  0xbe   : > { %v870_v58 = vadd.f32 %v834_v56, %v532_v54  ;;  %v1834_v54 = vld [vmem:[%s2183_s26 + $0x18] sm:$0xff]  }
  0xbf   : > { %v905_v59 = vld [vmem:[#allocation2 + $0x8] sm:$0xff]  ;;  %v1814_v63 = vunpack.c.l.bf16 %v1834_v54 }
  0xc0   : > { %887 = vst.msk [vmem:[#allocation2 + $0x10] sm:$0xff] %vm513_vm0, %v870_v58  ;;  %v2190_v60 = vpop.f32.mrf.mxu3  ;;  %v953_v61 = vadd.f32 %v1803_v57, %v905_v59  ;;  %v537_v59 = vld [vmem:[#allocation2 + $0x38] sm:$0xff] }
  0xc2   : > { %v786_v0 = vpop.f32.mrf.mxu0  ;;  %v1065_v1 = vmul.f32 %v992_v62, %v953_v61 }
  0xc3   : > { %v835_v3 = vpop.f32.mrf.mxu1 }
  0xc4   : > { %v836_v4 = vadd.f32 %v835_v3, %v786_v0  ;;  %1750 = vmatmul.msk.f32.gmra.mxu2 %vm513_vm0, %v1065_v1 }
  0xc6   : > { %v871_v6 = vadd.f32 %v836_v4, %v533_v2  ;;  %v545_v2 = vld [vmem:[#allocation2 + $0x78] sm:$0xff] }
  0xc7   : > { %v906_v8 = vld [vmem:[#allocation2 + $0x10] sm:$0xff] }
  0xc8   : > { %888 = vst.msk [vmem:[#allocation2 + $0x18] sm:$0xff] %vm513_vm0, %v871_v6  ;;  %v2195_v9 = vpop.f32.mrf.mxu3  ;;  %v954_v10 = vadd.f32 %v1806_v5, %v906_v8  ;;  %v538_v8 = vld [vmem:[#allocation2 + $0x40] sm:$0xff] }
  0xca   : > { %v789_v11 = vpop.f32.mrf.mxu0  ;;  %v1066_v12 = vmul.f32 %v997_v7, %v954_v10 }
  0xcb   : > { %v838_v14 = vpop.f32.mrf.mxu1 }
  0xcc   : > { %v839_v15 = vadd.f32 %v838_v14, %v789_v11  ;;  %1751 = vmatmul.msk.f32.gmra.mxu2 %vm513_vm0, %v1066_v12  ;;  %v2214_v11 = vpop.permute.xlu0 %1046 }
  0xce   : > { %v872_v17 = vadd.f32 %v839_v15, %v534_v13  ;;  %v1815_v13 = vunpack.c.h.bf16 %v1834_v54 }
  0xcf   : > { %v907_v18 = vld [vmem:[#allocation2 + $0x18] sm:$0xff] }
  0xd0   : > { %889 = vst.msk [vmem:[#allocation2 + $0x20] sm:$0xff] %vm513_vm0, %v872_v17  ;;  %v858_v20 = vpop.f32.mrf.mxu3  ;;  %v955_v21 = vadd.f32 %v1807_v16, %v907_v18  ;;  %v1022_v17 = vpop.permute.xlu1 %1021 }
  0xd1   : > { %v859_v23 = vadd.f32 %v858_v20, %v809_v40 }
  0xd2   : > { %v791_v25 = vpop.f32.mrf.mxu0  ;;  %v1067_v26 = vmul.f32 %v1002_v22, %v955_v21  ;;  %v539_v22 = vld [vmem:[#allocation2 + $0x48] sm:$0xff] }
  0xd3   : > { %v880_v27 = vadd.f32 %v859_v23, %v542_v19  ;;  %v840_v29 = vpop.f32.mrf.mxu1  ;;  %v1835_v19 = vld [vmem:[%s2183_s26 + $0x20] sm:$0xff]  }
  0xd4   : > { %v841_v30 = vadd.f32 %v840_v29, %v791_v25  ;;  %1752 = vmatmul.msk.f32.gmra.mxu2 %vm513_vm0, %v1067_v26  ;;  %v1818_v26 = vunpack.c.l.bf16 %v1835_v19 }
  0xd5   : > { %897 = vst.msk [vmem:[#allocation2 + $0x60] sm:$0xff] %vm513_vm0, %v880_v27 }
  0xd6   : > { %v873_v32 = vadd.f32 %v841_v30, %v535_v28  ;;  %v1062_v28 = vpop.permute.xlu0 %1061 }
  0xd7   : > { %v908_v34 = vld [vmem:[#allocation2 + $0x20] sm:$0xff] }
  0xd8   : > { %890 = vst.msk [vmem:[#allocation2 + $0x28] sm:$0xff] %vm513_vm0, %v873_v32  ;;  %v860_v37 = vpop.f32.mrf.mxu3  ;;  %v956_v38 = vadd.f32 %v1810_v31, %v908_v34 }
  0xd9   : > { %v861_v39 = vadd.f32 %v860_v37, %v811_v50  ;;  %v1012_v50 = vpop.permute.xlu2 %1011 }
  0xda   : > { %v794_v40 = vpop.f32.mrf.mxu0  ;;  %v1068_v41 = vmul.f32 %v1007_v33, %v956_v38 }
  0xdb   : > { %v881_v42 = vadd.f32 %v861_v39, %v543_v36  ;;  %v843_v44 = vpop.f32.mrf.mxu1  ;;  %v540_v36 = vld [vmem:[#allocation2 + $0x50] sm:$0xff]  ;;  %v1819_v39 = vunpack.c.h.bf16 %v1835_v19 }
  0xdc   : > { %v844_v45 = vadd.f32 %v843_v44, %v794_v40  ;;  %1753 = vmatmul.msk.f32.gmra.mxu2 %vm513_vm0, %v1068_v41 }
  0xdd   : > { %898 = vst.msk [vmem:[#allocation2 + $0x68] sm:$0xff] %vm513_vm0, %v881_v42 }
  0xde   : > { %v874_v47 = vadd.f32 %v844_v45, %v536_v43  ;;  %v1836_v43 = vld [vmem:[%s2183_s26 + $0x28] sm:$0xff]  }
  0xdf   : > { %v909_v48 = vld [vmem:[#allocation2 + $0x28] sm:$0xff] }
  0xe0   : > { %891 = vst.msk [vmem:[#allocation2 + $0x30] sm:$0xff] %vm513_vm0, %v874_v47  ;;  %v863_v51 = vpop.f32.mrf.mxu3  ;;  %v957_v52 = vadd.f32 %v1811_v46, %v909_v48  ;;  %v541_v46 = vld [vmem:[#allocation2 + $0x58] sm:$0xff] }
  0xe1   : > { %v864_v53 = vadd.f32 %v863_v51, %v2190_v60  ;;  %v1027_v33 = vpop.permute.xlu2 %1026 }
  0xe2   : > { %v796_v56 = vpop.f32.mrf.mxu0  ;;  %v1069_v57 = vmul.f32 %v1012_v50, %v957_v52 }
  0xe3   : > { %v882_v58 = vadd.f32 %v864_v53, %v544_v49  ;;  %v845_v61 = vpop.f32.mrf.mxu1  ;;  %v1822_v49 = vunpack.c.l.bf16 %v1836_v43  ;;  %v1037_v53 = vpop.permute.xlu1 %1036 }
  0xe4   : > { %v846_v62 = vadd.f32 %v845_v61, %v796_v56  ;;  %1754 = vmatmul.msk.f32.gmra.mxu2 %vm513_vm0, %v1069_v57  ;;  %v1823_v56 = vunpack.c.h.bf16 %v1836_v43 }
  0xe5   : > { %899 = vst.msk [vmem:[#allocation2 + $0x70] sm:$0xff] %vm513_vm0, %v882_v58  ;;  %v1837_v58 = vld [vmem:[%s2183_s26 + $0x30] sm:$0xff]  }
  0xe6   : > { %v875_v0 = vadd.f32 %v846_v62, %v537_v59  ;;  %v1826_v62 = vunpack.c.l.bf16 %v1837_v58 }
  0xe7   : > { %v910_v1 = vld [vmem:[#allocation2 + $0x30] sm:$0xff] }
  0xe8   : > { %892 = vst.msk [vmem:[#allocation2 + $0x38] sm:$0xff] %vm513_vm0, %v875_v0  ;;  %v865_v60 = vpop.f32.mrf.mxu3  ;;  %v958_v3 = vadd.f32 %v1814_v63, %v910_v1  ;;  %v916_v63 = vld [vmem:[#allocation2 + $0x60] sm:$0xff] }
  0xe9   : > { %v866_v4 = vadd.f32 %v865_v60, %v2195_v9  ;;  %v2220_v9 = vld [vmem:[%s2183_s26 + $0x38] sm:$0xff]   ;;  %v964_v0 = vadd.f32 %v1826_v62, %v916_v63  ;;  %v1198_v1 = vld [vmem:[%s2409_s9] sm:$0x1]  ;;  %v1827_v60 = vunpack.c.h.bf16 %v1837_v58  ;;  %v1366_v58 = vpop.permute.xlu0 %1365 }
  0xea   : > { %v799_v5 = vpop.f32.mrf.mxu0  ;;  %v1070_v6 = vmul.f32 %v1017_v35, %v958_v3  ;;  %v1831_v18 = vunpack.c.h.bf16 %v2220_v9  ;;  %v917_v3 = vld [vmem:[#allocation2 + $0x68] sm:$0xff] }
  0xeb   : > { %v883_v7 = vadd.f32 %v866_v4, %v545_v2  ;;  %v848_v10 = vpop.f32.mrf.mxu1  ;;  %v1076_v2 = vmul.f32 %v2214_v11, %v964_v0  ;;  %v1199_v4 = vadd.f32 1e-05, %v1198_v1 }
  0xec   : > { %v849_v12 = vadd.f32 %v848_v10, %v799_v5  ;;  %1755 = vmatmul.msk.f32.gmra.mxu2 %vm513_vm0, %v1070_v6  ;;  %v965_v5 = vadd.f32 %v1827_v60, %v917_v3  ;;  %v1052_v6 = vpop.permute.xlu1 %1051  ;;  %v918_v10 = vld [vmem:[#allocation2 + $0x70] sm:$0xff] }
  0xed   : > { %900 = vst.msk [vmem:[#allocation2 + $0x78] sm:$0xff] %vm513_vm0, %v883_v7  ;;  %1889 = vrsqrt.f32 %v1199_v4  ;;  %vm1206_vm1 = vweird.f32 %v1199_v4 }
  0xee   : > { %v876_v14 = vadd.f32 %v849_v12, %v538_v8  ;;  %v1077_v7 = vmul.f32 %v1052_v6, %v965_v5  ;;  %v1830_v8 = vunpack.c.l.bf16 %v2220_v9  ;;  %v2247_v9 = vld [vmem:[%s2405_s5] ss:$0 sm:$0xff] }
  0xef   : > { %v911_v15 = vld [vmem:[#allocation2 + $0x38] sm:$0xff] }
  0xf0   : > { %893 = vst.msk [vmem:[#allocation2 + $0x40] sm:$0xff] %vm513_vm0, %v876_v14  ;;  %v959_v16 = vadd.f32 %v1815_v13, %v911_v15  ;;  %v966_v13 = vadd.f32 %v1830_v8, %v918_v10 }
  0xf2   : > { %v801_v20 = vpop.f32.mrf.mxu0  ;;  %v1071_v21 = vmul.f32 %v1022_v17, %v959_v16 }
  0xf3   : > { %v850_v23 = vpop.f32.mrf.mxu1  ;;  %v1890_v12 = vpop.eup %1889 }
  0xf4   : > { %v851_v24 = vadd.f32 %v850_v23, %v801_v20  ;;  %1756 = vmatmul.msk.f32.gmra.mxu2 %vm513_vm0, %v1071_v21  ;;  %v919_v25 = vld [vmem:[#allocation2 + $0x78] sm:$0xff]  ;;  %v1201_v15 = vmul.f32 %v1890_v12, %v1199_v4  ;;  %vm1207_vm2 = vweird.f32 %v1890_v12  ;;  %v2252_v21 = vld [vmem:[%s2408_s8] ss:$0 sm:$0xff] }
  0xf5   : > { %v967_v27 = vadd.f32 %v1831_v18, %v919_v25  ;;  %vm1208_vm3 = vmor %vm1206_vm1, %vm1207_vm2 }
  0xf6   : > { %v877_v29 = vadd.f32 %v851_v24, %v539_v22  ;;  %v1202_v11 = vmul.f32 %v1890_v12, %v1201_v15 }
  0xf7   : > { %v1079_v30 = vmul.f32 %v1062_v28, %v967_v27  ;;  %v912_v31 = vld [vmem:[#allocation2 + $0x40] sm:$0xff] }
  0xf8   : > { %894 = vst.msk [vmem:[#allocation2 + $0x48] sm:$0xff] %vm513_vm0, %v877_v29  ;;  %v960_v32 = vadd.f32 %v1818_v26, %v912_v31  ;;  %v1203_v17 = vmul.f32 0.5, %v1202_v11  ;;  %v2261_v26 = vld [vmem:[%s2406_s6] ss:$0 sm:$0xff] }
  0xf9   : > { %1764 = vmatmul.msk.f32.vlgmr.msra.gmra.mxu3 %vm513_vm0, %v1079_v30  ;;  %v2267_v28 = vld [vmem:[%s2407_s7] ss:$0 sm:$0xff] }
  0xfa   : > { %v804_v34 = vpop.f32.mrf.mxu0  ;;  %v1072_v35 = vmul.f32 %v1027_v33, %v960_v32  ;;  %v1204_v18 = vsub.f32 1.5, %v1203_v17 }
  0xfb   : > { %v853_v37 = vpop.f32.mrf.mxu1 }
  0xfc   : > { %v854_v38 = vadd.f32 %v853_v37, %v804_v34  ;;  %1757 = vmatmul.msk.f32.gmra.mxu2 %vm513_vm0, %v1072_v35  ;;  %v1205_v19 = vmul.f32 %v1890_v12, %v1204_v18  ;;  %v1356_v35 = vpop.permute.xlu1 %1355 }
  0xfe   : > { %v878_v40 = vadd.f32 %v854_v38, %v540_v36  ;;  %v1209_v20 = vsel %vm1208_vm3, %v1890_v12, %v1205_v19 }
  0xff   : > { %v913_v41 = vld [vmem:[#allocation2 + $0x48] sm:$0xff]  ;;  %v2255_v24 = vperm.slane %v1209_v20, 0 }
 0x100   : > { %895 = vst.msk [vmem:[#allocation2 + $0x50] sm:$0xff] %vm513_vm0, %v878_v40  ;;  %v961_v42 = vadd.f32 %v1819_v39, %v913_v41 }
 0x102   : > { %v806_v44 = vpop.f32.mrf.mxu0  ;;  %v1073_v45 = vmul.f32 %v2208_v55, %v961_v42  ;;  %v1042_v55 = vpop.permute.xlu2 %1041 }
 0x103   : > { %v855_v47 = vpop.f32.mrf.mxu1 }
 0x104   : > { %v856_v48 = vadd.f32 %v855_v47, %v806_v44  ;;  %1758 = vmatmul.msk.f32.gmra.mxu2 %vm513_vm0, %v1073_v45  ;;  %v1371_v60 = vpop.permute.xlu1 %1370 }
 0x106   : > { %v879_v51 = vadd.f32 %v856_v48, %v541_v46 }
 0x107   : > { %v914_v52 = vld [vmem:[#allocation2 + $0x50] sm:$0xff] }
 0x108   : > { %896 = vst.msk [vmem:[#allocation2 + $0x58] sm:$0xff] %vm513_vm0, %v879_v51  ;;  %v962_v50 = vadd.f32 %v1822_v49, %v914_v52 }
 0x10a   : > { %v1074_v54 = vmul.f32 %v1037_v53, %v962_v50  ;;  %v1057_v14 = vpop.permute.xlu2 %1056 }
 0x10b   : > { %v1078_v16 = vmul.f32 %v1057_v14, %v966_v13 }
 0x10c   : > { %1759 = vmatmul.msk.f32.gmra.mxu2 %vm513_vm0, %v1074_v54  ;;  %v1386_v11 = vpop.permute.xlu1 %1385 }
 0x10f   : > { %v915_v57 = vld [vmem:[#allocation2 + $0x58] sm:$0xff] }
 0x110   : > { %v963_v59 = vadd.f32 %v1823_v56, %v915_v57 }
 0x112   : > { %v1075_v61 = vmul.f32 %v1042_v55, %v963_v59  ;;  %v1361_v46 = vpop.permute.xlu2 %1360 }
 0x114   : > { %1760 = vmatmul.msk.f32.gmra.mxu2 %vm513_vm0, %v1075_v61 }
 0x11a   : > { %v1376_v17 = vpop.permute.xlu2 %1375 }
 0x11c   : > { %1761 = vmatmul.msk.f32.gmra.mxu2 %vm513_vm0, %v1076_v2 }
 0x124   : > { %1762 = vmatmul.msk.f32.gmra.mxu2 %vm513_vm0, %v1077_v7 }
 0x12c   : > { %1763 = vmatmul.msk.f32.gmra.mxu2 %vm513_vm0, %v1078_v16 }
 0x13f   : > { %v1150_v22 = vpop.f32.mrf.mxu2 }
 0x140   : > { %v1151_v23 = vadd.f32 %v2247_v9, %v1150_v22 }
 0x142   : > { %v1214_v25 = vsub.f32 %v1151_v23, %v2252_v21 }
 0x144   : > { %v1233_v27 = vmul.f32 %v2255_v24, %v1214_v25 }
 0x146   : > { %v1253_v29 = vmul.f32 %v2261_v26, %v1233_v27 }
 0x147   : > { %v1153_v30 = vpop.f32.mrf.mxu2 }
 0x148   : > { %v1273_v31 = vadd.f32 %v2267_v28, %v1253_v29  ;;  %v1154_v32 = vadd.f32 %v2247_v9, %v1153_v30 }
 0x14a   : > { %vm1289_vm4 = vcmp.ge.f32.partialorder %v1273_v31, 0.0  ;;  %v1305_v33 = vmul.f32 0.01, %v1273_v31  ;;  %v1215_v34 = vsub.f32 %v1154_v32, %v2252_v21  ;;  %v1381_v32 = vpop.permute.xlu0 %1380 }
 0x14c   : > { %v1321_v36 = vsel %vm1289_vm4, %v1273_v31, %v1305_v33  ;;  %v1234_v37 = vmul.f32 %v2255_v24, %v1215_v34 }
 0x14d   : > { %v1433_v38 = vmul.f32 %v1356_v35, %v1321_v36  ;;  %v2316_v35 = vpop.permute.xlu1 %1400 }
 0x14e   : > { %v1254_v39 = vmul.f32 %v2261_v26, %v1234_v37 }
 0x14f   : > { %v1449_v40 = vpack.c.bf16 %v1433_v38, %v1433_v38  ;;  %v1156_v41 = vpop.f32.mrf.mxu2 }
 0x150   : > { %v1274_v42 = vadd.f32 %v2267_v28, %v1254_v39  ;;  %v1157_v43 = vadd.f32 %v2247_v9, %v1156_v41 }
 0x151   : > { %1466 = vst.msk [vmem:[%s2279_s24] sm:$0xf] %vm1465_vm5, %v1449_v40 }
 0x152   : > { %vm1290_vm6 = vcmp.ge.f32.partialorder %v1274_v42, 0.0  ;;  %v1306_v44 = vmul.f32 0.01, %v1274_v42  ;;  %v1216_v45 = vsub.f32 %v1157_v43, %v2252_v21 }
 0x154   : > { %v1322_v47 = vsel %vm1290_vm6, %v1274_v42, %v1306_v44  ;;  %v1235_v48 = vmul.f32 %v2255_v24, %v1216_v45 }
 0x155   : > { %v1434_v49 = vmul.f32 %v1361_v46, %v1322_v47 }
 0x156   : > { %v1255_v51 = vmul.f32 %v2261_v26, %v1235_v48 }
 0x157   : > { %v1450_v52 = vpack.c.bf16 %v1434_v49, %v1434_v49  ;;  %v1159_v50 = vpop.f32.mrf.mxu2 }
 0x158   : > { %v1275_v53 = vadd.f32 %v2267_v28, %v1255_v51  ;;  %v1160_v54 = vadd.f32 %v2247_v9, %v1159_v50  ;;  %v2327_v51 = vpop.permute.xlu1 %1415 }
 0x159   : > { %1467 = vst.msk [vmem:[%s2279_s24 + $0x4] sm:$0xf] %vm1465_vm5, %v1450_v52 }
 0x15a   : > { %vm1291_vm7 = vcmp.ge.f32.partialorder %v1275_v53, 0.0  ;;  %v1307_v56 = vmul.f32 0.01, %v1275_v53  ;;  %v1217_v57 = vsub.f32 %v1160_v54, %v2252_v21 }
 0x15c   : > { %v1323_v59 = vsel %vm1291_vm7, %v1275_v53, %v1307_v56  ;;  %v1236_v55 = vmul.f32 %v2255_v24, %v1217_v57 }
 0x15d   : > { %v1435_v61 = vmul.f32 %v1366_v58, %v1323_v59 }
 0x15e   : > { %v1256_v62 = vmul.f32 %v2261_v26, %v1236_v55 }
 0x15f   : > { %v1451_v63 = vpack.c.bf16 %v1435_v61, %v1435_v61  ;;  %v1162_v0 = vpop.f32.mrf.mxu2  ;;  %v1391_v61 = vpop.permute.xlu2 %1390 }
 0x160   : > { %v1276_v1 = vadd.f32 %v2267_v28, %v1256_v62  ;;  %v1163_v2 = vadd.f32 %v2247_v9, %v1162_v0 }
 0x161   : > { %1468 = vst.msk [vmem:[%s2279_s24 + $0x8] sm:$0xf] %vm1465_vm5, %v1451_v63 }
 0x162   : > { %vm1292_vm8 = vcmp.ge.f32.partialorder %v1276_v1, 0.0  ;;  %v1308_v3 = vmul.f32 0.01, %v1276_v1  ;;  %v1218_v4 = vsub.f32 %v1163_v2, %v2252_v21 }
 0x164   : > { %v1324_v5 = vsel %vm1292_vm8, %v1276_v1, %v1308_v3  ;;  %v1237_v6 = vmul.f32 %v2255_v24, %v1218_v4 }
 0x165   : > { %v1436_v7 = vmul.f32 %v1371_v60, %v1324_v5 }
 0x166   : > { %v1257_v8 = vmul.f32 %v2261_v26, %v1237_v6 }
 0x167   : > { %v1452_v10 = vpack.c.bf16 %v1436_v7, %v1436_v7  ;;  %v1165_v12 = vpop.f32.mrf.mxu2  ;;  %v1431_v7 = vpop.permute.xlu1 %1430 }
 0x168   : > { %v1277_v13 = vadd.f32 %v2267_v28, %v1257_v8  ;;  %v1166_v14 = vadd.f32 %v2247_v9, %v1165_v12 }
 0x169   : > { %1469 = vst.msk [vmem:[%s2279_s24 + $0xc] sm:$0xf] %vm1465_vm5, %v1452_v10 }
 0x16a   : > { %vm1293_vm9 = vcmp.ge.f32.partialorder %v1277_v13, 0.0  ;;  %v1309_v15 = vmul.f32 0.01, %v1277_v13  ;;  %v1219_v16 = vsub.f32 %v1166_v14, %v2252_v21  ;;  %v1396_v14 = vpop.permute.xlu0 %1395 }
 0x16c   : > { %v1325_v18 = vsel %vm1293_vm9, %v1277_v13, %v1309_v15  ;;  %v1238_v19 = vmul.f32 %v2255_v24, %v1219_v16 }
 0x16d   : > { %v1437_v20 = vmul.f32 %v1376_v17, %v1325_v18 }
 0x16e   : > { %v1258_v22 = vmul.f32 %v2261_v26, %v1238_v19 }
 0x16f   : > { %v1453_v23 = vpack.c.bf16 %v1437_v20, %v1437_v20  ;;  %v1168_v25 = vpop.f32.mrf.mxu2 }
 0x170   : > { %v1278_v27 = vadd.f32 %v2267_v28, %v1258_v22  ;;  %v1169_v29 = vadd.f32 %v2247_v9, %v1168_v25 }
 0x171   : > { %1470 = vst.msk [vmem:[%s2279_s24 + $0x10] sm:$0xf] %vm1465_vm5, %v1453_v23 }
 0x172   : > { %vm1294_vm10 = vcmp.ge.f32.partialorder %v1278_v27, 0.0  ;;  %v1310_v30 = vmul.f32 0.01, %v1278_v27  ;;  %v1220_v31 = vsub.f32 %v1169_v29, %v2252_v21 }
 0x174   : > { %v1326_v33 = vsel %vm1294_vm10, %v1278_v27, %v1310_v30  ;;  %v1239_v34 = vmul.f32 %v2255_v24, %v1220_v31 }
 0x175   : > { %v1438_v36 = vmul.f32 %v1381_v32, %v1326_v33 }
 0x176   : > { %v1259_v37 = vmul.f32 %v2261_v26, %v1239_v34 }
 0x177   : > { %v1454_v38 = vpack.c.bf16 %v1438_v36, %v1438_v36  ;;  %v1171_v39 = vpop.f32.mrf.mxu2 }
 0x178   : > { %v1279_v40 = vadd.f32 %v2267_v28, %v1259_v37  ;;  %v1172_v41 = vadd.f32 %v2247_v9, %v1171_v39 }
 0x179   : > { %1471 = vst.msk [vmem:[%s2279_s24 + $0x14] sm:$0xf] %vm1465_vm5, %v1454_v38 }
 0x17a   : > { %vm1295_vm11 = vcmp.ge.f32.partialorder %v1279_v40, 0.0  ;;  %v1311_v42 = vmul.f32 0.01, %v1279_v40  ;;  %v1221_v43 = vsub.f32 %v1172_v41, %v2252_v21 }
 0x17c   : > { %v1327_v44 = vsel %vm1295_vm11, %v1279_v40, %v1311_v42  ;;  %v1240_v45 = vmul.f32 %v2255_v24, %v1221_v43  ;;  %v1195_v46 = vpop.f32.mrf.mxu3  ;;  %v1406_v40 = vpop.permute.xlu2 %1405 }
 0x17d   : > { %v1439_v47 = vmul.f32 %v1386_v11, %v1327_v44  ;;  %v1196_v48 = vadd.f32 %v2247_v9, %v1195_v46 }
 0x17e   : > { %v1260_v49 = vmul.f32 %v2261_v26, %v1240_v45 }
 0x17f   : > { %v1455_v52 = vpack.c.bf16 %v1439_v47, %v1439_v47  ;;  %v1229_v50 = vsub.f32 %v1196_v48, %v2252_v21  ;;  %v1174_v53 = vpop.f32.mrf.mxu2 }
 0x180   : > { %v1280_v54 = vadd.f32 %v2267_v28, %v1260_v49  ;;  %v1175_v56 = vadd.f32 %v2247_v9, %v1174_v53 }
 0x181   : > { %1472 = vst.msk [vmem:[%s2279_s24 + $0x18] sm:$0xf] %vm1465_vm5, %v1455_v52  ;;  %v1248_v57 = vmul.f32 %v2255_v24, %v1229_v50  ;;  %v1411_v52 = vpop.permute.xlu0 %1410 }
 0x182   : > { %vm1296_vm12 = vcmp.ge.f32.partialorder %v1280_v54, 0.0  ;;  %v1312_v58 = vmul.f32 0.01, %v1280_v54  ;;  %v1222_v59 = vsub.f32 %v1175_v56, %v2252_v21 }
 0x183   : > { %v1268_v55 = vmul.f32 %v2261_v26, %v1248_v57 }
 0x184   : > { %v1328_v62 = vsel %vm1296_vm12, %v1280_v54, %v1312_v58  ;;  %v1241_v63 = vmul.f32 %v2255_v24, %v1222_v59 }
 0x185   : > { %v1440_v0 = vmul.f32 %v1391_v61, %v1328_v62  ;;  %v1288_v1 = vadd.f32 %v2267_v28, %v1268_v55 }
 0x186   : > { %v1261_v2 = vmul.f32 %v2261_v26, %v1241_v63 }
 0x187   : > { %v1456_v60 = vpack.c.bf16 %v1440_v0, %v1440_v0  ;;  %vm1304_vm13 = vcmp.ge.f32.partialorder %v1288_v1, 0.0  ;;  %v1320_v3 = vmul.f32 0.01, %v1288_v1  ;;  %v1177_v4 = vpop.f32.mrf.mxu2 }
 0x188   : > { %v1281_v5 = vadd.f32 %v2267_v28, %v1261_v2  ;;  %v1178_v6 = vadd.f32 %v2247_v9, %v1177_v4 }
 0x189   : > { %1473 = vst.msk [vmem:[%s2279_s24 + $0x1c] sm:$0xf] %vm1465_vm5, %v1456_v60  ;;  %v1336_v8 = vsel %vm1304_vm13, %v1288_v1, %v1320_v3 }
 0x18a   : > { %v1448_v10 = vmul.f32 %v1431_v7, %v1336_v8  ;;  %vm1297_vm14 = vcmp.ge.f32.partialorder %v1281_v5, 0.0  ;;  %v1313_v12 = vmul.f32 0.01, %v1281_v5  ;;  %v1223_v13 = vsub.f32 %v1178_v6, %v2252_v21  ;;  %v1421_v8 = vpop.permute.xlu2 %1420 }
 0x18c   : > { %v1464_v15 = vpack.c.bf16 %v1448_v10, %v1448_v10  ;;  %v1329_v16 = vsel %vm1297_vm14, %v1281_v5, %v1313_v12  ;;  %v1242_v11 = vmul.f32 %v2255_v24, %v1223_v13 }
 0x18d   : > { %v1441_v17 = vmul.f32 %v1396_v14, %v1329_v16  ;;  %v1426_v16 = vpop.permute.xlu0 %1425 }
 0x18e   : > { %1481 = vst.msk [vmem:[%s2279_s24 + $0x3c] sm:$0xf] %vm1465_vm5, %v1464_v15  ;;  %v1262_v18 = vmul.f32 %v2261_v26, %v1242_v11 }
 0x18f   : > { %v1457_v19 = vpack.c.bf16 %v1441_v17, %v1441_v17  ;;  %v1180_v20 = vpop.f32.mrf.mxu2 }
 0x190   : > { %v1282_v22 = vadd.f32 %v2267_v28, %v1262_v18  ;;  %v1181_v23 = vadd.f32 %v2247_v9, %v1180_v20 }
 0x191   : > { %1474 = vst.msk [vmem:[%s2279_s24 + $0x20] sm:$0xf] %vm1465_vm5, %v1457_v19 }
 0x192   : > { %vm1298_vm15 = vcmp.ge.f32.partialorder %v1282_v22, 0.0  ;;  %v1314_v25 = vmul.f32 0.01, %v1282_v22  ;;  %v1224_v27 = vsub.f32 %v1181_v23, %v2252_v21 }
 0x194   : > { %v1330_v29 = vsel %vm1298_vm15, %v1282_v22, %v1314_v25  ;;  %v1243_v30 = vmul.f32 %v2255_v24, %v1224_v27 }
 0x195   : > { %v1442_v31 = vmul.f32 %v2316_v35, %v1330_v29 }
 0x196   : > { %v1263_v32 = vmul.f32 %v2261_v26, %v1243_v30 }
 0x197   : > { %v1458_v33 = vpack.c.bf16 %v1442_v31, %v1442_v31  ;;  %v1183_v34 = vpop.f32.mrf.mxu2 }
 0x198   : > { %v1283_v36 = vadd.f32 %v2267_v28, %v1263_v32  ;;  %v1184_v37 = vadd.f32 %v2247_v9, %v1183_v34 }
 0x199   : > { %1475 = vst.msk [vmem:[%s2279_s24 + $0x24] sm:$0xf] %vm1465_vm5, %v1458_v33 }
 0x19a   : > { %vm1299_vm0 = vcmp.ge.f32.partialorder %v1283_v36, 0.0  ;;  %v1315_v38 = vmul.f32 0.01, %v1283_v36  ;;  %v1225_v39 = vsub.f32 %v1184_v37, %v2252_v21 }
 0x19c   : > { %v1331_v41 = vsel %vm1299_vm0, %v1283_v36, %v1315_v38  ;;  %v1244_v42 = vmul.f32 %v2255_v24, %v1225_v39 }
 0x19d   : > { %v1443_v35 = vmul.f32 %v1406_v40, %v1331_v41 }
 0x19e   : > { %v1264_v43 = vmul.f32 %v2261_v26, %v1244_v42 }
 0x19f   : > { %v1459_v44 = vpack.c.bf16 %v1443_v35, %v1443_v35  ;;  %v1186_v45 = vpop.f32.mrf.mxu2 }
 0x1a0   : > { %v1284_v46 = vadd.f32 %v2267_v28, %v1264_v43  ;;  %v1187_v47 = vadd.f32 %v2247_v9, %v1186_v45 }
 0x1a1   : > { %1476 = vst.msk [vmem:[%s2279_s24 + $0x28] sm:$0xf] %vm1465_vm5, %v1459_v44 }
 0x1a2   : > { %vm1300_vm1 = vcmp.ge.f32.partialorder %v1284_v46, 0.0  ;;  %v1316_v48 = vmul.f32 0.01, %v1284_v46  ;;  %v1226_v49 = vsub.f32 %v1187_v47, %v2252_v21 }
 0x1a4   : > { %v1332_v50 = vsel %vm1300_vm1, %v1284_v46, %v1316_v48  ;;  %v1245_v53 = vmul.f32 %v2255_v24, %v1226_v49 }
 0x1a5   : > { %v1444_v54 = vmul.f32 %v1411_v52, %v1332_v50 }
 0x1a6   : > { %v1265_v56 = vmul.f32 %v2261_v26, %v1245_v53 }
 0x1a7   : > { %v1460_v57 = vpack.c.bf16 %v1444_v54, %v1444_v54  ;;  %v1189_v58 = vpop.f32.mrf.mxu2 }
 0x1a8   : > { %v1285_v59 = vadd.f32 %v2267_v28, %v1265_v56  ;;  %v1190_v55 = vadd.f32 %v2247_v9, %v1189_v58 }
 0x1a9   : > { %1477 = vst.msk [vmem:[%s2279_s24 + $0x2c] sm:$0xf] %vm1465_vm5, %v1460_v57 }
 0x1aa   : > { %vm1301_vm2 = vcmp.ge.f32.partialorder %v1285_v59, 0.0  ;;  %v1317_v61 = vmul.f32 0.01, %v1285_v59  ;;  %v1227_v62 = vsub.f32 %v1190_v55, %v2252_v21 }
 0x1ac   : > { %v1333_v63 = vsel %vm1301_vm2, %v1285_v59, %v1317_v61  ;;  %v1246_v0 = vmul.f32 %v2255_v24, %v1227_v62 }
 0x1ad   : > { %v1445_v1 = vmul.f32 %v2327_v51, %v1333_v63 }
 0x1ae   : > { %v1266_v2 = vmul.f32 %v2261_v26, %v1246_v0 }
 0x1af   : > { %v1461_v60 = vpack.c.bf16 %v1445_v1, %v1445_v1  ;;  %v1192_v3 = vpop.f32.mrf.mxu2 }
 0x1b0   : > { %v1286_v4 = vadd.f32 %v2267_v28, %v1266_v2  ;;  %v1193_v5 = vadd.f32 %v2247_v9, %v1192_v3 }
 0x1b1   : > { %1478 = vst.msk [vmem:[%s2279_s24 + $0x30] sm:$0xf] %vm1465_vm5, %v1461_v60 }
 0x1b2   : > { %vm1302_vm3 = vcmp.ge.f32.partialorder %v1286_v4, 0.0  ;;  %v1318_v6 = vmul.f32 0.01, %v1286_v4  ;;  %v1228_v7 = vsub.f32 %v1193_v5, %v2252_v21 }
 0x1b4   : > { %v1334_v10 = vsel %vm1302_vm3, %v1286_v4, %v1318_v6  ;;  %v1247_v51 = vmul.f32 %v2255_v24, %v1228_v7 }
 0x1b5   : > { %v1446_v12 = vmul.f32 %v1421_v8, %v1334_v10 }
 0x1b6   : > { %v1267_v13 = vmul.f32 %v2261_v26, %v1247_v51 }
 0x1b7   : > { %v1462_v14 = vpack.c.bf16 %v1446_v12, %v1446_v12 }
 0x1b8   : > { %v1287_v15 = vadd.f32 %v2267_v28, %v1267_v13 }
 0x1b9   : > { %1479 = vst.msk [vmem:[%s2279_s24 + $0x34] sm:$0xf] %vm1465_vm5, %v1462_v14 }
 0x1ba   : > { %vm1303_vm4 = vcmp.ge.f32.partialorder %v1287_v15, 0.0  ;;  %v1319_v9 = vmul.f32 0.01, %v1287_v15 }
 0x1bc   : > { %v1335_v11 = vsel %vm1303_vm4, %v1287_v15, %v1319_v9 }
 0x1bd   : > { %v1447_v17 = vmul.f32 %v1426_v16, %v1335_v11 }
 0x1bf   : > { %v1463_v18 = vpack.c.bf16 %v1447_v17, %v1447_v17 }
 0x1c1   : > { %1480 = vst.msk [vmem:[%s2279_s24 + $0x38] sm:$0xf] %vm1465_vm5, %v1463_v18 }
 0x1c2 PF: > { %s21_s19 = sadd.s32 1, %s1913_s19   ;;  %s2412_s17 = smov %s1909_s18 }
 0x1c3   : > { %p18_p5 = scmp.ge.s32.totalorder %s21_s19, 4   ;;  %s2413_s18 = smov %s2415_s20 }
 0x1c5   :  { %20 = sbr.rel (!%p18_p5) target bundleno = 2 (0x2), region = 114 }

// kernel: seal_forward.11
= control target key start
LH: loop header
LB: loop body
LE: loop exit
PB: predicated region body
PF: predicated region fallthrough
CT: control target
= control target key end

     0   :  { %s657_s12 = smov 0   ;;  %s751_s0 = inlined_call_operand.vmem [shape: bf16[256,16], index: 0, kind: input, shape index: {}]   ;;  %s752_s1 = inlined_call_operand.vmem [shape: f32[16,8], index: 1, kind: input, shape index: {}]   ;;  %s753_s2 = inlined_call_operand.vmem [shape: f32[256,1], index: 2, kind: input, shape index: {}]   ;;  %s754_s3 = inlined_call_operand.vmem [shape: bf16[256,8], index: 3, kind: output, shape index: {}]  }
   0x1 LB: > { %s549_s13 = sadd.s32 4294967295, %s634_s12   ;;  %p553_p0 = scmp.ge.s32.totalorder %s634_s12, 1  ;;  %s634_s12 = sphi %s657_s12, %s13_s12  }
   0x2   : > { %p149_p1 = scmp.lt.s32.totalorder %s634_s12, 3 }
   0x4   : > { %p150_p2 = pnand %p553_p0, %p149_p1 }
   0x5   : > { %s554_s16 = sshll.u32 (!%p150_p2), %s549_s13, 4 }
   0x6   : > { %153 = sbr.rel (%p150_p2) target bundleno = 181 (0xb5), region = 32  ;;  %p179_p3 = scmp.lt.s32.totalorder (!%p150_p2), %s554_s16, 31 }
   0xb   : > { %v213_v0 = vld [vmem:[%s752_s1 + $0x8] sm:$0xff]  ;;  %v636_v1 = vmov 0   ;;  %v212_v2 = vld [vmem:[%s752_s1] sm:$0xff]  ;;  %s756_s16 = smov (!%p179_p3, %s554_s16), 31  ;;  %vm254_vm0 = vcmask 130048   ;;  %vm464_vm1 = vcmask 60416  }
   0xc   : > { %626 = vset.pattern.permute.xlu1 %v636_v1  ;;  %625 = vset.pattern.permute.xlu0 %v636_v1  ;;  %s557_s19 = sshll.u32 %s756_s16, 3  ;;  %s555_s20 = sshll.u32 %s756_s16, 2 }
   0xd   : > { %293 = vmatpush.msra.mxu0 %v213_v0  ;;  %610 = vmatpush.msra.mxu1 %v213_v0  ;;  %s678_s23 = scalar_lea.vmem %s753_s2, %s557_s19  ;;  %s182_s26 = scalar_lea.vmem %s751_s0, %s555_s20 }
   0xe   : > { %611 = vmatpush.msra.mxu2 %v213_v0  ;;  %612 = vmatpush.msra.mxu3 %v213_v0  ;;  %v338_v3 = vld [vmem:[%s678_s23 + $0x10] sm:$0xff]  ;;  %v336_v4 = vld [vmem:[%s678_s23] sm:$0xff]  ;;  %v339_v10 = vld [vmem:[%s678_s23 + $0x18] sm:$0xff]  ;;  %s714_s29 = scalar_lea.vmem %s754_s3, %s555_s20 }
   0xf   : > { %294 = vmatpush.msra.mxu0 %v212_v2  ;;  %613 = vmatpush.msra.mxu1 %v212_v2  ;;  %v602_v5 = vld [vmem:[%s182_s26] sm:$0xff]  ;;  %v604_v6 = vld [vmem:[%s182_s26 + $0x10] sm:$0xff]  ;;  %v337_v11 = vld [vmem:[%s678_s23 + $0x8] sm:$0xff] }
  0x10   : > { %614 = vmatpush.msra.mxu2 %v212_v2  ;;  %615 = vmatpush.msra.mxu3 %v212_v2  ;;  %v606_v7 = vld [vmem:[%s182_s26 + $0x20] sm:$0xff]  ;;  %v608_v8 = vld [vmem:[%s182_s26 + $0x30] sm:$0xff]  ;;  %v341_v12 = vld [vmem:[%s678_s23 + $0x28] sm:$0xff] }
  0x11   : > { %627 = vset.pattern.permute.xlu2 %v636_v1  ;;  %364 = vperm.xlu1 %626, %v338_v3   ;;  %v340_v9 = vld [vmem:[%s678_s23 + $0x20] sm:$0xff]  ;;  %v343_v13 = vld [vmem:[%s678_s23 + $0x38] sm:$0xff]  ;;  %v342_v14 = vld [vmem:[%s678_s23 + $0x30] sm:$0xff] }
  0x12   : > { %354 = vperm.xlu0 %625, %v336_v4   ;;  %592 = vmatmul.msk.bf16.vlgmr.msra.gmra.mxu0 %vm254_vm0, %v602_v5  ;;  %v603_v15 = vld [vmem:[%s182_s26 + $0x8] sm:$0xff]  ;;  %v605_v16 = vld [vmem:[%s182_s26 + $0x18] sm:$0xff]  ;;  %v344_v19 = vld [vmem:[%s678_s23 + $0x40] sm:$0xff] }
  0x13   : > { %594 = vmatmul.msk.bf16.vlgmr.msra.gmra.mxu1 %vm254_vm0, %v604_v6  ;;  %596 = vmatmul.msk.bf16.vlgmr.msra.gmra.mxu2 %vm254_vm0, %v606_v7  ;;  %v607_v17 = vld [vmem:[%s182_s26 + $0x28] sm:$0xff]  ;;  %v609_v18 = vld [vmem:[%s182_s26 + $0x38] sm:$0xff]  ;;  %v346_v20 = vld [vmem:[%s678_s23 + $0x50] sm:$0xff] }
  0x14   : > { %598 = vmatmul.msk.bf16.vlgmr.msra.gmra.mxu3 %vm254_vm0, %v608_v8  ;;  %374 = vperm.xlu2 %627, %v340_v9   ;;  %v345_v21 = vld [vmem:[%s678_s23 + $0x48] sm:$0xff]  ;;  %v347_v22 = vld [vmem:[%s678_s23 + $0x58] sm:$0xff]  ;;  %v348_v24 = vld [vmem:[%s678_s23 + $0x60] sm:$0xff] }
  0x15   : > { %v349_v23 = vld [vmem:[%s678_s23 + $0x68] sm:$0xff]  ;;  %v350_v25 = vld [vmem:[%s678_s23 + $0x70] sm:$0xff]  ;;  %v351_v26 = vld [vmem:[%s678_s23 + $0x78] sm:$0xff] }
  0x19   : > { %369 = vperm.xlu1 %626, %v339_v10  }
  0x1a   : > { %359 = vperm.xlu0 %625, %v337_v11  }
  0x1c   : > { %379 = vperm.xlu2 %627, %v341_v12  }
  0x21   : > { %389 = vperm.xlu1 %626, %v343_v13  }
  0x22   : > { %384 = vperm.xlu0 %625, %v342_v14   ;;  %593 = vmatmul.msk.bf16.gmra.mxu0 %vm254_vm0, %v603_v15 }
  0x23   : > { %595 = vmatmul.msk.bf16.gmra.mxu1 %vm254_vm0, %v605_v16  ;;  %597 = vmatmul.msk.bf16.gmra.mxu2 %vm254_vm0, %v607_v17 }
  0x24   : > { %599 = vmatmul.msk.bf16.gmra.mxu3 %vm254_vm0, %v609_v18  ;;  %394 = vperm.xlu2 %627, %v344_v19  }
  0x29   : > { %404 = vperm.xlu1 %626, %v346_v20  }
  0x2a   : > { %399 = vperm.xlu0 %625, %v345_v21  }
  0x2c   : > { %409 = vperm.xlu2 %627, %v347_v22  }
  0x31   : > { %419 = vperm.xlu1 %626, %v349_v23  }
  0x32   : > { %414 = vperm.xlu0 %625, %v348_v24  }
  0x34   : > { %424 = vperm.xlu2 %627, %v350_v25  }
  0x3a   : > { %429 = vperm.xlu0 %625, %v351_v26  }
  0x6e   : > { %v375_v27 = vpop.permute.xlu2 %374 }
  0x76   : > { %v380_v30 = vpop.permute.xlu2 %379 }
  0x7e   : > { %v395_v37 = vpop.permute.xlu2 %394 }
  0x83   : > { %v365_v28 = vpop.permute.xlu1 %364 }
  0x84   : > { %v355_v29 = vpop.permute.xlu0 %354 }
  0x86   : > { %v410_v54 = vpop.permute.xlu2 %409 }
  0x8b   : > { %v370_v31 = vpop.permute.xlu1 %369 }
  0x8c   : > { %v360_v32 = vpop.permute.xlu0 %359 }
  0x8e   : > { %v425_v5 = vpop.permute.xlu2 %424 }
  0x8f   : > { %v296_v33 = vpop.f32.mrf.mxu0 }
  0x90   : > { %v432_v34 = vmul.f32 %v355_v29, %v296_v33  ;;  %v306_v35 = vpop.f32.mrf.mxu1 }
  0x91   : > { %v436_v36 = vmul.f32 %v375_v27, %v306_v35 }
  0x92   : > { %v448_v38 = vpack.c.bf16 %v432_v34, %v432_v34 }
  0x93   : > { %v452_v39 = vpack.c.bf16 %v436_v36, %v436_v36  ;;  %v390_v40 = vpop.permute.xlu1 %389 }
  0x94   : > { %v385_v41 = vpop.permute.xlu0 %384  ;;  %465 = vst.msk [vmem:[%s714_s29] sm:$0xf] %vm464_vm1, %v448_v38 }
  0x95   : > { %469 = vst.msk [vmem:[%s714_s29 + $0x10] sm:$0xf] %vm464_vm1, %v452_v39 }
  0x96   : > { %v316_v42 = vpop.f32.mrf.mxu2 }
  0x97   : > { %v440_v43 = vmul.f32 %v395_v37, %v316_v42  ;;  %v326_v44 = vpop.f32.mrf.mxu3  ;;  %v298_v45 = vpop.f32.mrf.mxu0 }
  0x98   : > { %v433_v46 = vmul.f32 %v360_v32, %v298_v45  ;;  %v308_v47 = vpop.f32.mrf.mxu1 }
  0x99   : > { %v456_v48 = vpack.c.bf16 %v440_v43, %v440_v43  ;;  %v437_v49 = vmul.f32 %v380_v30, %v308_v47 }
  0x9a   : > { %v449_v50 = vpack.c.bf16 %v433_v46, %v433_v46 }
  0x9b   : > { %473 = vst.msk [vmem:[%s714_s29 + $0x20] sm:$0xf] %vm464_vm1, %v456_v48  ;;  %v453_v51 = vpack.c.bf16 %v437_v49, %v437_v49  ;;  %v405_v52 = vpop.permute.xlu1 %404 }
  0x9c   : > { %v400_v53 = vpop.permute.xlu0 %399  ;;  %466 = vst.msk [vmem:[%s714_s29 + $0x4] sm:$0xf] %vm464_vm1, %v449_v50 }
  0x9d   : > { %470 = vst.msk [vmem:[%s714_s29 + $0x14] sm:$0xf] %vm464_vm1, %v453_v51 }
  0x9e   : > { %v318_v55 = vpop.f32.mrf.mxu2 }
  0x9f   : > { %v441_v56 = vmul.f32 %v400_v53, %v318_v55  ;;  %v328_v57 = vpop.f32.mrf.mxu3  ;;  %v301_v58 = vpop.f32.mrf.mxu0 }
  0xa0   : > { %v434_v59 = vmul.f32 %v365_v28, %v301_v58  ;;  %v311_v60 = vpop.f32.mrf.mxu1 }
  0xa1   : > { %v457_v61 = vpack.c.bf16 %v441_v56, %v441_v56  ;;  %v438_v62 = vmul.f32 %v385_v41, %v311_v60 }
  0xa2   : > { %v450_v63 = vpack.c.bf16 %v434_v59, %v434_v59 }
  0xa3   : > { %474 = vst.msk [vmem:[%s714_s29 + $0x24] sm:$0xf] %vm464_vm1, %v457_v61  ;;  %v454_v0 = vpack.c.bf16 %v438_v62, %v438_v62  ;;  %v420_v1 = vpop.permute.xlu1 %419 }
  0xa4   : > { %v415_v2 = vpop.permute.xlu0 %414  ;;  %467 = vst.msk [vmem:[%s714_s29 + $0x8] sm:$0xf] %vm464_vm1, %v450_v63  ;;  %v445_v3 = vmul.f32 %v420_v1, %v328_v57 }
  0xa5   : > { %v444_v4 = vmul.f32 %v415_v2, %v326_v44  ;;  %471 = vst.msk [vmem:[%s714_s29 + $0x18] sm:$0xf] %vm464_vm1, %v454_v0 }
  0xa6   : > { %v461_v6 = vpack.c.bf16 %v445_v3, %v445_v3  ;;  %v321_v8 = vpop.f32.mrf.mxu2 }
  0xa7   : > { %v460_v7 = vpack.c.bf16 %v444_v4, %v444_v4  ;;  %v442_v9 = vmul.f32 %v405_v52, %v321_v8  ;;  %v331_v10 = vpop.f32.mrf.mxu3  ;;  %v303_v11 = vpop.f32.mrf.mxu0 }
  0xa8   : > { %478 = vst.msk [vmem:[%s714_s29 + $0x34] sm:$0xf] %vm464_vm1, %v461_v6  ;;  %v446_v12 = vmul.f32 %v425_v5, %v331_v10  ;;  %v435_v13 = vmul.f32 %v370_v31, %v303_v11  ;;  %v313_v14 = vpop.f32.mrf.mxu1 }
  0xa9   : > { %477 = vst.msk [vmem:[%s714_s29 + $0x30] sm:$0xf] %vm464_vm1, %v460_v7  ;;  %v458_v15 = vpack.c.bf16 %v442_v9, %v442_v9  ;;  %v439_v16 = vmul.f32 %v390_v40, %v313_v14 }
  0xaa   : > { %v462_v17 = vpack.c.bf16 %v446_v12, %v446_v12  ;;  %v451_v18 = vpack.c.bf16 %v435_v13, %v435_v13 }
  0xab   : > { %475 = vst.msk [vmem:[%s714_s29 + $0x28] sm:$0xf] %vm464_vm1, %v458_v15  ;;  %v455_v19 = vpack.c.bf16 %v439_v16, %v439_v16 }
  0xac   : > { %479 = vst.msk [vmem:[%s714_s29 + $0x38] sm:$0xf] %vm464_vm1, %v462_v17  ;;  %v430_v21 = vpop.permute.xlu0 %429 }
  0xad   : > { %468 = vst.msk [vmem:[%s714_s29 + $0xc] sm:$0xf] %vm464_vm1, %v451_v18 }
  0xae   : > { %472 = vst.msk [vmem:[%s714_s29 + $0x1c] sm:$0xf] %vm464_vm1, %v455_v19  ;;  %v323_v20 = vpop.f32.mrf.mxu2 }
  0xaf   : > { %v443_v22 = vmul.f32 %v410_v54, %v323_v20  ;;  %v333_v23 = vpop.f32.mrf.mxu3 }
  0xb0   : > { %v447_v24 = vmul.f32 %v430_v21, %v333_v23 }
  0xb1   : > { %v459_v25 = vpack.c.bf16 %v443_v22, %v443_v22 }
  0xb2   : > { %v463_v26 = vpack.c.bf16 %v447_v24, %v447_v24 }
  0xb3   : > { %476 = vst.msk [vmem:[%s714_s29 + $0x2c] sm:$0xf] %vm464_vm1, %v459_v25 }
  0xb4   : > { %480 = vst.msk [vmem:[%s714_s29 + $0x3c] sm:$0xf] %vm464_vm1, %v463_v26 }
  0xb5 PF: > { %s13_s12 = sadd.s32 1, %s634_s12  }
  0xb6   : > { %p10_p4 = scmp.ge.s32.totalorder %s13_s12, 4  }
  0xb8   :  { %12 = sbr.rel (!%p10_p4) target bundleno = 1 (0x1), region = 65 }

// kernel: seal_forward.13
= control target key start
LH: loop header
LB: loop body
LE: loop exit
PB: predicated region body
PF: predicated region fallthrough
CT: control target
= control target key end

     0   :  { %s653_s12 = smov 0   ;;  %s744_s0 = inlined_call_operand.vmem [shape: bf16[256,8], index: 0, kind: input, shape index: {}]   ;;  %s745_s1 = inlined_call_operand.vmem [shape: f32[8,8], index: 1, kind: input, shape index: {}]   ;;  %s746_s2 = inlined_call_operand.vmem [shape: f32[256,1], index: 2, kind: input, shape index: {}]   ;;  %s747_s3 = inlined_call_operand.vmem [shape: bf16[256,8], index: 3, kind: output, shape index: {}]  }
   0x1 LB: > { %s548_s13 = sadd.s32 4294967295, %s630_s12   ;;  %p552_p0 = scmp.ge.s32.totalorder %s630_s12, 1  ;;  %s630_s12 = sphi %s653_s12, %s13_s12  }
   0x2   : > { %p149_p1 = scmp.lt.s32.totalorder %s630_s12, 3 }
   0x4   : > { %p150_p2 = pnand %p552_p0, %p149_p1 }
   0x5   : > { %s553_s14 = sshll.u32 (!%p150_p2), %s548_s13, 4 }
   0x6   : > { %153 = sbr.rel (%p150_p2) target bundleno = 179 (0xb3), region = 32  ;;  %p179_p3 = scmp.lt.s32.totalorder (!%p150_p2), %s553_s14, 31 }
   0xb   : > { %v212_v0 = vld [vmem:[%s745_s1] sm:$0xff]  ;;  %v632_v1 = vmov 0   ;;  %s749_s14 = smov (!%p179_p3, %s553_s14), 31  ;;  %vm253_vm0 = vcmask 64512   ;;  %vm463_vm1 = vcmask 60416  }
   0xc   : > { %622 = vset.pattern.permute.xlu1 %v632_v1  ;;  %621 = vset.pattern.permute.xlu0 %v632_v1  ;;  %s556_s17 = sshll.u32 %s749_s14, 3  ;;  %s554_s18 = sshll.u32 %s749_s14, 2 }
   0xd   : > { %293 = vmatpush.msra.mxu0 %v212_v0  ;;  %609 = vmatpush.msra.mxu1 %v212_v0  ;;  %s671_s21 = scalar_lea.vmem %s746_s2, %s556_s17  ;;  %s182_s24 = scalar_lea.vmem %s744_s0, %s554_s18 }
   0xe   : > { %610 = vmatpush.msra.mxu2 %v212_v0  ;;  %611 = vmatpush.msra.mxu3 %v212_v0  ;;  %v337_v2 = vld [vmem:[%s671_s21 + $0x10] sm:$0xff]  ;;  %v335_v3 = vld [vmem:[%s671_s21] sm:$0xff]  ;;  %v338_v9 = vld [vmem:[%s671_s21 + $0x18] sm:$0xff]  ;;  %s707_s27 = scalar_lea.vmem %s747_s3, %s554_s18 }
   0xf   : > { %623 = vset.pattern.permute.xlu2 %v632_v1  ;;  %v601_v4 = vld [vmem:[%s182_s24] sm:$0xff]  ;;  %363 = vperm.xlu1 %622, %v337_v2   ;;  %v603_v5 = vld [vmem:[%s182_s24 + $0x10] sm:$0xff]  ;;  %v336_v10 = vld [vmem:[%s671_s21 + $0x8] sm:$0xff] }
  0x10   : > { %353 = vperm.xlu0 %621, %v335_v3   ;;  %v605_v6 = vld [vmem:[%s182_s24 + $0x20] sm:$0xff]  ;;  %v607_v7 = vld [vmem:[%s182_s24 + $0x30] sm:$0xff]  ;;  %591 = vmatmul.msk.bf16.vlgmr.msra.gmra.mxu0 %vm253_vm0, %v601_v4  ;;  %v340_v11 = vld [vmem:[%s671_s21 + $0x28] sm:$0xff] }
  0x11   : > { %v339_v8 = vld [vmem:[%s671_s21 + $0x20] sm:$0xff]  ;;  %593 = vmatmul.msk.bf16.vlgmr.msra.gmra.mxu1 %vm253_vm0, %v603_v5  ;;  %595 = vmatmul.msk.bf16.vlgmr.msra.gmra.mxu2 %vm253_vm0, %v605_v6  ;;  %v342_v12 = vld [vmem:[%s671_s21 + $0x38] sm:$0xff]  ;;  %v341_v13 = vld [vmem:[%s671_s21 + $0x30] sm:$0xff] }
  0x12   : > { %597 = vmatmul.msk.bf16.vlgmr.msra.gmra.mxu3 %vm253_vm0, %v607_v7  ;;  %373 = vperm.xlu2 %623, %v339_v8   ;;  %v602_v14 = vld [vmem:[%s182_s24 + $0x8] sm:$0xff]  ;;  %v604_v15 = vld [vmem:[%s182_s24 + $0x18] sm:$0xff]  ;;  %v343_v18 = vld [vmem:[%s671_s21 + $0x40] sm:$0xff] }
  0x13   : > { %v606_v16 = vld [vmem:[%s182_s24 + $0x28] sm:$0xff]  ;;  %v608_v17 = vld [vmem:[%s182_s24 + $0x38] sm:$0xff]  ;;  %v345_v19 = vld [vmem:[%s671_s21 + $0x50] sm:$0xff] }
  0x14   : > { %v344_v20 = vld [vmem:[%s671_s21 + $0x48] sm:$0xff]  ;;  %v346_v21 = vld [vmem:[%s671_s21 + $0x58] sm:$0xff]  ;;  %v347_v23 = vld [vmem:[%s671_s21 + $0x60] sm:$0xff] }
  0x15   : > { %v348_v22 = vld [vmem:[%s671_s21 + $0x68] sm:$0xff]  ;;  %v349_v24 = vld [vmem:[%s671_s21 + $0x70] sm:$0xff]  ;;  %v350_v25 = vld [vmem:[%s671_s21 + $0x78] sm:$0xff] }
  0x17   : > { %368 = vperm.xlu1 %622, %v338_v9  }
  0x18   : > { %358 = vperm.xlu0 %621, %v336_v10  }
  0x1a   : > { %378 = vperm.xlu2 %623, %v340_v11  }
  0x1f   : > { %388 = vperm.xlu1 %622, %v342_v12  }
  0x20   : > { %383 = vperm.xlu0 %621, %v341_v13   ;;  %592 = vmatmul.msk.bf16.gmra.mxu0 %vm253_vm0, %v602_v14 }
  0x21   : > { %594 = vmatmul.msk.bf16.gmra.mxu1 %vm253_vm0, %v604_v15  ;;  %596 = vmatmul.msk.bf16.gmra.mxu2 %vm253_vm0, %v606_v16 }
  0x22   : > { %598 = vmatmul.msk.bf16.gmra.mxu3 %vm253_vm0, %v608_v17  ;;  %393 = vperm.xlu2 %623, %v343_v18  }
  0x27   : > { %403 = vperm.xlu1 %622, %v345_v19  }
  0x28   : > { %398 = vperm.xlu0 %621, %v344_v20  }
  0x2a   : > { %408 = vperm.xlu2 %623, %v346_v21  }
  0x2f   : > { %418 = vperm.xlu1 %622, %v348_v22  }
  0x30   : > { %413 = vperm.xlu0 %621, %v347_v23  }
  0x32   : > { %423 = vperm.xlu2 %623, %v349_v24  }
  0x38   : > { %428 = vperm.xlu0 %621, %v350_v25  }
  0x6c   : > { %v374_v26 = vpop.permute.xlu2 %373 }
  0x74   : > { %v379_v29 = vpop.permute.xlu2 %378 }
  0x7c   : > { %v394_v36 = vpop.permute.xlu2 %393 }
  0x81   : > { %v364_v27 = vpop.permute.xlu1 %363 }
  0x82   : > { %v354_v28 = vpop.permute.xlu0 %353 }
  0x84   : > { %v409_v53 = vpop.permute.xlu2 %408 }
  0x89   : > { %v369_v30 = vpop.permute.xlu1 %368 }
  0x8a   : > { %v359_v31 = vpop.permute.xlu0 %358 }
  0x8c   : > { %v424_v4 = vpop.permute.xlu2 %423 }
  0x8d   : > { %v295_v32 = vpop.f32.mrf.mxu0 }
  0x8e   : > { %v431_v33 = vmul.f32 %v354_v28, %v295_v32  ;;  %v305_v34 = vpop.f32.mrf.mxu1 }
  0x8f   : > { %v435_v35 = vmul.f32 %v374_v26, %v305_v34 }
  0x90   : > { %v447_v37 = vpack.c.bf16 %v431_v33, %v431_v33 }
  0x91   : > { %v451_v38 = vpack.c.bf16 %v435_v35, %v435_v35  ;;  %v389_v39 = vpop.permute.xlu1 %388 }
  0x92   : > { %v384_v40 = vpop.permute.xlu0 %383  ;;  %464 = vst.msk [vmem:[%s707_s27] sm:$0xf] %vm463_vm1, %v447_v37 }
  0x93   : > { %468 = vst.msk [vmem:[%s707_s27 + $0x10] sm:$0xf] %vm463_vm1, %v451_v38 }
  0x94   : > { %v315_v41 = vpop.f32.mrf.mxu2 }
  0x95   : > { %v439_v42 = vmul.f32 %v394_v36, %v315_v41  ;;  %v325_v43 = vpop.f32.mrf.mxu3  ;;  %v297_v44 = vpop.f32.mrf.mxu0 }
  0x96   : > { %v432_v45 = vmul.f32 %v359_v31, %v297_v44  ;;  %v307_v46 = vpop.f32.mrf.mxu1 }
  0x97   : > { %v455_v47 = vpack.c.bf16 %v439_v42, %v439_v42  ;;  %v436_v48 = vmul.f32 %v379_v29, %v307_v46 }
  0x98   : > { %v448_v49 = vpack.c.bf16 %v432_v45, %v432_v45 }
  0x99   : > { %472 = vst.msk [vmem:[%s707_s27 + $0x20] sm:$0xf] %vm463_vm1, %v455_v47  ;;  %v452_v50 = vpack.c.bf16 %v436_v48, %v436_v48  ;;  %v404_v51 = vpop.permute.xlu1 %403 }
  0x9a   : > { %v399_v52 = vpop.permute.xlu0 %398  ;;  %465 = vst.msk [vmem:[%s707_s27 + $0x4] sm:$0xf] %vm463_vm1, %v448_v49 }
  0x9b   : > { %469 = vst.msk [vmem:[%s707_s27 + $0x14] sm:$0xf] %vm463_vm1, %v452_v50 }
  0x9c   : > { %v317_v54 = vpop.f32.mrf.mxu2 }
  0x9d   : > { %v440_v55 = vmul.f32 %v399_v52, %v317_v54  ;;  %v327_v56 = vpop.f32.mrf.mxu3  ;;  %v300_v57 = vpop.f32.mrf.mxu0 }
  0x9e   : > { %v433_v58 = vmul.f32 %v364_v27, %v300_v57  ;;  %v310_v59 = vpop.f32.mrf.mxu1 }
  0x9f   : > { %v456_v60 = vpack.c.bf16 %v440_v55, %v440_v55  ;;  %v437_v61 = vmul.f32 %v384_v40, %v310_v59 }
  0xa0   : > { %v449_v62 = vpack.c.bf16 %v433_v58, %v433_v58 }
  0xa1   : > { %473 = vst.msk [vmem:[%s707_s27 + $0x24] sm:$0xf] %vm463_vm1, %v456_v60  ;;  %v453_v63 = vpack.c.bf16 %v437_v61, %v437_v61  ;;  %v419_v0 = vpop.permute.xlu1 %418 }
  0xa2   : > { %v414_v1 = vpop.permute.xlu0 %413  ;;  %466 = vst.msk [vmem:[%s707_s27 + $0x8] sm:$0xf] %vm463_vm1, %v449_v62  ;;  %v444_v2 = vmul.f32 %v419_v0, %v327_v56 }
  0xa3   : > { %v443_v3 = vmul.f32 %v414_v1, %v325_v43  ;;  %470 = vst.msk [vmem:[%s707_s27 + $0x18] sm:$0xf] %vm463_vm1, %v453_v63 }
  0xa4   : > { %v460_v5 = vpack.c.bf16 %v444_v2, %v444_v2  ;;  %v320_v7 = vpop.f32.mrf.mxu2 }
  0xa5   : > { %v459_v6 = vpack.c.bf16 %v443_v3, %v443_v3  ;;  %v441_v8 = vmul.f32 %v404_v51, %v320_v7  ;;  %v330_v9 = vpop.f32.mrf.mxu3  ;;  %v302_v10 = vpop.f32.mrf.mxu0 }
  0xa6   : > { %477 = vst.msk [vmem:[%s707_s27 + $0x34] sm:$0xf] %vm463_vm1, %v460_v5  ;;  %v445_v11 = vmul.f32 %v424_v4, %v330_v9  ;;  %v434_v12 = vmul.f32 %v369_v30, %v302_v10  ;;  %v312_v13 = vpop.f32.mrf.mxu1 }
  0xa7   : > { %476 = vst.msk [vmem:[%s707_s27 + $0x30] sm:$0xf] %vm463_vm1, %v459_v6  ;;  %v457_v14 = vpack.c.bf16 %v441_v8, %v441_v8  ;;  %v438_v15 = vmul.f32 %v389_v39, %v312_v13 }
  0xa8   : > { %v461_v16 = vpack.c.bf16 %v445_v11, %v445_v11  ;;  %v450_v17 = vpack.c.bf16 %v434_v12, %v434_v12 }
  0xa9   : > { %474 = vst.msk [vmem:[%s707_s27 + $0x28] sm:$0xf] %vm463_vm1, %v457_v14  ;;  %v454_v18 = vpack.c.bf16 %v438_v15, %v438_v15 }
  0xaa   : > { %478 = vst.msk [vmem:[%s707_s27 + $0x38] sm:$0xf] %vm463_vm1, %v461_v16  ;;  %v429_v20 = vpop.permute.xlu0 %428 }
  0xab   : > { %467 = vst.msk [vmem:[%s707_s27 + $0xc] sm:$0xf] %vm463_vm1, %v450_v17 }
  0xac   : > { %471 = vst.msk [vmem:[%s707_s27 + $0x1c] sm:$0xf] %vm463_vm1, %v454_v18  ;;  %v322_v19 = vpop.f32.mrf.mxu2 }
  0xad   : > { %v442_v21 = vmul.f32 %v409_v53, %v322_v19  ;;  %v332_v22 = vpop.f32.mrf.mxu3 }
  0xae   : > { %v446_v23 = vmul.f32 %v429_v20, %v332_v22 }
  0xaf   : > { %v458_v24 = vpack.c.bf16 %v442_v21, %v442_v21 }
  0xb0   : > { %v462_v25 = vpack.c.bf16 %v446_v23, %v446_v23 }
  0xb1   : > { %475 = vst.msk [vmem:[%s707_s27 + $0x2c] sm:$0xf] %vm463_vm1, %v458_v24 }
  0xb2   : > { %479 = vst.msk [vmem:[%s707_s27 + $0x3c] sm:$0xf] %vm463_vm1, %v462_v25 }
  0xb3 PF: > { %s13_s12 = sadd.s32 1, %s630_s12  }
  0xb4   : > { %p10_p4 = scmp.ge.s32.totalorder %s13_s12, 4  }
  0xb6   :  { %12 = sbr.rel (!%p10_p4) target bundleno = 1 (0x1), region = 65 }

// kernel: seal_forward.10
= control target key start
LH: loop header
LB: loop body
LE: loop exit
PB: predicated region body
PF: predicated region fallthrough
CT: control target
= control target key end

     0   :  { %s1981_s17 = smov 0   ;;  %s1983_s18 = smov 0   ;;  %s2483_s0 = inlined_call_operand.vmem [shape: bf16[256,256], index: 0, kind: input, shape index: {}]   ;;  %s2484_s1 = inlined_call_operand.vmem [shape: bf16[256,16], index: 1, kind: input, shape index: {}]   ;;  %s2485_s2 = inlined_call_operand.vmem [shape: f32[256,1], index: 2, kind: input, shape index: {}]   ;;  %s2486_s3 = inlined_call_operand.vmem [shape: bf16[256,32], index: 3, kind: input, shape index: {}]   ;;  %s2487_s4 = inlined_call_operand.vmem [shape: f32[32,16], index: 4, kind: input, shape index: {}]   ;;  %s2488_s5 = inlined_call_operand.vmem [shape: f32[1,16], index: 5, kind: input, shape index: {}]   ;;  %s2489_s6 = inlined_call_operand.vmem [shape: f32[1,16], index: 6, kind: input, shape index: {}]   ;;  %s2490_s7 = inlined_call_operand.vmem [shape: f32[1,16], index: 7, kind: input, shape index: {}]   ;;  %s2491_s8 = inlined_call_operand.vmem [shape: f32[1,16], index: 8, kind: input, shape index: {}]   ;;  %s2492_s9 = inlined_call_operand.vmem [shape: f32[1,16], index: 9, kind: input, shape index: {}]   ;;  %s2493_s10 = inlined_call_operand.vmem [shape: f32[256,1], index: 10, kind: input, shape index: {}]   ;;  %s2494_s11 = inlined_call_operand.vmem [shape: bf16[256,16], index: 11, kind: output, shape index: {}]  }
   0x1   :  { %s1985_s19 = smov 0  }
   0x2 LB: > { %s33_s20 = sadd.s32 1, %s1913_s18  ;;  %p1621_p0 = scmp.ge.s32.totalorder %s1917_s19, 1  ;;  %s1917_s19 = sphi %s1985_s19, %s21_s19   ;;  %s1913_s18 = sphi %s1983_s18, %s2496_s18   ;;  %s1909_s17 = sphi %s1981_s17, %s2495_s17  }
   0x3   : > { %p35_p1 = scmp.ge.s32.totalorder %s33_s20, 2  ;;  %p402_p2 = scmp.lt.s32.totalorder %s1917_s19, 3 }
   0x5   : > { %s2498_s20 = smov (%p35_p1, %s33_s20), 0  ;;  %p403_p3 = pnand %p1621_p0, %p402_p2 }
   0x6   : > { %s1622_s27 = sshll.u32 (!%p403_p3), %s1909_s17, 4 }
   0x7   : > { %406 = sbr.rel (%p403_p3) target bundleno = 295 (0x127), region = 64  ;;  %p469_p4 = scmp.lt.s32.totalorder (!%p403_p3), %s1622_s27, 31 }
   0xc   : > { %v1827_v0 = vld [vmem:[%s2484_s1 + $0x38] sm:$0xff]  ;;  %v1070_v3 = vld [vmem:[%s2487_s4 + $0x10] sm:$0xff]  ;;  %v1919_v4 = vmov 0   ;;  %v1069_v5 = vld [vmem:[%s2487_s4 + $0x8] sm:$0xff]  ;;  %s2500_s27 = smov (!%p469_p4, %s1622_s27), 31  ;;  %vm1112_vm0 = vcmask 261120  }
   0xd   : > { %v2005_v1 = vld [vmem:[%s2484_s1 + $0x78] sm:$0xff]  ;;  %1887 = vset.pattern.permute.xlu1 %v1919_v4  ;;  %770 = vmatpush.bf16.msra.mxu0 %v1827_v0  ;;  %v1826_v6 = vld [vmem:[%s2484_s1 + $0x30] sm:$0xff]  ;;  %v1068_v8 = vld [vmem:[%s2487_s4] sm:$0xff]  ;;  %s2031_s22 = sshll.u32 %s2500_s27, 3  ;;  %s1628_s23 = sshll.u32 %s2500_s27, 2  ;;  %vm513_vm1 = vcmask 130048  }
   0xe   : > { %v1071_v2 = vld [vmem:[%s2487_s4 + $0x18] sm:$0xff]  ;;  %1844 = vmatpush.bf16.msra.mxu3 %v1827_v0  ;;  %819 = vmatpush.bf16.msra.mxu1 %v2005_v1  ;;  %v2023_v7 = vld [vmem:[%s2484_s1 + $0x70] sm:$0xff]  ;;  %s2038_s26 = scalar_lea.vmem %s2485_s2, %s2031_s22  ;;  %v1825_v9 = vld [vmem:[%s2484_s1 + $0x28] sm:$0xff]  ;;  %s2051_s13 = scalar_lea.vmem %s2486_s3, %s1628_s23  ;;  %vm1477_vm6 = vcmask 125952  }
   0xf   : > { %1149 = vmatpush.msra.mxu2 %v1071_v2  ;;  %1886 = vset.pattern.permute.xlu0 %v1919_v4  ;;  %v922_v10 = vld [vmem:[%s2038_s26 + $0x10] sm:$0xff]  ;;  %v920_v11 = vld [vmem:[%s2038_s26] sm:$0xff]  ;;  %v2056_v12 = vld [vmem:[%s2484_s1 + $0x68] sm:$0xff]  ;;  %s2097_s24 = scalar_lea.vmem %s2483_s0, %s2031_s22  ;;  %s2142_s25 = scalar_lea.vmem %s2493_s10, %s2031_s22 }
  0x10   : > { %1888 = vset.pattern.permute.xlu2 %v1919_v4  ;;  %948 = vperm.xlu1 %1887, %v922_v10   ;;  %v1836_v13 = vld [vmem:[%s2051_s13] sm:$0xff]  ;;  %v1823_v16 = vld [vmem:[%s2484_s1 + $0x18] sm:$0xff]  ;;  %v921_v18 = vld [vmem:[%s2038_s26 + $0x8] sm:$0xff]  ;;  %s2308_s21 = scalar_lea.vmem %s2494_s11, %s1628_s23 }
  0x11   : > { %1150 = vmatpush.msra.mxu2 %v1070_v3  ;;  %771 = vmatpush.bf16.msra.mxu0 %v1826_v6  ;;  %v1824_v14 = vld [vmem:[%s2484_s1 + $0x20] sm:$0xff]  ;;  %v923_v17 = vld [vmem:[%s2038_s26 + $0x18] sm:$0xff]  ;;  %v1822_v21 = vld [vmem:[%s2484_s1 + $0x10] sm:$0xff] }
  0x12   : > { %1845 = vmatpush.bf16.msra.mxu3 %v1826_v6  ;;  %820 = vmatpush.bf16.msra.mxu1 %v2023_v7  ;;  %v2067_v15 = vld [vmem:[%s2484_s1 + $0x60] sm:$0xff]  ;;  %v2079_v20 = vld [vmem:[%s2484_s1 + $0x58] sm:$0xff]  ;;  %v2088_v22 = vld [vmem:[%s2484_s1 + $0x50] sm:$0xff] }
  0x13   : > { %1151 = vmatpush.msra.mxu2 %v1069_v5  ;;  %938 = vperm.xlu0 %1886, %v920_v11   ;;  %v924_v19 = vld [vmem:[%s2038_s26 + $0x20] sm:$0xff]  ;;  %v925_v23 = vld [vmem:[%s2038_s26 + $0x28] sm:$0xff]  ;;  %v927_v24 = vld [vmem:[%s2038_s26 + $0x38] sm:$0xff] }
  0x14   : > { %958 = vperm.xlu2 %1888, %v924_v19   ;;  %v926_v25 = vld [vmem:[%s2038_s26 + $0x30] sm:$0xff]  ;;  %v1837_v26 = vld [vmem:[%s2051_s13 + $0x8] sm:$0xff]  ;;  %v1820_v29 = vld [vmem:[%s2484_s1] sm:$0xff] }
  0x15   : > { %1152 = vmatpush.msra.mxu2 %v1068_v8  ;;  %772 = vmatpush.bf16.msra.mxu0 %v1825_v9  ;;  %v1821_v27 = vld [vmem:[%s2484_s1 + $0x8] sm:$0xff]  ;;  %v2115_v30 = vld [vmem:[%s2484_s1 + $0x40] sm:$0xff]  ;;  %v930_v38 = vld [vmem:[%s2038_s26 + $0x50] sm:$0xff] }
  0x16   : > { %1793 = vmatmul.msk.bf16.vlgmr.msra.gmra.mxu2 %vm1112_vm0, %v1836_v13  ;;  %1846 = vmatpush.bf16.msra.mxu3 %v1825_v9  ;;  %v2107_v28 = vld [vmem:[%s2484_s1 + $0x48] sm:$0xff]  ;;  %v1635_v31 = vld [vmem:[%s2097_s24] sm:$0xf]  ;;  %v1804_v35 = vld [vmem:[%s2097_s24 + $0x4] sm:$0xf] }
  0x17   : > { %821 = vmatpush.bf16.msra.mxu1 %v2056_v12  ;;  %v1805_v32 = vld [vmem:[%s2097_s24 + $0x4] sm:$0xf0]  ;;  %v1683_v33 = vld [vmem:[%s2097_s24 + $0x60] sm:$0xf]  ;;  %v1637_v36 = vld [vmem:[%s2097_s24 + $0x8] sm:$0xf0] }
  0x18   : > { %953 = vperm.xlu1 %1887, %v923_v17   ;;  %v1817_v34 = vld [vmem:[%s2097_s24 + $0x64] sm:$0xf0]  ;;  %v928_v37 = vld [vmem:[%s2038_s26 + $0x40] sm:$0xff]  ;;  %v1636_v40 = vor.u32 %v1805_v32, %v1635_v31  ;;  %v1640_v42 = vor.u32 %v1804_v35, %v1637_v36  ;;  %v931_v43 = vld [vmem:[%s2038_s26 + $0x58] sm:$0xff] }
  0x19   : > { %773 = vmatpush.bf16.msra.mxu0 %v1824_v14  ;;  %v929_v39 = vld [vmem:[%s2038_s26 + $0x48] sm:$0xff]  ;;  %v1684_v41 = vor.u32 %v1817_v34, %v1683_v33  ;;  %v932_v45 = vld [vmem:[%s2038_s26 + $0x60] sm:$0xff]  ;;  %v1838_v46 = vld [vmem:[%s2051_s13 + $0x10] sm:$0xff] }
  0x1a   : > { %1847 = vmatpush.bf16.msra.mxu3 %v1824_v14  ;;  %v933_v44 = vld [vmem:[%s2038_s26 + $0x68] sm:$0xff]  ;;  %v1643_v47 = vld [vmem:[%s2097_s24 + $0x10] sm:$0xf]  ;;  %v1807_v48 = vld [vmem:[%s2097_s24 + $0x14] sm:$0xf0] }
  0x1b   : > { %822 = vmatpush.bf16.msra.mxu1 %v2067_v15  ;;  %943 = vperm.xlu0 %1886, %v921_v18   ;;  %v1691_v49 = vld [vmem:[%s2097_s24 + $0x70] sm:$0xf]  ;;  %v1819_v50 = vld [vmem:[%s2097_s24 + $0x74] sm:$0xf0]  ;;  %v1806_v51 = vld [vmem:[%s2097_s24 + $0x14] sm:$0xf]  ;;  %v1644_v56 = vor.u32 %v1807_v48, %v1643_v47 }
  0x1c   : > { %963 = vperm.xlu2 %1888, %v925_v23   ;;  %v1645_v52 = vld [vmem:[%s2097_s24 + $0x18] sm:$0xf0]  ;;  %v934_v53 = vld [vmem:[%s2038_s26 + $0x70] sm:$0xff]  ;;  %v1349_v54 = vld [vmem:[%s2142_s25] sm:$0xff]  ;;  %v1692_v57 = vor.u32 %v1819_v50, %v1691_v49 }
  0x1d   : > { %774 = vmatpush.bf16.msra.mxu0 %v1823_v16  ;;  %v935_v55 = vld [vmem:[%s2038_s26 + $0x78] sm:$0xff]  ;;  %v1648_v58 = vor.u32 %v1806_v51, %v1645_v52  ;;  %v1350_v59 = vld [vmem:[%s2142_s25 + $0x8] sm:$0xff]  ;;  %v1351_v61 = vld [vmem:[%s2142_s25 + $0x10] sm:$0xff] }
  0x1e   : > { %1848 = vmatpush.bf16.msra.mxu3 %v1823_v16  ;;  %v1352_v60 = vld [vmem:[%s2142_s25 + $0x18] sm:$0xff]  ;;  %v1651_v63 = vld [vmem:[%s2097_s24 + $0x20] sm:$0xf]  ;;  %v1809_v0 = vld [vmem:[%s2097_s24 + $0x24] sm:$0xf0] }
  0x1f   : > { %823 = vmatpush.bf16.msra.mxu1 %v2079_v20  ;;  %v1839_v62 = vld [vmem:[%s2051_s13 + $0x18] sm:$0xff]  ;;  %v1653_v2 = vld [vmem:[%s2097_s24 + $0x28] sm:$0xf0]  ;;  %v1816_v3 = vld [vmem:[%s2097_s24 + $0x64] sm:$0xf]  ;;  %v1652_v8 = vor.u32 %v1809_v0, %v1651_v63 }
  0x20   : > { %973 = vperm.xlu1 %1887, %v927_v24   ;;  %v1685_v4 = vld [vmem:[%s2097_s24 + $0x68] sm:$0xf0]  ;;  %v1353_v5 = vld [vmem:[%s2142_s25 + $0x20] sm:$0xff]  ;;  %v1355_v6 = vld [vmem:[%s2142_s25 + $0x30] sm:$0xff] }
  0x21   : > { %775 = vmatpush.bf16.msra.mxu0 %v1822_v21  ;;  %v1688_v10 = vor.u32 %v1816_v3, %v1685_v4  ;;  %v1356_v11 = vld [vmem:[%s2142_s25 + $0x38] sm:$0xff]  ;;  %v1357_v13 = vld [vmem:[%s2142_s25 + $0x40] sm:$0xff]  ;;  %v1810_v17 = vld [vmem:[%s2097_s24 + $0x34] sm:$0xf] }
  0x22   : > { %1849 = vmatpush.bf16.msra.mxu3 %v1822_v21  ;;  %v1840_v14 = vld [vmem:[%s2051_s13 + $0x20] sm:$0xff]  ;;  %v1811_v16 = vld [vmem:[%s2097_s24 + $0x34] sm:$0xf0]  ;;  %v1661_v18 = vld [vmem:[%s2097_s24 + $0x38] sm:$0xf0] }
  0x23   : > { %824 = vmatpush.bf16.msra.mxu1 %v2088_v22  ;;  %968 = vperm.xlu0 %1886, %v926_v25   ;;  %v1818_v19 = vld [vmem:[%s2097_s24 + $0x74] sm:$0xf]  ;;  %v1360_v23 = vld [vmem:[%s2142_s25 + $0x58] sm:$0xff]  ;;  %v1664_v25 = vor.u32 %v1810_v17, %v1661_v18  ;;  %v1667_v31 = vld [vmem:[%s2097_s24 + $0x40] sm:$0xf] }
  0x24   : > { %978 = vperm.xlu2 %1888, %v928_v37   ;;  %v1359_v21 = vld [vmem:[%s2142_s25 + $0x50] sm:$0xff]  ;;  %v1813_v32 = vld [vmem:[%s2097_s24 + $0x44] sm:$0xf0]  ;;  %v1812_v33 = vld [vmem:[%s2097_s24 + $0x44] sm:$0xf] }
  0x25   : > { %776 = vmatpush.bf16.msra.mxu0 %v1821_v27  ;;  %v1669_v34 = vld [vmem:[%s2097_s24 + $0x48] sm:$0xf0]  ;;  %v1668_v35 = vor.u32 %v1813_v32, %v1667_v31  ;;  %v1842_v37 = vld [vmem:[%s2051_s13 + $0x30] sm:$0xff]  ;;  %v2273_v32 = vld [vmem:[%s2489_s6] ss:$0 sm:$0xff] }
  0x26   : > { %1794 = vmatmul.msk.bf16.gmra.mxu2 %vm1112_vm0, %v1837_v26  ;;  %1850 = vmatpush.bf16.msra.mxu3 %v1821_v27  ;;  %v1362_v27 = vld [vmem:[%s2142_s25 + $0x68] sm:$0xff]  ;;  %v1672_v36 = vor.u32 %v1812_v33, %v1669_v34 }
  0x27   : > { %825 = vmatpush.bf16.msra.mxu1 %v2107_v28 }
  0x28   : > { %988 = vperm.xlu1 %1887, %v930_v38   ;;  %v1675_v38 = vld [vmem:[%s2097_s24 + $0x50] sm:$0xf] }
  0x29   : > { %777 = vmatpush.bf16.msra.mxu0 %v1820_v29 }
  0x2a   : > { %1851 = vmatpush.bf16.msra.mxu3 %v1820_v29  ;;  %v1363_v29 = vld [vmem:[%s2142_s25 + $0x70] sm:$0xff] }
  0x2b   : > { %826 = vmatpush.bf16.msra.mxu1 %v2115_v30  ;;  %983 = vperm.xlu0 %1886, %v929_v39   ;;  %v1815_v39 = vld [vmem:[%s2097_s24 + $0x54] sm:$0xf0] }
  0x2c   : > { %778 = vmatmul.bf16.vlgmr.msra.gmra.mxu0 %v1636_v40  ;;  %993 = vperm.xlu2 %1888, %v931_v43   ;;  %v1814_v40 = vld [vmem:[%s2097_s24 + $0x54] sm:$0xf] }
  0x2d   : > { %808 = vmatmul.bf16.vlgmr.msra.gmra.mxu3 %v1684_v41  ;;  %v1677_v41 = vld [vmem:[%s2097_s24 + $0x58] sm:$0xf0] }
  0x2e   : > { %1852 = vmatpush.bf16.msrb.mxu3 %v2005_v1  ;;  %827 = vmatmul.bf16.vlgmr.msra.gmra.mxu1 %v1640_v42  ;;  %v1808_v1 = vld [vmem:[%s2097_s24 + $0x24] sm:$0xf]  ;;  %v1676_v42 = vor.u32 %v1815_v39, %v1675_v38  ;;  %v1680_v43 = vor.u32 %v1814_v40, %v1677_v41 }
  0x2f   : > { %v1656_v9 = vor.u32 %v1808_v1, %v1653_v2 }
  0x30   : > { %1003 = vperm.xlu1 %1887, %v933_v44   ;;  %v1843_v44 = vld [vmem:[%s2051_s13 + $0x38] sm:$0xff] }
  0x32   : > { %1853 = vmatpush.bf16.msrb.mxu3 %v2023_v7  ;;  %v1354_v7 = vld [vmem:[%s2142_s25 + $0x28] sm:$0xff] }
  0x33   : > { %998 = vperm.xlu0 %1886, %v932_v45   ;;  %v1920_v45 = vmov 0.0  }
  0x34   : > { %1008 = vperm.xlu2 %1888, %v934_v53   ;;  %514 = vst.msk [vmem:[#allocation2] sm:$0xff] %vm513_vm1, %v1920_v45 }
  0x35   : > { %515 = vst.msk [vmem:[#allocation2 + $0x8] sm:$0xff] %vm513_vm1, %v1920_v45 }
  0x36   : > { %1854 = vmatpush.bf16.msrb.mxu3 %v2056_v12  ;;  %1795 = vmatmul.msk.bf16.gmra.mxu2 %vm1112_vm0, %v1838_v46  ;;  %v1358_v12 = vld [vmem:[%s2142_s25 + $0x48] sm:$0xff]  ;;  %516 = vst.msk [vmem:[#allocation2 + $0x10] sm:$0xff] %vm513_vm1, %v1920_v45  ;;  %v1210_v46 = vld [vmem:[%s2492_s9] sm:$0x1] }
  0x37   : > { %517 = vst.msk [vmem:[#allocation2 + $0x18] sm:$0xff] %vm513_vm1, %v1920_v45  ;;  %v1211_v48 = vadd.f32 1e-05, %v1210_v46 }
  0x38   : > { %1367 = vperm.xlu1 %1887, %v1349_v54   ;;  %518 = vst.msk [vmem:[#allocation2 + $0x20] sm:$0xff] %vm513_vm1, %v1920_v45 }
  0x39   : > { %519 = vst.msk [vmem:[#allocation2 + $0x28] sm:$0xff] %vm513_vm1, %v1920_v45  ;;  %1893 = vrsqrt.f32 %v1211_v48  ;;  %vm1218_vm2 = vweird.f32 %v1211_v48 }
  0x3a   : > { %1855 = vmatpush.bf16.msrb.mxu3 %v2067_v15  ;;  %v1659_v15 = vld [vmem:[%s2097_s24 + $0x30] sm:$0xf]  ;;  %520 = vst.msk [vmem:[#allocation2 + $0x30] sm:$0xff] %vm513_vm1, %v1920_v45 }
  0x3b   : > { %1013 = vperm.xlu0 %1886, %v935_v55   ;;  %v1660_v24 = vor.u32 %v1811_v16, %v1659_v15  ;;  %521 = vst.msk [vmem:[#allocation2 + $0x38] sm:$0xff] %vm513_vm1, %v1920_v45 }
  0x3c   : > { %783 = vmatmul.bf16.gmra.mxu0 %v1644_v56  ;;  %1372 = vperm.xlu2 %1888, %v1350_v59   ;;  %522 = vst.msk [vmem:[#allocation2 + $0x40] sm:$0xff] %vm513_vm1, %v1920_v45 }
  0x3d   : > { %813 = vmatmul.bf16.gmra.mxu3 %v1692_v57  ;;  %523 = vst.msk [vmem:[#allocation2 + $0x48] sm:$0xff] %vm513_vm1, %v1920_v45 }
  0x3e   : > { %1856 = vmatpush.bf16.msrb.mxu3 %v2079_v20  ;;  %832 = vmatmul.bf16.gmra.mxu1 %v1648_v58  ;;  %v1693_v20 = vld [vmem:[%s2097_s24 + $0x78] sm:$0xf0]  ;;  %524 = vst.msk [vmem:[#allocation2 + $0x50] sm:$0xff] %vm513_vm1, %v1920_v45 }
  0x3f   : > { %v1696_v26 = vor.u32 %v1818_v19, %v1693_v20  ;;  %525 = vst.msk [vmem:[#allocation2 + $0x58] sm:$0xff] %vm513_vm1, %v1920_v45  ;;  %v1894_v54 = vpop.eup %1893 }
  0x40   : > { %1382 = vperm.xlu1 %1887, %v1352_v60   ;;  %526 = vst.msk [vmem:[#allocation2 + $0x60] sm:$0xff] %vm513_vm1, %v1920_v45  ;;  %v1213_v55 = vmul.f32 %v1894_v54, %v1211_v48  ;;  %vm1219_vm3 = vweird.f32 %v1894_v54 }
  0x41   : > { %527 = vst.msk [vmem:[#allocation2 + $0x68] sm:$0xff] %vm513_vm1, %v1920_v45  ;;  %vm1220_vm4 = vmor %vm1218_vm2, %vm1219_vm3 }
  0x42   : > { %1857 = vmatpush.bf16.msrb.mxu3 %v2088_v22  ;;  %v1361_v22 = vld [vmem:[%s2142_s25 + $0x60] sm:$0xff]  ;;  %528 = vst.msk [vmem:[#allocation2 + $0x70] sm:$0xff] %vm513_vm1, %v1920_v45  ;;  %v1214_v59 = vmul.f32 %v1894_v54, %v1213_v55 }
  0x43   : > { %1377 = vperm.xlu0 %1886, %v1351_v61   ;;  %529 = vst.msk [vmem:[#allocation2 + $0x78] sm:$0xff] %vm513_vm1, %v1920_v45 }
  0x44   : > { %1387 = vperm.xlu2 %1888, %v1353_v5   ;;  %v1215_v1 = vmul.f32 0.5, %v1214_v59 }
  0x46   : > { %1858 = vmatpush.bf16.msrb.mxu3 %v2107_v28  ;;  %1796 = vmatmul.msk.bf16.gmra.mxu2 %vm1112_vm0, %v1839_v62  ;;  %v1364_v28 = vld [vmem:[%s2142_s25 + $0x78] sm:$0xff]  ;;  %v530_v62 = vld [vmem:[#allocation2] sm:$0xff]  ;;  %v1216_v4 = vsub.f32 1.5, %v1215_v1 }
  0x48   : > { %1397 = vperm.xlu1 %1887, %v1355_v6  }
  0x4a   : > { %1859 = vmatpush.bf16.msrb.mxu3 %v2115_v30  ;;  %v1841_v30 = vld [vmem:[%s2051_s13 + $0x28] sm:$0xff] }
  0x4b   : > { %1392 = vperm.xlu0 %1886, %v1354_v7  }
  0x4c   : > { %788 = vmatmul.bf16.gmra.mxu0 %v1652_v8  ;;  %1402 = vperm.xlu2 %1888, %v1356_v11  }
  0x4d   : > { %857 = vmatmul.bf16.vlgmr.msrb.gmra.mxu3 %v1688_v10 }
  0x4e   : > { %837 = vmatmul.bf16.gmra.mxu1 %v1656_v9  ;;  %v531_v9 = vld [vmem:[#allocation2 + $0x8] sm:$0xff] }
  0x50   : > { %1412 = vperm.xlu1 %1887, %v1358_v12  }
  0x53   : > { %1407 = vperm.xlu0 %1886, %v1357_v13   ;;  %v1217_v13 = vmul.f32 %v1894_v54, %v1216_v4 }
  0x54   : > { %1417 = vperm.xlu2 %1888, %v1359_v21  }
  0x55   : > { %v1221_v18 = vsel %vm1220_vm4, %v1894_v54, %v1217_v13 }
  0x56   : > { %1797 = vmatmul.msk.bf16.gmra.mxu2 %vm1112_vm0, %v1840_v14  ;;  %v2249_v14 = vld [vmem:[%s2488_s5] ss:$0 sm:$0xff] }
  0x58   : > { %1427 = vperm.xlu1 %1887, %v1361_v22   ;;  %v2261_v22 = vld [vmem:[%s2491_s8] ss:$0 sm:$0xff] }
  0x5b   : > { %1422 = vperm.xlu0 %1886, %v1360_v23  }
  0x5c   : > { %793 = vmatmul.bf16.gmra.mxu0 %v1660_v24  ;;  %1432 = vperm.xlu2 %1888, %v1362_v27  }
  0x5d   : > { %862 = vmatmul.bf16.gmra.mxu3 %v1696_v26 }
  0x5e   : > { %842 = vmatmul.bf16.gmra.mxu1 %v1664_v25  ;;  %v532_v25 = vld [vmem:[#allocation2 + $0x10] sm:$0xff] }
  0x60   : > { %1442 = vperm.xlu1 %1887, %v1364_v28   ;;  %v2266_v28 = vperm.slane %v1221_v18, 0 }
  0x63   : > { %1437 = vperm.xlu0 %1886, %v1363_v29  }
  0x66   : > { %1798 = vmatmul.msk.bf16.gmra.mxu2 %vm1112_vm0, %v1841_v30 }
  0x6c   : > { %798 = vmatmul.bf16.gmra.mxu0 %v1668_v35 }
  0x6e   : > { %847 = vmatmul.bf16.gmra.mxu1 %v1672_v36  ;;  %v2223_v51 = vpop.permute.xlu2 %958  ;;  %v2279_v36 = vld [vmem:[%s2490_s7] ss:$0 sm:$0xff] }
  0x76   : > { %1799 = vmatmul.msk.bf16.gmra.mxu2 %vm1112_vm0, %v1842_v37  ;;  %v2229_v57 = vpop.permute.xlu2 %963 }
  0x7c   : > { %803 = vmatmul.bf16.gmra.mxu0 %v1676_v42 }
  0x7e   : > { %852 = vmatmul.bf16.gmra.mxu1 %v1680_v43  ;;  %v2242_v7 = vpop.permute.xlu2 %978 }
  0x82   : > { %v2221_v47 = vpop.permute.xlu1 %948 }
  0x85   : > { %v939_v50 = vpop.permute.xlu0 %938 }
  0x86   : > { %1800 = vmatmul.msk.bf16.gmra.mxu2 %vm1112_vm0, %v1843_v44  ;;  %v2264_v27 = vpop.permute.xlu2 %993  ;;  %v533_v44 = vld [vmem:[#allocation2 + $0x18] sm:$0xff] }
  0x8a   : > { %v2225_v52 = vpop.permute.xlu1 %953 }
  0x8d   : > { %v944_v56 = vpop.permute.xlu0 %943 }
  0x8e   : > { %v2293_v55 = vpop.permute.xlu2 %1008 }
  0x92   : > { %v2233_v60 = vpop.permute.xlu1 %973 }
  0x95   : > { %v2235_v3 = vpop.permute.xlu0 %968 }
  0x99   : > { %v1154_v49 = vpop.f32.mrf.mxu2 }
  0x9a   : > { %v2244_v11 = vpop.permute.xlu1 %988 }
  0x9d   : > { %v2256_v21 = vpop.permute.xlu0 %983 }
  0xa1   : > { %v2227_v53 = vpop.f32.mrf.mxu2 }
  0xa2   : > { %v2268_v31 = vpop.permute.xlu1 %1003 }
  0xa5   : > { %v2289_v46 = vpop.permute.xlu0 %998 }
  0xa9   : > { %v2231_v58 = vpop.f32.mrf.mxu2  ;;  %v779_v61 = vpop.f32.mrf.mxu0 }
  0xab   : > { %v828_v63 = vpop.f32.mrf.mxu1 }
  0xac   : > { %v829_v0 = vadd.f32 %v828_v63, %v779_v61 }
  0xad   : > { %v2316_v18 = vpop.permute.xlu0 %1013 }
  0xae   : > { %v868_v2 = vadd.f32 %v829_v0, %v530_v62  ;;  %v1368_v62 = vpop.permute.xlu1 %1367 }
  0xb0   : > { %885 = vst.msk [vmem:[#allocation2] sm:$0xff] %vm513_vm1, %v868_v2  ;;  %v2238_v5 = vpop.f32.mrf.mxu3 }
  0xb1   : > { %v2240_v6 = vpop.f32.mrf.mxu2  ;;  %v781_v8 = vpop.f32.mrf.mxu0 }
  0xb3   : > { %v830_v10 = vpop.f32.mrf.mxu1 }
  0xb4   : > { %v831_v12 = vadd.f32 %v830_v10, %v781_v8 }
  0xb6   : > { %v869_v15 = vadd.f32 %v831_v12, %v531_v9  ;;  %v534_v12 = vld [vmem:[#allocation2 + $0x20] sm:$0xff] }
  0xb7   : > { %v904_v16 = vld [vmem:[#allocation2] sm:$0xff] }
  0xb8   : > { %v1016_v17 = vmul.f32 %v939_v50, %v904_v16  ;;  %886 = vst.msk [vmem:[#allocation2 + $0x8] sm:$0xff] %vm513_vm1, %v869_v15  ;;  %v2252_v19 = vpop.f32.mrf.mxu3 }
  0xb9   : > { %v2254_v20 = vpop.f32.mrf.mxu2  ;;  %v784_v24 = vpop.f32.mrf.mxu0 }
  0xba   : > { %v1036_v23 = vadd.f32 %v2249_v14, %v1016_v17 }
  0xbb   : > { %v833_v26 = vpop.f32.mrf.mxu1 }
  0xbc   : > { %v1194_v29 = vadd.f32 %v1154_v49, %v1036_v23  ;;  %v834_v30 = vadd.f32 %v833_v26, %v784_v24 }
  0xbe   : > { %v1226_v33 = vsub.f32 %v1194_v29, %v2261_v22  ;;  %v870_v34 = vadd.f32 %v834_v30, %v532_v25  ;;  %v1373_v29 = vpop.permute.xlu2 %1372 }
  0xbf   : > { %v905_v35 = vld [vmem:[#allocation2 + $0x8] sm:$0xff] }
  0xc0   : > { %v1245_v37 = vmul.f32 %v2266_v28, %v1226_v33  ;;  %v1017_v38 = vmul.f32 %v944_v56, %v905_v35  ;;  %887 = vst.msk [vmem:[#allocation2 + $0x10] sm:$0xff] %vm513_vm1, %v870_v34  ;;  %v2283_v39 = vpop.f32.mrf.mxu3  ;;  %v542_v35 = vld [vmem:[#allocation2 + $0x60] sm:$0xff] }
  0xc1   : > { %v2285_v40 = vpop.f32.mrf.mxu2  ;;  %v786_v43 = vpop.f32.mrf.mxu0 }
  0xc2   : > { %v1265_v41 = vmul.f32 %v2273_v32, %v1245_v37  ;;  %v1037_v42 = vadd.f32 %v2249_v14, %v1017_v38 }
  0xc3   : > { %v835_v45 = vpop.f32.mrf.mxu1 }
  0xc4   : > { %v1285_v48 = vadd.f32 %v2279_v36, %v1265_v41  ;;  %v1195_v49 = vadd.f32 %v2227_v53, %v1037_v42  ;;  %v836_v50 = vadd.f32 %v835_v45, %v786_v43 }
  0xc6   : > { %vm1301_vm5 = vcmp.ge.f32.partialorder %v1285_v48, 0.0  ;;  %v1317_v54 = vmul.f32 0.01, %v1285_v48  ;;  %v1227_v56 = vsub.f32 %v1195_v49, %v2261_v22  ;;  %v871_v59 = vadd.f32 %v836_v50, %v533_v44 }
  0xc7   : > { %v906_v61 = vld [vmem:[#allocation2 + $0x10] sm:$0xff] }
  0xc8   : > { %v1333_v63 = vsel %vm1301_vm5, %v1285_v48, %v1317_v54  ;;  %v1246_v0 = vmul.f32 %v2266_v28, %v1227_v56  ;;  %v1018_v1 = vmul.f32 %v2221_v47, %v906_v61  ;;  %888 = vst.msk [vmem:[#allocation2 + $0x18] sm:$0xff] %vm513_vm1, %v871_v59  ;;  %v2299_v53 = vpop.f32.mrf.mxu3  ;;  %v535_v48 = vld [vmem:[#allocation2 + $0x28] sm:$0xff] }
  0xc9   : > { %v1445_v2 = vmul.f32 %v1368_v62, %v1333_v63  ;;  %v2301_v4 = vpop.f32.mrf.mxu2  ;;  %v789_v47 = vpop.f32.mrf.mxu0 }
  0xca   : > { %v1266_v8 = vmul.f32 %v2273_v32, %v1246_v0  ;;  %v1038_v9 = vadd.f32 %v2249_v14, %v1018_v1  ;;  %v1378_v63 = vpop.permute.xlu0 %1377 }
  0xcb   : > { %v1461_v10 = vpack.c.bf16 %v1445_v2, %v1445_v2  ;;  %v838_v13 = vpop.f32.mrf.mxu1 }
  0xcc   : > { %v1286_v15 = vadd.f32 %v2279_v36, %v1266_v8  ;;  %v1196_v16 = vadd.f32 %v2231_v58, %v1038_v9  ;;  %v839_v17 = vadd.f32 %v838_v13, %v789_v47  ;;  %v543_v8 = vld [vmem:[#allocation2 + $0x68] sm:$0xff] }
  0xcd   : > { %1478 = vst.msk [vmem:[%s2308_s21] sm:$0xf] %vm1477_vm6, %v1461_v10 }
  0xce   : > { %vm1302_vm7 = vcmp.ge.f32.partialorder %v1286_v15, 0.0  ;;  %v1318_v23 = vmul.f32 0.01, %v1286_v15  ;;  %v1228_v24 = vsub.f32 %v1196_v16, %v2261_v22  ;;  %v872_v25 = vadd.f32 %v839_v17, %v534_v12  ;;  %v536_v17 = vld [vmem:[#allocation2 + $0x30] sm:$0xff] }
  0xcf   : > { %v907_v26 = vld [vmem:[#allocation2 + $0x18] sm:$0xff] }
  0xd0   : > { %v1334_v30 = vsel %vm1302_vm7, %v1286_v15, %v1318_v23  ;;  %v1247_v33 = vmul.f32 %v2266_v28, %v1228_v24  ;;  %v1019_v34 = vmul.f32 %v2225_v52, %v907_v26  ;;  %889 = vst.msk [vmem:[#allocation2 + $0x20] sm:$0xff] %vm513_vm1, %v872_v25  ;;  %v858_v37 = vpop.f32.mrf.mxu3 }
  0xd1   : > { %v1446_v58 = vmul.f32 %v1373_v29, %v1334_v30  ;;  %v2322_v38 = vpop.f32.mrf.mxu2  ;;  %v859_v43 = vadd.f32 %v858_v37, %v2238_v5  ;;  %v791_v44 = vpop.f32.mrf.mxu0 }
  0xd2   : > { %v1267_v41 = vmul.f32 %v2273_v32, %v1247_v33  ;;  %v1039_v42 = vadd.f32 %v2249_v14, %v1019_v34  ;;  %v1383_v34 = vpop.permute.xlu1 %1382 }
  0xd3   : > { %v1462_v45 = vpack.c.bf16 %v1446_v58, %v1446_v58  ;;  %v840_v49 = vpop.f32.mrf.mxu1  ;;  %v880_v54 = vadd.f32 %v859_v43, %v542_v35 }
  0xd4   : > { %v1287_v52 = vadd.f32 %v2279_v36, %v1267_v41  ;;  %v1197_v50 = vadd.f32 %v2240_v6, %v1039_v42  ;;  %v841_v56 = vadd.f32 %v840_v49, %v791_v44  ;;  %v544_v41 = vld [vmem:[#allocation2 + $0x70] sm:$0xff] }
  0xd5   : > { %1479 = vst.msk [vmem:[%s2308_s21 + $0x4] sm:$0xf] %vm1477_vm6, %v1462_v45 }
  0xd6   : > { %vm1303_vm8 = vcmp.ge.f32.partialorder %v1287_v52, 0.0  ;;  %v1319_v59 = vmul.f32 0.01, %v1287_v52  ;;  %v1229_v61 = vsub.f32 %v1197_v50, %v2261_v22  ;;  %897 = vst.msk [vmem:[#allocation2 + $0x60] sm:$0xff] %vm513_vm1, %v880_v54  ;;  %v873_v62 = vadd.f32 %v841_v56, %v535_v48  ;;  %v537_v50 = vld [vmem:[#allocation2 + $0x38] sm:$0xff] }
  0xd7   : > { %v908_v5 = vld [vmem:[#allocation2 + $0x20] sm:$0xff] }
  0xd8   : > { %v1335_v0 = vsel %vm1303_vm8, %v1287_v52, %v1319_v59  ;;  %v1248_v1 = vmul.f32 %v2266_v28, %v1229_v61  ;;  %v1020_v2 = vmul.f32 %v2223_v51, %v908_v5  ;;  %890 = vst.msk [vmem:[#allocation2 + $0x28] sm:$0xff] %vm513_vm1, %v873_v62  ;;  %v860_v9 = vpop.f32.mrf.mxu3 }
  0xd9   : > { %v1447_v6 = vmul.f32 %v1378_v63, %v1335_v0  ;;  %v2336_v47 = vpop.f32.mrf.mxu2  ;;  %v861_v13 = vadd.f32 %v860_v9, %v2252_v19  ;;  %v794_v15 = vpop.f32.mrf.mxu0 }
  0xda   : > { %v1268_v10 = vmul.f32 %v2273_v32, %v1248_v1  ;;  %v1040_v12 = vadd.f32 %v2249_v14, %v1020_v2  ;;  %v1388_v0 = vpop.permute.xlu2 %1387 }
  0xdb   : > { %v1463_v16 = vpack.c.bf16 %v1447_v6, %v1447_v6  ;;  %v843_v23 = vpop.f32.mrf.mxu1  ;;  %v881_v25 = vadd.f32 %v861_v13, %v543_v8  ;;  %v545_v8 = vld [vmem:[#allocation2 + $0x78] sm:$0xff] }
  0xdc   : > { %v1288_v51 = vadd.f32 %v2279_v36, %v1268_v10  ;;  %v1198_v24 = vadd.f32 %v2254_v20, %v1040_v12  ;;  %v844_v26 = vadd.f32 %v843_v23, %v794_v15  ;;  %v538_v23 = vld [vmem:[#allocation2 + $0x40] sm:$0xff] }
  0xdd   : > { %1480 = vst.msk [vmem:[%s2308_s21 + $0x8] sm:$0xf] %vm1477_vm6, %v1463_v16 }
  0xde   : > { %vm1304_vm9 = vcmp.ge.f32.partialorder %v1288_v51, 0.0  ;;  %v1320_v29 = vmul.f32 0.01, %v1288_v51  ;;  %v1230_v30 = vsub.f32 %v1198_v24, %v2261_v22  ;;  %898 = vst.msk [vmem:[#allocation2 + $0x68] sm:$0xff] %vm513_vm1, %v881_v25  ;;  %v874_v33 = vadd.f32 %v844_v26, %v536_v17 }
  0xdf   : > { %v909_v19 = vld [vmem:[#allocation2 + $0x28] sm:$0xff] }
  0xe0   : > { %v1336_v58 = vsel %vm1304_vm9, %v1288_v51, %v1320_v29  ;;  %v1249_v35 = vmul.f32 %v2266_v28, %v1230_v30  ;;  %v1021_v37 = vmul.f32 %v2229_v57, %v909_v19  ;;  %891 = vst.msk [vmem:[#allocation2 + $0x30] sm:$0xff] %vm513_vm1, %v874_v33  ;;  %v863_v42 = vpop.f32.mrf.mxu3  ;;  %v1393_v19 = vpop.permute.xlu0 %1392 }
  0xe1   : > { %v1448_v20 = vmul.f32 %v1383_v34, %v1336_v58  ;;  %v2350_v43 = vpop.f32.mrf.mxu2  ;;  %v864_v48 = vadd.f32 %v863_v42, %v2283_v39  ;;  %v796_v49 = vpop.f32.mrf.mxu0 }
  0xe2   : > { %v1269_v44 = vmul.f32 %v2273_v32, %v1249_v35  ;;  %v1041_v45 = vadd.f32 %v2249_v14, %v1021_v37 }
  0xe3   : > { %v1464_v52 = vpack.c.bf16 %v1448_v20, %v1448_v20  ;;  %v845_v54 = vpop.f32.mrf.mxu1  ;;  %v882_v59 = vadd.f32 %v864_v48, %v544_v41  ;;  %v916_v20 = vld [vmem:[#allocation2 + $0x60] sm:$0xff]  ;;  %v1398_v41 = vpop.permute.xlu1 %1397 }
  0xe4   : > { %v1289_v57 = vadd.f32 %v2279_v36, %v1269_v44  ;;  %v1199_v56 = vadd.f32 %v2285_v40, %v1041_v45  ;;  %v846_v61 = vadd.f32 %v845_v54, %v796_v49  ;;  %v539_v49 = vld [vmem:[#allocation2 + $0x48] sm:$0xff] }
  0xe5   : > { %1481 = vst.msk [vmem:[%s2308_s21 + $0xc] sm:$0xf] %vm1477_vm6, %v1464_v52 }
  0xe6   : > { %vm1305_vm10 = vcmp.ge.f32.partialorder %v1289_v57, 0.0  ;;  %v1321_v62 = vmul.f32 0.01, %v1289_v57  ;;  %v1231_v5 = vsub.f32 %v1199_v56, %v2261_v22  ;;  %899 = vst.msk [vmem:[#allocation2 + $0x70] sm:$0xff] %vm513_vm1, %v882_v59  ;;  %v875_v63 = vadd.f32 %v846_v61, %v537_v50 }
  0xe7   : > { %v910_v39 = vld [vmem:[#allocation2 + $0x30] sm:$0xff] }
  0xe8   : > { %v1337_v1 = vsel %vm1305_vm10, %v1289_v57, %v1321_v62  ;;  %v1250_v2 = vmul.f32 %v2266_v28, %v1231_v5  ;;  %v1022_v6 = vmul.f32 %v2235_v3, %v910_v39  ;;  %892 = vst.msk [vmem:[#allocation2 + $0x38] sm:$0xff] %vm513_vm1, %v875_v63  ;;  %v865_v9 = vpop.f32.mrf.mxu3  ;;  %v1028_v57 = vmul.f32 %v2289_v46, %v916_v20 }
  0xe9   : > { %v1449_v40 = vmul.f32 %v1388_v0, %v1337_v1  ;;  %v2364_v10 = vpop.f32.mrf.mxu2  ;;  %v866_v15 = vadd.f32 %v865_v9, %v2299_v53  ;;  %v799_v16 = vpop.f32.mrf.mxu0  ;;  %v917_v0 = vld [vmem:[#allocation2 + $0x68] sm:$0xff] }
  0xea   : > { %v1270_v12 = vmul.f32 %v2273_v32, %v1250_v2  ;;  %v1042_v13 = vadd.f32 %v2249_v14, %v1022_v6  ;;  %v1403_v9 = vpop.permute.xlu2 %1402 }
  0xeb   : > { %v1465_v17 = vpack.c.bf16 %v1449_v40, %v1449_v40  ;;  %v848_v51 = vpop.f32.mrf.mxu1  ;;  %v883_v25 = vadd.f32 %v866_v15, %v545_v8  ;;  %v1029_v15 = vmul.f32 %v2268_v31, %v917_v0 }
  0xec   : > { %v1290_v3 = vadd.f32 %v2279_v36, %v1270_v12  ;;  %v1200_v24 = vadd.f32 %v2301_v4, %v1042_v13  ;;  %v849_v26 = vadd.f32 %v848_v51, %v799_v16  ;;  %v540_v51 = vld [vmem:[#allocation2 + $0x50] sm:$0xff] }
  0xed   : > { %1482 = vst.msk [vmem:[%s2308_s21 + $0x10] sm:$0xf] %vm1477_vm6, %v1465_v17 }
  0xee   : > { %vm1306_vm11 = vcmp.ge.f32.partialorder %v1290_v3, 0.0  ;;  %v1322_v29 = vmul.f32 0.01, %v1290_v3  ;;  %v1232_v30 = vsub.f32 %v1200_v24, %v2261_v22  ;;  %900 = vst.msk [vmem:[#allocation2 + $0x78] sm:$0xff] %vm513_vm1, %v883_v25  ;;  %v876_v33 = vadd.f32 %v849_v26, %v538_v23 }
  0xef   : > { %v911_v53 = vld [vmem:[#allocation2 + $0x38] sm:$0xff] }
  0xf0   : > { %v1338_v34 = vsel %vm1306_vm11, %v1290_v3, %v1322_v29  ;;  %v1251_v58 = vmul.f32 %v2266_v28, %v1232_v30  ;;  %v1023_v35 = vmul.f32 %v2233_v60, %v911_v53  ;;  %893 = vst.msk [vmem:[#allocation2 + $0x40] sm:$0xff] %vm513_vm1, %v876_v33  ;;  %v1049_v30 = vadd.f32 %v2249_v14, %v1029_v15 }
  0xf1   : > { %v1450_v4 = vmul.f32 %v1393_v19, %v1338_v34  ;;  %v2378_v37 = vpop.f32.mrf.mxu2  ;;  %v801_v45 = vpop.f32.mrf.mxu0  ;;  %v918_v34 = vld [vmem:[#allocation2 + $0x70] sm:$0xff] }
  0xf2   : > { %v1271_v42 = vmul.f32 %v2273_v32, %v1251_v58  ;;  %v1043_v44 = vadd.f32 %v2249_v14, %v1023_v35 }
  0xf3   : > { %v1466_v48 = vpack.c.bf16 %v1450_v4, %v1450_v4  ;;  %v850_v52 = vpop.f32.mrf.mxu1  ;;  %v1408_v4 = vpop.permute.xlu0 %1407 }
  0xf4   : > { %v1291_v50 = vadd.f32 %v2279_v36, %v1271_v42  ;;  %v1201_v60 = vadd.f32 %v2322_v38, %v1043_v44  ;;  %v851_v54 = vadd.f32 %v850_v52, %v801_v45  ;;  %v1048_v38 = vadd.f32 %v2249_v14, %v1028_v57  ;;  %v2415_v57 = vpop.permute.xlu2 %1417 }
  0xf5   : > { %1483 = vst.msk [vmem:[%s2308_s21 + $0x14] sm:$0xf] %vm1477_vm6, %v1466_v48 }
  0xf6   : > { %vm1307_vm12 = vcmp.ge.f32.partialorder %v1291_v50, 0.0  ;;  %v1323_v56 = vmul.f32 0.01, %v1291_v50  ;;  %v1233_v59 = vsub.f32 %v1201_v60, %v2261_v22  ;;  %v877_v61 = vadd.f32 %v851_v54, %v539_v49  ;;  %v541_v54 = vld [vmem:[#allocation2 + $0x58] sm:$0xff] }
  0xf7   : > { %v912_v62 = vld [vmem:[#allocation2 + $0x40] sm:$0xff] }
  0xf8   : > { %v1339_v5 = vsel %vm1307_vm12, %v1291_v50, %v1323_v56  ;;  %v1252_v63 = vmul.f32 %v2266_v28, %v1233_v59  ;;  %v1024_v39 = vmul.f32 %v2242_v7, %v912_v62  ;;  %894 = vst.msk [vmem:[#allocation2 + $0x48] sm:$0xff] %vm513_vm1, %v877_v61  ;;  %v2395_v7 = vpop.permute.xlu1 %1412 }
  0xf9   : > { %v1451_v1 = vmul.f32 %v1398_v41, %v1339_v5  ;;  %v1184_v46 = vpop.f32.mrf.mxu2  ;;  %v804_v8 = vpop.f32.mrf.mxu0 }
  0xfa   : > { %v1272_v2 = vmul.f32 %v2273_v32, %v1252_v63  ;;  %v1044_v6 = vadd.f32 %v2249_v14, %v1024_v39  ;;  %v1206_v40 = vadd.f32 %v1184_v46, %v1048_v38 }
  0xfb   : > { %v1467_v12 = vpack.c.bf16 %v1451_v1, %v1451_v1  ;;  %v853_v13 = vpop.f32.mrf.mxu1 }
  0xfc   : > { %v1292_v16 = vadd.f32 %v2279_v36, %v1272_v2  ;;  %v1202_v17 = vadd.f32 %v2336_v47, %v1044_v6  ;;  %v1238_v23 = vsub.f32 %v1206_v40, %v2261_v22  ;;  %v854_v3 = vadd.f32 %v853_v13, %v804_v8 }
  0xfd   : > { %1484 = vst.msk [vmem:[%s2308_s21 + $0x18] sm:$0xf] %vm1477_vm6, %v1467_v12  ;;  %v919_v12 = vld [vmem:[#allocation2 + $0x78] sm:$0xff] }
  0xfe   : > { %vm1308_vm13 = vcmp.ge.f32.partialorder %v1292_v16, 0.0  ;;  %v1324_v24 = vmul.f32 0.01, %v1292_v16  ;;  %v1234_v25 = vsub.f32 %v1202_v17, %v2261_v22  ;;  %v1257_v26 = vmul.f32 %v2266_v28, %v1238_v23 }
  0xff   : > { %v913_v29 = vld [vmem:[#allocation2 + $0x48] sm:$0xff]  ;;  %v878_v31 = vadd.f32 %v854_v3, %v540_v51  ;;  %v2432_v51 = vpop.permute.xlu0 %1422 }
 0x100   : > { %v1340_v33 = vsel %vm1308_vm13, %v1292_v16, %v1324_v24  ;;  %v1253_v53 = vmul.f32 %v2266_v28, %v1234_v25  ;;  %v1025_v47 = vmul.f32 %v2256_v21, %v913_v29  ;;  %v1277_v19 = vmul.f32 %v2273_v32, %v1257_v26  ;;  %v1428_v61 = vpop.permute.xlu1 %1427 }
 0x101   : > { %v1452_v58 = vmul.f32 %v1403_v9, %v1340_v33  ;;  %895 = vst.msk [vmem:[#allocation2 + $0x50] sm:$0xff] %vm513_vm1, %v878_v31  ;;  %v1186_v35 = vpop.f32.mrf.mxu2  ;;  %v806_v45 = vpop.f32.mrf.mxu0  ;;  %v1030_v21 = vmul.f32 %v2293_v55, %v918_v34  ;;  %v1031_v24 = vmul.f32 %v2316_v18, %v919_v12 }
 0x102   : > { %v1273_v20 = vmul.f32 %v2273_v32, %v1253_v53  ;;  %v1045_v41 = vadd.f32 %v2249_v14, %v1025_v47  ;;  %v1297_v42 = vadd.f32 %v2279_v36, %v1277_v19  ;;  %v1207_v44 = vadd.f32 %v1186_v35, %v1049_v30  ;;  %v1433_v30 = vpop.permute.xlu2 %1432 }
 0x103   : > { %v1468_v48 = vpack.c.bf16 %v1452_v58, %v1452_v58  ;;  %v855_v49 = vpop.f32.mrf.mxu1  ;;  %v1050_v46 = vadd.f32 %v2249_v14, %v1030_v21  ;;  %v1051_v58 = vadd.f32 %v2249_v14, %v1031_v24 }
 0x104   : > { %v1293_v52 = vadd.f32 %v2279_v36, %v1273_v20  ;;  %v1203_v50 = vadd.f32 %v2350_v43, %v1045_v41  ;;  %vm1313_vm14 = vcmp.ge.f32.partialorder %v1297_v42, 0.0  ;;  %v1329_v60 = vmul.f32 0.01, %v1297_v42 }
 0x105   : > { %1485 = vst.msk [vmem:[%s2308_s21 + $0x1c] sm:$0xf] %vm1477_vm6, %v1468_v48  ;;  %v1239_v56 = vsub.f32 %v1207_v44, %v2261_v22  ;;  %v856_v59 = vadd.f32 %v855_v49, %v806_v45 }
 0x106   : > { %vm1309_vm15 = vcmp.ge.f32.partialorder %v1293_v52, 0.0  ;;  %v1325_v62 = vmul.f32 0.01, %v1293_v52  ;;  %v1235_v5 = vsub.f32 %v1203_v50, %v2261_v22  ;;  %v1345_v55 = vsel %vm1313_vm14, %v1297_v42, %v1329_v60 }
 0x107   : > { %v1457_v63 = vmul.f32 %v1428_v61, %v1345_v55  ;;  %v1258_v39 = vmul.f32 %v2266_v28, %v1239_v56  ;;  %v879_v43 = vadd.f32 %v856_v59, %v541_v54  ;;  %v1438_v50 = vpop.permute.xlu0 %1437 }
 0x108   : > { %v1341_v38 = vsel %vm1309_vm15, %v1293_v52, %v1325_v62  ;;  %v1254_v0 = vmul.f32 %v2266_v28, %v1235_v5  ;;  %v914_v1 = vld [vmem:[#allocation2 + $0x50] sm:$0xff] }
 0x109   : > { %v1453_v2 = vmul.f32 %v1408_v4, %v1341_v38  ;;  %v1473_v6 = vpack.c.bf16 %v1457_v63, %v1457_v63  ;;  %v1026_v40 = vmul.f32 %v2244_v11, %v914_v1  ;;  %v1278_v8 = vmul.f32 %v2273_v32, %v1258_v39  ;;  %896 = vst.msk [vmem:[#allocation2 + $0x58] sm:$0xff] %vm513_vm1, %v879_v43  ;;  %v1189_v9 = vpop.f32.mrf.mxu2 }
 0x10a   : > { %v1274_v13 = vmul.f32 %v2273_v32, %v1254_v0  ;;  %v1208_v15 = vadd.f32 %v1189_v9, %v1050_v46  ;;  %v1443_v0 = vpop.permute.xlu1 %1442 }
 0x10b   : > { %v1469_v16 = vpack.c.bf16 %v1453_v2, %v1453_v2  ;;  %1490 = vst.msk [vmem:[%s2308_s21 + $0x30] sm:$0xf] %vm1477_vm6, %v1473_v6  ;;  %v1046_v17 = vadd.f32 %v2249_v14, %v1026_v40  ;;  %v1298_v23 = vadd.f32 %v2279_v36, %v1278_v8 }
 0x10c   : > { %v1294_v11 = vadd.f32 %v2279_v36, %v1274_v13  ;;  %v1240_v3 = vsub.f32 %v1208_v15, %v2261_v22 }
 0x10d   : > { %1486 = vst.msk [vmem:[%s2308_s21 + $0x20] sm:$0xf] %vm1477_vm6, %v1469_v16  ;;  %v1204_v25 = vadd.f32 %v2364_v10, %v1046_v17  ;;  %vm1314_vm0 = vcmp.ge.f32.partialorder %v1298_v23, 0.0  ;;  %v1330_v26 = vmul.f32 0.01, %v1298_v23 }
 0x10e   : > { %vm1310_vm1 = vcmp.ge.f32.partialorder %v1294_v11, 0.0  ;;  %v1326_v29 = vmul.f32 0.01, %v1294_v11  ;;  %v1259_v31 = vmul.f32 %v2266_v28, %v1240_v3 }
 0x10f   : > { %v1236_v33 = vsub.f32 %v1204_v25, %v2261_v22  ;;  %v1346_v53 = vsel %vm1314_vm0, %v1298_v23, %v1330_v26 }
 0x110   : > { %v1342_v47 = vsel %vm1310_vm1, %v1294_v11, %v1326_v29  ;;  %v1458_v19 = vmul.f32 %v1433_v30, %v1346_v53  ;;  %v915_v34 = vld [vmem:[#allocation2 + $0x58] sm:$0xff]  ;;  %v1279_v18 = vmul.f32 %v2273_v32, %v1259_v31 }
 0x111   : > { %v1454_v10 = vmul.f32 %v2395_v7, %v1342_v47  ;;  %v1255_v35 = vmul.f32 %v2266_v28, %v1236_v33  ;;  %v1027_v4 = vmul.f32 %v2264_v27, %v915_v34  ;;  %v1191_v20 = vpop.f32.mrf.mxu2 }
 0x112   : > { %v1474_v41 = vpack.c.bf16 %v1458_v19, %v1458_v19  ;;  %v1299_v42 = vadd.f32 %v2279_v36, %v1279_v18  ;;  %v1209_v44 = vadd.f32 %v1191_v20, %v1051_v58 }
 0x113   : > { %v1470_v45 = vpack.c.bf16 %v1454_v10, %v1454_v10  ;;  %v1275_v48 = vmul.f32 %v2273_v32, %v1255_v35  ;;  %v1047_v49 = vadd.f32 %v2249_v14, %v1027_v4 }
 0x114   : > { %1491 = vst.msk [vmem:[%s2308_s21 + $0x34] sm:$0xf] %vm1477_vm6, %v1474_v41  ;;  %vm1315_vm2 = vcmp.ge.f32.partialorder %v1299_v42, 0.0  ;;  %v1331_v21 = vmul.f32 0.01, %v1299_v42  ;;  %v1241_v7 = vsub.f32 %v1209_v44, %v2261_v22 }
 0x115   : > { %1487 = vst.msk [vmem:[%s2308_s21 + $0x24] sm:$0xf] %vm1477_vm6, %v1470_v45  ;;  %v1295_v27 = vadd.f32 %v2279_v36, %v1275_v48  ;;  %v1205_v52 = vadd.f32 %v2378_v37, %v1047_v49 }
 0x116   : > { %v1347_v60 = vsel %vm1315_vm2, %v1299_v42, %v1331_v21  ;;  %v1260_v54 = vmul.f32 %v2266_v28, %v1241_v7 }
 0x117   : > { %vm1311_vm3 = vcmp.ge.f32.partialorder %v1295_v27, 0.0  ;;  %v1327_v56 = vmul.f32 0.01, %v1295_v27  ;;  %v1237_v14 = vsub.f32 %v1205_v52, %v2261_v22  ;;  %v1459_v59 = vmul.f32 %v1438_v50, %v1347_v60 }
 0x118   : > { %v1280_v61 = vmul.f32 %v2273_v32, %v1260_v54 }
 0x119   : > { %v1343_v62 = vsel %vm1311_vm3, %v1295_v27, %v1327_v56  ;;  %v1256_v5 = vmul.f32 %v2266_v28, %v1237_v14  ;;  %v1475_v55 = vpack.c.bf16 %v1459_v59, %v1459_v59 }
 0x11a   : > { %v1455_v63 = vmul.f32 %v2415_v57, %v1343_v62  ;;  %v1300_v37 = vadd.f32 %v2279_v36, %v1280_v61 }
 0x11b   : > { %v1276_v39 = vmul.f32 %v2273_v32, %v1256_v5  ;;  %1492 = vst.msk [vmem:[%s2308_s21 + $0x38] sm:$0xf] %vm1477_vm6, %v1475_v55 }
 0x11c   : > { %v1471_v43 = vpack.c.bf16 %v1455_v63, %v1455_v63  ;;  %vm1316_vm4 = vcmp.ge.f32.partialorder %v1300_v37, 0.0  ;;  %v1332_v22 = vmul.f32 0.01, %v1300_v37 }
 0x11d   : > { %v1296_v38 = vadd.f32 %v2279_v36, %v1276_v39 }
 0x11e   : > { %1488 = vst.msk [vmem:[%s2308_s21 + $0x28] sm:$0xf] %vm1477_vm6, %v1471_v43  ;;  %v1348_v28 = vsel %vm1316_vm4, %v1300_v37, %v1332_v22 }
 0x11f   : > { %vm1312_vm5 = vcmp.ge.f32.partialorder %v1296_v38, 0.0  ;;  %v1328_v1 = vmul.f32 0.01, %v1296_v38  ;;  %v1460_v57 = vmul.f32 %v1443_v0, %v1348_v28 }
 0x121   : > { %v1344_v46 = vsel %vm1312_vm5, %v1296_v38, %v1328_v1  ;;  %v1476_v2 = vpack.c.bf16 %v1460_v57, %v1460_v57 }
 0x122   : > { %v1456_v6 = vmul.f32 %v2432_v51, %v1344_v46 }
 0x123   : > { %1493 = vst.msk [vmem:[%s2308_s21 + $0x3c] sm:$0xf] %vm1477_vm6, %v1476_v2 }
 0x124   : > { %v1472_v32 = vpack.c.bf16 %v1456_v6, %v1456_v6 }
 0x126   : > { %1489 = vst.msk [vmem:[%s2308_s21 + $0x2c] sm:$0xf] %vm1477_vm6, %v1472_v32 }
 0x127 PF: > { %s21_s19 = sadd.s32 1, %s1917_s19   ;;  %s2495_s17 = smov %s1913_s18 }
 0x128   : > { %p18_p5 = scmp.ge.s32.totalorder %s21_s19, 4   ;;  %s2496_s18 = smov %s2498_s20 }
 0x12a   :  { %20 = sbr.rel (!%p18_p5) target bundleno = 2 (0x2), region = 114 }

// kernel: seal_forward.12
= control target key start
LH: loop header
LB: loop body
LE: loop exit
PB: predicated region body
PF: predicated region fallthrough
CT: control target
= control target key end

     0   :  { %s1830_s13 = smov 0   ;;  %s1832_s14 = smov 0   ;;  %s2290_s0 = inlined_call_operand.vmem [shape: bf16[256,256], index: 0, kind: input, shape index: {}]   ;;  %s2291_s1 = inlined_call_operand.vmem [shape: bf16[256,8], index: 1, kind: input, shape index: {}, may-alias: {1,2}]   ;;  %s2292_s2 = inlined_call_operand.vmem [shape: bf16[256,8], index: 2, kind: input, shape index: {}, may-alias: {1,2}]   ;;  %s2293_s3 = inlined_call_operand.vmem [shape: f32[256,1], index: 3, kind: input, shape index: {}]   ;;  %s2294_s4 = inlined_call_operand.vmem [shape: f32[1,8], index: 4, kind: input, shape index: {}]   ;;  %s2295_s5 = inlined_call_operand.vmem [shape: f32[1,8], index: 5, kind: input, shape index: {}]   ;;  %s2296_s6 = inlined_call_operand.vmem [shape: f32[1,8], index: 6, kind: input, shape index: {}]   ;;  %s2297_s7 = inlined_call_operand.vmem [shape: f32[1,8], index: 7, kind: input, shape index: {}]   ;;  %s2298_s8 = inlined_call_operand.vmem [shape: f32[1,8], index: 8, kind: input, shape index: {}]   ;;  %s2299_s9 = inlined_call_operand.vmem [shape: f32[256,1], index: 9, kind: input, shape index: {}]   ;;  %s2300_s10 = inlined_call_operand.vmem [shape: bf16[256,8], index: 10, kind: output, shape index: {}]  }
   0x1   :  { %s1834_s15 = smov 0  }
   0x2 LB: > { %s32_s16 = sadd.s32 1, %s1767_s14  ;;  %p1484_p0 = scmp.ge.s32.totalorder %s1771_s15, 1  ;;  %s1771_s15 = sphi %s1834_s15, %s20_s15   ;;  %s1767_s14 = sphi %s1832_s14, %s2304_s14   ;;  %s1763_s13 = sphi %s1830_s13, %s2303_s13  }
   0x3   : > { %p34_p1 = scmp.ge.s32.totalorder %s32_s16, 2  ;;  %p377_p2 = scmp.lt.s32.totalorder %s1771_s15, 3 }
   0x5   : > { %s2306_s16 = smov (%p34_p1, %s32_s16), 0  ;;  %p378_p3 = pnand %p1484_p0, %p377_p2 }
   0x6   : > { %s1485_s21 = sshll.u32 (!%p378_p3), %s1763_s13, 4 }
   0x7   : > { %381 = sbr.rel (%p378_p3) target bundleno = 268 (0x10c), region = 60  ;;  %p442_p4 = scmp.lt.s32.totalorder (!%p378_p3), %s1485_s21, 31 }
   0xc   : > { %v1650_v0 = vld [vmem:[%s2291_s1 + $0x38] sm:$0xff]  ;;  %v1773_v2 = vmov 0   ;;  %v1649_v3 = vld [vmem:[%s2291_s1 + $0x30] sm:$0xff]  ;;  %s2308_s21 = smov (!%p442_p4, %s1485_s21), 31  ;;  %v1648_v5 = vld [vmem:[%s2291_s1 + $0x28] sm:$0xff]  ;;  %vm486_vm0 = vcmask 64512  }
   0xd   : > { %v1658_v1 = vld [vmem:[%s2291_s1 + $0x78] sm:$0xff]  ;;  %1741 = vset.pattern.permute.xlu1 %v1773_v2  ;;  %1740 = vset.pattern.permute.xlu0 %v1773_v2  ;;  %v1657_v4 = vld [vmem:[%s2291_s1 + $0x70] sm:$0xff]  ;;  %s1863_s26 = sshll.u32 %s2308_s21, 3  ;;  %v1656_v6 = vld [vmem:[%s2291_s1 + $0x68] sm:$0xff]  ;;  %s1489_s12 = sshll.u32 %s2308_s21, 2  ;;  %vm1340_vm5 = vcmask 60416  }
   0xe   : > { %743 = vmatpush.bf16.msra.mxu0 %v1650_v0  ;;  %1698 = vmatpush.bf16.msra.mxu2 %v1650_v0  ;;  %s1872_s11 = scalar_lea.vmem %s2293_s3, %s1863_s26  ;;  %v1647_v10 = vld [vmem:[%s2291_s1 + $0x20] sm:$0xff]  ;;  %v1646_v14 = vld [vmem:[%s2291_s1 + $0x18] sm:$0xff]  ;;  %v1645_v17 = vld [vmem:[%s2291_s1 + $0x10] sm:$0xff]  ;;  %s1907_s17 = scalar_lea.vmem %s2290_s0, %s1863_s26 }
   0xf   : > { %792 = vmatpush.bf16.msra.mxu1 %v1658_v1  ;;  %1706 = vmatpush.bf16.msra.mxu3 %v1658_v1  ;;  %v943_v7 = vld [vmem:[%s1872_s11 + $0x10] sm:$0xff]  ;;  %v941_v8 = vld [vmem:[%s1872_s11] sm:$0xff]  ;;  %v944_v12 = vld [vmem:[%s1872_s11 + $0x18] sm:$0xff]  ;;  %s1942_s30 = scalar_lea.vmem %s2299_s9, %s1863_s26  ;;  %s2034_s18 = scalar_lea.vmem %s2292_s2, %s1489_s12 }
  0x10   : > { %1742 = vset.pattern.permute.xlu2 %v1773_v2  ;;  %v945_v9 = vld [vmem:[%s1872_s11 + $0x20] sm:$0xff]  ;;  %969 = vperm.xlu1 %1741, %v943_v7   ;;  %v942_v13 = vld [vmem:[%s1872_s11 + $0x8] sm:$0xff]  ;;  %v1654_v16 = vld [vmem:[%s2291_s1 + $0x58] sm:$0xff]  ;;  %s2122_s26 = scalar_lea.vmem %s2300_s10, %s1489_s12 }
  0x11   : > { %959 = vperm.xlu0 %1740, %v941_v8   ;;  %979 = vperm.xlu2 %1742, %v945_v9   ;;  %v1655_v11 = vld [vmem:[%s2291_s1 + $0x60] sm:$0xff]  ;;  %v946_v15 = vld [vmem:[%s1872_s11 + $0x28] sm:$0xff]  ;;  %v1653_v18 = vld [vmem:[%s2291_s1 + $0x50] sm:$0xff] }
  0x12   : > { %744 = vmatpush.bf16.msra.mxu0 %v1649_v3  ;;  %1699 = vmatpush.bf16.msra.mxu2 %v1649_v3  ;;  %v948_v19 = vld [vmem:[%s1872_s11 + $0x38] sm:$0xff]  ;;  %v947_v20 = vld [vmem:[%s1872_s11 + $0x30] sm:$0xff]  ;;  %v1644_v21 = vld [vmem:[%s2291_s1 + $0x8] sm:$0xff] }
  0x13   : > { %793 = vmatpush.bf16.msra.mxu1 %v1657_v4  ;;  %1707 = vmatpush.bf16.msra.mxu3 %v1657_v4  ;;  %v949_v22 = vld [vmem:[%s1872_s11 + $0x40] sm:$0xff]  ;;  %v1652_v23 = vld [vmem:[%s2291_s1 + $0x48] sm:$0xff]  ;;  %v951_v34 = vld [vmem:[%s1872_s11 + $0x50] sm:$0xff] }
  0x14   : > { %v1643_v24 = vld [vmem:[%s2291_s1] sm:$0xff]  ;;  %v1628_v27 = vld [vmem:[%s1907_s17 + $0x4] sm:$0xf0]  ;;  %v1500_v31 = vld [vmem:[%s1907_s17 + $0x8] sm:$0xf0] }
  0x15   : > { %v1651_v25 = vld [vmem:[%s2291_s1 + $0x40] sm:$0xff]  ;;  %v1636_v29 = vld [vmem:[%s1907_s17 + $0x44] sm:$0xf0]  ;;  %v1532_v33 = vld [vmem:[%s1907_s17 + $0x48] sm:$0xf0] }
  0x16   : > { %745 = vmatpush.bf16.msra.mxu0 %v1648_v5  ;;  %1700 = vmatpush.bf16.msra.mxu2 %v1648_v5  ;;  %v1498_v26 = vld [vmem:[%s1907_s17] sm:$0xf]  ;;  %v1627_v30 = vld [vmem:[%s1907_s17 + $0x4] sm:$0xf]  ;;  %v950_v35 = vld [vmem:[%s1872_s11 + $0x48] sm:$0xff] }
  0x17   : > { %794 = vmatpush.bf16.msra.mxu1 %v1656_v6  ;;  %1708 = vmatpush.bf16.msra.mxu3 %v1656_v6  ;;  %v1530_v28 = vld [vmem:[%s1907_s17 + $0x40] sm:$0xf]  ;;  %v1635_v32 = vld [vmem:[%s1907_s17 + $0x44] sm:$0xf]  ;;  %v1499_v36 = vor.u32 %v1628_v27, %v1498_v26  ;;  %v1503_v38 = vor.u32 %v1627_v30, %v1500_v31  ;;  %v952_v40 = vld [vmem:[%s1872_s11 + $0x58] sm:$0xff] }
  0x18   : > { %974 = vperm.xlu1 %1741, %v944_v12   ;;  %v1531_v37 = vor.u32 %v1636_v29, %v1530_v28  ;;  %v1535_v39 = vor.u32 %v1635_v32, %v1532_v33  ;;  %v954_v41 = vld [vmem:[%s1872_s11 + $0x68] sm:$0xff]  ;;  %v953_v42 = vld [vmem:[%s1872_s11 + $0x60] sm:$0xff]  ;;  %v955_v43 = vld [vmem:[%s1872_s11 + $0x70] sm:$0xff] }
  0x19   : > { %964 = vperm.xlu0 %1740, %v942_v13   ;;  %984 = vperm.xlu2 %1742, %v946_v15   ;;  %v1506_v44 = vld [vmem:[%s1907_s17 + $0x10] sm:$0xf]  ;;  %v1630_v45 = vld [vmem:[%s1907_s17 + $0x14] sm:$0xf0]  ;;  %v1629_v48 = vld [vmem:[%s1907_s17 + $0x14] sm:$0xf] }
  0x1a   : > { %746 = vmatpush.bf16.msra.mxu0 %v1647_v10  ;;  %1701 = vmatpush.bf16.msra.mxu2 %v1647_v10  ;;  %v1538_v46 = vld [vmem:[%s1907_s17 + $0x50] sm:$0xf]  ;;  %v1638_v47 = vld [vmem:[%s1907_s17 + $0x54] sm:$0xf0]  ;;  %v1508_v49 = vld [vmem:[%s1907_s17 + $0x18] sm:$0xf0]  ;;  %v1507_v54 = vor.u32 %v1630_v45, %v1506_v44 }
  0x1b   : > { %795 = vmatpush.bf16.msra.mxu1 %v1655_v11  ;;  %1709 = vmatpush.bf16.msra.mxu3 %v1655_v11  ;;  %v1637_v50 = vld [vmem:[%s1907_s17 + $0x54] sm:$0xf]  ;;  %v1540_v51 = vld [vmem:[%s1907_s17 + $0x58] sm:$0xf0]  ;;  %v1212_v52 = vld [vmem:[%s1942_s30] sm:$0xff]  ;;  %v1539_v55 = vor.u32 %v1638_v47, %v1538_v46  ;;  %v1511_v56 = vor.u32 %v1629_v48, %v1508_v49 }
  0x1c   : > { %v956_v53 = vld [vmem:[%s1872_s11 + $0x78] sm:$0xff]  ;;  %v1543_v57 = vor.u32 %v1637_v50, %v1540_v51  ;;  %v1213_v58 = vld [vmem:[%s1942_s30 + $0x8] sm:$0xff]  ;;  %v1214_v60 = vld [vmem:[%s1942_s30 + $0x10] sm:$0xff] }
  0x1d   : > { %v1215_v59 = vld [vmem:[%s1942_s30 + $0x18] sm:$0xff]  ;;  %v1216_v61 = vld [vmem:[%s1942_s30 + $0x20] sm:$0xff]  ;;  %v1632_v63 = vld [vmem:[%s1907_s17 + $0x24] sm:$0xf0] }
  0x1e   : > { %747 = vmatpush.bf16.msra.mxu0 %v1646_v14  ;;  %1702 = vmatpush.bf16.msra.mxu2 %v1646_v14  ;;  %v1514_v62 = vld [vmem:[%s1907_s17 + $0x20] sm:$0xf]  ;;  %v1640_v1 = vld [vmem:[%s1907_s17 + $0x64] sm:$0xf0]  ;;  %v1631_v2 = vld [vmem:[%s1907_s17 + $0x24] sm:$0xf] }
  0x1f   : > { %796 = vmatpush.bf16.msra.mxu1 %v1654_v16  ;;  %1710 = vmatpush.bf16.msra.mxu3 %v1654_v16  ;;  %v1546_v0 = vld [vmem:[%s1907_s17 + $0x60] sm:$0xf]  ;;  %v1516_v3 = vld [vmem:[%s1907_s17 + $0x28] sm:$0xf0]  ;;  %v1639_v4 = vld [vmem:[%s1907_s17 + $0x64] sm:$0xf]  ;;  %v1515_v8 = vor.u32 %v1632_v63, %v1514_v62 }
  0x20   : > { %994 = vperm.xlu1 %1741, %v948_v19   ;;  %v1548_v5 = vld [vmem:[%s1907_s17 + $0x68] sm:$0xf0]  ;;  %v1218_v6 = vld [vmem:[%s1942_s30 + $0x30] sm:$0xff]  ;;  %v1547_v9 = vor.u32 %v1640_v1, %v1546_v0  ;;  %v1519_v10 = vor.u32 %v1631_v2, %v1516_v3  ;;  %v1219_v12 = vld [vmem:[%s1942_s30 + $0x38] sm:$0xff] }
  0x21   : > { %989 = vperm.xlu0 %1740, %v947_v20   ;;  %999 = vperm.xlu2 %1742, %v949_v22   ;;  %v1217_v7 = vld [vmem:[%s1942_s30 + $0x28] sm:$0xff]  ;;  %v1551_v11 = vor.u32 %v1639_v4, %v1548_v5  ;;  %v1220_v14 = vld [vmem:[%s1942_s30 + $0x40] sm:$0xff]  ;;  %v1222_v15 = vld [vmem:[%s1942_s30 + $0x50] sm:$0xff] }
  0x22   : > { %748 = vmatpush.bf16.msra.mxu0 %v1645_v17  ;;  %1703 = vmatpush.bf16.msra.mxu2 %v1645_v17  ;;  %v1221_v13 = vld [vmem:[%s1942_s30 + $0x48] sm:$0xff]  ;;  %v1522_v16 = vld [vmem:[%s1907_s17 + $0x30] sm:$0xf]  ;;  %v1634_v17 = vld [vmem:[%s1907_s17 + $0x34] sm:$0xf0] }
  0x23   : > { %797 = vmatpush.bf16.msra.mxu1 %v1653_v18  ;;  %1711 = vmatpush.bf16.msra.mxu3 %v1653_v18  ;;  %v1554_v18 = vld [vmem:[%s1907_s17 + $0x70] sm:$0xf]  ;;  %v1642_v19 = vld [vmem:[%s1907_s17 + $0x74] sm:$0xf0]  ;;  %v1633_v20 = vld [vmem:[%s1907_s17 + $0x34] sm:$0xf]  ;;  %v1523_v26 = vor.u32 %v1634_v17, %v1522_v16 }
  0x24   : > { %v1641_v22 = vld [vmem:[%s1907_s17 + $0x74] sm:$0xf]  ;;  %v1555_v27 = vor.u32 %v1642_v19, %v1554_v18  ;;  %v1225_v30 = vld [vmem:[%s1942_s30 + $0x68] sm:$0xff]  ;;  %v1227_v31 = vld [vmem:[%s1942_s30 + $0x78] sm:$0xff] }
  0x25   : > { %v1226_v32 = vld [vmem:[%s1942_s30 + $0x70] sm:$0xff] }
  0x26   : > { %749 = vmatpush.bf16.msra.mxu0 %v1644_v21  ;;  %1704 = vmatpush.bf16.msra.mxu2 %v1644_v21  ;;  %v1524_v21 = vld [vmem:[%s1907_s17 + $0x38] sm:$0xf0] }
  0x27   : > { %798 = vmatpush.bf16.msra.mxu1 %v1652_v23  ;;  %1712 = vmatpush.bf16.msra.mxu3 %v1652_v23  ;;  %v1556_v23 = vld [vmem:[%s1907_s17 + $0x78] sm:$0xf0]  ;;  %v1527_v28 = vor.u32 %v1633_v20, %v1524_v21  ;;  %v2065_v21 = vld [vmem:[%s2297_s7] ss:$0 sm:$0xff] }
  0x28   : > { %1009 = vperm.xlu1 %1741, %v951_v34   ;;  %v1559_v29 = vor.u32 %v1641_v22, %v1556_v23  ;;  %v1774_v34 = vmov 0.0  }
  0x29   : > { %1004 = vperm.xlu0 %1740, %v950_v35   ;;  %1014 = vperm.xlu2 %1742, %v952_v40   ;;  %487 = vst.msk [vmem:[#allocation2] sm:$0xff] %vm486_vm0, %v1774_v34 }
  0x2a   : > { %750 = vmatpush.bf16.msra.mxu0 %v1643_v24  ;;  %1705 = vmatpush.bf16.msra.mxu2 %v1643_v24  ;;  %v1224_v24 = vld [vmem:[%s1942_s30 + $0x60] sm:$0xff]  ;;  %488 = vst.msk [vmem:[#allocation2 + $0x8] sm:$0xff] %vm486_vm0, %v1774_v34 }
  0x2b   : > { %799 = vmatpush.bf16.msra.mxu1 %v1651_v25  ;;  %1713 = vmatpush.bf16.msra.mxu3 %v1651_v25  ;;  %v1223_v25 = vld [vmem:[%s1942_s30 + $0x58] sm:$0xff]  ;;  %489 = vst.msk [vmem:[#allocation2 + $0x10] sm:$0xff] %vm486_vm0, %v1774_v34 }
  0x2c   : > { %490 = vst.msk [vmem:[#allocation2 + $0x18] sm:$0xff] %vm486_vm0, %v1774_v34 }
  0x2d   : > { %751 = vmatmul.bf16.vlgmr.msra.gmra.mxu0 %v1499_v36  ;;  %771 = vmatmul.bf16.vlgmr.msra.gmra.mxu2 %v1531_v37  ;;  %491 = vst.msk [vmem:[#allocation2 + $0x20] sm:$0xff] %vm486_vm0, %v1774_v34 }
  0x2e   : > { %800 = vmatmul.bf16.vlgmr.msra.gmra.mxu1 %v1503_v38  ;;  %820 = vmatmul.bf16.vlgmr.msra.gmra.mxu3 %v1535_v39  ;;  %492 = vst.msk [vmem:[#allocation2 + $0x28] sm:$0xff] %vm486_vm0, %v1774_v34  ;;  %v1073_v39 = vld [vmem:[%s2298_s8] sm:$0x1] }
  0x2f   : > { %493 = vst.msk [vmem:[#allocation2 + $0x30] sm:$0xff] %vm486_vm0, %v1774_v34 }
  0x30   : > { %1024 = vperm.xlu1 %1741, %v954_v41   ;;  %494 = vst.msk [vmem:[#allocation2 + $0x38] sm:$0xff] %vm486_vm0, %v1774_v34  ;;  %v1074_v41 = vadd.f32 1e-05, %v1073_v39 }
  0x31   : > { %1019 = vperm.xlu0 %1740, %v953_v42   ;;  %1029 = vperm.xlu2 %1742, %v955_v43   ;;  %495 = vst.msk [vmem:[#allocation2 + $0x40] sm:$0xff] %vm486_vm0, %v1774_v34  ;;  %v504_v3 = vld [vmem:[#allocation2 + $0x8] sm:$0xff] }
  0x32   : > { %496 = vst.msk [vmem:[#allocation2 + $0x48] sm:$0xff] %vm486_vm0, %v1774_v34  ;;  %1747 = vrsqrt.f32 %v1074_v41  ;;  %vm1081_vm1 = vweird.f32 %v1074_v41 }
  0x33   : > { %497 = vst.msk [vmem:[#allocation2 + $0x50] sm:$0xff] %vm486_vm0, %v1774_v34 }
  0x34   : > { %498 = vst.msk [vmem:[#allocation2 + $0x58] sm:$0xff] %vm486_vm0, %v1774_v34 }
  0x35   : > { %499 = vst.msk [vmem:[#allocation2 + $0x60] sm:$0xff] %vm486_vm0, %v1774_v34 }
  0x36   : > { %500 = vst.msk [vmem:[#allocation2 + $0x68] sm:$0xff] %vm486_vm0, %v1774_v34 }
  0x37   : > { %501 = vst.msk [vmem:[#allocation2 + $0x70] sm:$0xff] %vm486_vm0, %v1774_v34 }
  0x38   : > { %1230 = vperm.xlu1 %1741, %v1212_v52   ;;  %502 = vst.msk [vmem:[#allocation2 + $0x78] sm:$0xff] %vm486_vm0, %v1774_v34  ;;  %v1748_v45 = vpop.eup %1747  ;;  %v503_v52 = vld [vmem:[#allocation2] sm:$0xff] }
  0x39   : > { %1034 = vperm.xlu0 %1740, %v956_v53   ;;  %1235 = vperm.xlu2 %1742, %v1213_v58   ;;  %v1076_v48 = vmul.f32 %v1748_v45, %v1074_v41  ;;  %v511_v63 = vld [vmem:[#allocation2 + $0x40] sm:$0xff]  ;;  %vm1082_vm2 = vweird.f32 %v1748_v45  ;;  %v512_v19 = vld [vmem:[#allocation2 + $0x48] sm:$0xff] }
  0x3a   : > { %vm2042_vm3 = vmor %vm1081_vm1, %vm1082_vm2 }
  0x3b   : > { %v1077_v50 = vmul.f32 %v1748_v45, %v1076_v48 }
  0x3d   : > { %756 = vmatmul.bf16.gmra.mxu0 %v1507_v54  ;;  %776 = vmatmul.bf16.gmra.mxu2 %v1539_v55 }
  0x3e   : > { %805 = vmatmul.bf16.gmra.mxu1 %v1511_v56  ;;  %825 = vmatmul.bf16.gmra.mxu3 %v1543_v57  ;;  %v1078_v56 = vmul.f32 0.5, %v1077_v50 }
  0x40   : > { %1245 = vperm.xlu1 %1741, %v1215_v59  }
  0x41   : > { %1240 = vperm.xlu0 %1740, %v1214_v60   ;;  %1250 = vperm.xlu2 %1742, %v1216_v61   ;;  %v1660_v60 = vld [vmem:[%s2034_s18] sm:$0xff]   ;;  %v1079_v61 = vsub.f32 1.5, %v1078_v56 }
  0x42   : > { %v1661_v5 = vunpack.c.l.bf16 %v1660_v60 }
  0x48   : > { %1260 = vperm.xlu1 %1741, %v1218_v6  }
  0x49   : > { %1255 = vperm.xlu0 %1740, %v1217_v7   ;;  %1265 = vperm.xlu2 %1742, %v1219_v12  }
  0x4d   : > { %761 = vmatmul.bf16.gmra.mxu0 %v1515_v8  ;;  %781 = vmatmul.bf16.gmra.mxu2 %v1547_v9  ;;  %v1080_v8 = vmul.f32 %v1748_v45, %v1079_v61 }
  0x4e   : > { %810 = vmatmul.bf16.gmra.mxu1 %v1519_v10  ;;  %830 = vmatmul.bf16.gmra.mxu3 %v1551_v11 }
  0x4f   : > { %v1084_v17 = vsel %vm2042_vm3, %v1748_v45, %v1080_v8 }
  0x50   : > { %1275 = vperm.xlu1 %1741, %v1221_v13   ;;  %v2050_v13 = vld [vmem:[%s2034_s18 + $0x20] sm:$0xff]  }
  0x51   : > { %1270 = vperm.xlu0 %1740, %v1220_v14   ;;  %1280 = vperm.xlu2 %1742, %v1222_v15   ;;  %v2055_v14 = vld [vmem:[%s2294_s4] ss:$0 sm:$0xff] }
  0x58   : > { %1290 = vperm.xlu1 %1741, %v1224_v24  }
  0x59   : > { %1285 = vperm.xlu0 %1740, %v1223_v25   ;;  %1295 = vperm.xlu2 %1742, %v1225_v30   ;;  %v1677_v25 = vunpack.c.l.bf16 %v2050_v13  ;;  %v2071_v30 = vperm.slane %v1084_v17, 0 }
  0x5d   : > { %766 = vmatmul.bf16.gmra.mxu0 %v1523_v26  ;;  %786 = vmatmul.bf16.gmra.mxu2 %v1555_v27  ;;  %v1662_v26 = vunpack.c.h.bf16 %v1660_v60  ;;  %v513_v60 = vld [vmem:[#allocation2 + $0x50] sm:$0xff] }
  0x5e   : > { %815 = vmatmul.bf16.gmra.mxu1 %v1527_v28  ;;  %835 = vmatmul.bf16.gmra.mxu3 %v1559_v29  ;;  %v505_v28 = vld [vmem:[#allocation2 + $0x10] sm:$0xff] }
  0x60   : > { %1305 = vperm.xlu1 %1741, %v1227_v31  }
  0x61   : > { %1300 = vperm.xlu0 %1740, %v1226_v32  }
  0x6b   : > { %v1998_v37 = vpop.permute.xlu2 %979 }
  0x73   : > { %v2014_v42 = vpop.permute.xlu2 %984 }
  0x7b   : > { %v2020_v46 = vpop.permute.xlu2 %999 }
  0x82   : > { %v1986_v35 = vpop.permute.xlu1 %969 }
  0x83   : > { %v1983_v33 = vpop.permute.xlu0 %959  ;;  %v2027_v55 = vpop.permute.xlu2 %1014 }
  0x8a   : > { %v2002_v38 = vpop.permute.xlu1 %974 }
  0x8b   : > { %v1995_v36 = vpop.permute.xlu0 %964  ;;  %v2047_v11 = vpop.permute.xlu2 %1029 }
  0x92   : > { %v2016_v43 = vpop.permute.xlu1 %994 }
  0x93   : > { %v2012_v40 = vpop.permute.xlu0 %989 }
  0x9a   : > { %v2022_v47 = vpop.permute.xlu1 %1009 }
  0x9b   : > { %v2018_v44 = vpop.permute.xlu0 %1004 }
  0xa2   : > { %v2036_v58 = vpop.permute.xlu1 %1024 }
  0xa3   : > { %v2024_v49 = vpop.permute.xlu0 %1019 }
  0xaa   : > { %v752_v51 = vpop.f32.mrf.mxu0  ;;  %v2060_v18 = vpop.permute.xlu1 %1230 }
  0xab   : > { %v801_v53 = vpop.f32.mrf.mxu1  ;;  %v2040_v62 = vpop.permute.xlu0 %1034 }
  0xac   : > { %v802_v54 = vadd.f32 %v801_v53, %v752_v51  ;;  %v2084_v51 = vld [vmem:[%s2296_s6] ss:$0 sm:$0xff] }
  0xae   : > { %v841_v57 = vadd.f32 %v802_v54, %v503_v52  ;;  %v2089_v54 = vld [vmem:[%s2034_s18 + $0x8] sm:$0xff]  }
  0xb0   : > { %858 = vst.msk [vmem:[#allocation2] sm:$0xff] %vm486_vm0, %v841_v57  ;;  %v772_v59 = vpop.f32.mrf.mxu2 }
  0xb1   : > { %v821_v0 = vpop.f32.mrf.mxu3 }
  0xb2   : > { %v822_v1 = vadd.f32 %v821_v0, %v772_v59  ;;  %v754_v2 = vpop.f32.mrf.mxu0  ;;  %v2092_v59 = vpop.permute.xlu2 %1235 }
  0xb3   : > { %v803_v4 = vpop.f32.mrf.mxu1  ;;  %v2069_v27 = vpop.permute.xlu0 %1240 }
  0xb4   : > { %v849_v6 = vadd.f32 %v822_v1, %v511_v63  ;;  %v804_v7 = vadd.f32 %v803_v4, %v754_v2  ;;  %v2097_v4 = vpop.permute.xlu1 %1245 }
  0xb6   : > { %866 = vst.msk [vmem:[#allocation2 + $0x40] sm:$0xff] %vm486_vm0, %v849_v6  ;;  %v842_v10 = vadd.f32 %v804_v7, %v504_v3  ;;  %v506_v6 = vld [vmem:[#allocation2 + $0x18] sm:$0xff] }
  0xb7   : > { %v877_v12 = vld [vmem:[#allocation2] sm:$0xff] }
  0xb8   : > { %v925_v15 = vadd.f32 %v1661_v5, %v877_v12  ;;  %859 = vst.msk [vmem:[#allocation2 + $0x8] sm:$0xff] %vm486_vm0, %v842_v10  ;;  %v774_v16 = vpop.f32.mrf.mxu2  ;;  %v1665_v5 = vunpack.c.l.bf16 %v2089_v54 }
  0xb9   : > { %v823_v20 = vpop.f32.mrf.mxu3 }
  0xba   : > { %v1037_v22 = vmul.f32 %v1983_v33, %v925_v15  ;;  %v824_v23 = vadd.f32 %v823_v20, %v774_v16  ;;  %v757_v24 = vpop.f32.mrf.mxu0  ;;  %v2077_v33 = vld [vmem:[%s2295_s5] ss:$0 sm:$0xff] }
  0xbb   : > { %v806_v29 = vpop.f32.mrf.mxu1 }
  0xbc   : > { %v1057_v31 = vadd.f32 %v2055_v14, %v1037_v22  ;;  %v850_v32 = vadd.f32 %v824_v23, %v512_v19  ;;  %v807_v34 = vadd.f32 %v806_v29, %v757_v24  ;;  %v2110_v24 = vld [vmem:[%s2034_s18 + $0x28] sm:$0xff]  }
  0xbd   : > { %v885_v39 = vld [vmem:[#allocation2 + $0x40] sm:$0xff] }
  0xbe   : > { %v1089_v41 = vsub.f32 %v1057_v31, %v2065_v21  ;;  %867 = vst.msk [vmem:[#allocation2 + $0x48] sm:$0xff] %vm486_vm0, %v850_v32  ;;  %v843_v45 = vadd.f32 %v807_v34, %v505_v28  ;;  %v933_v48 = vadd.f32 %v1677_v25, %v885_v39  ;;  %v514_v39 = vld [vmem:[#allocation2 + $0x58] sm:$0xff] }
  0xbf   : > { %v878_v50 = vld [vmem:[#allocation2 + $0x8] sm:$0xff] }
  0xc0   : > { %v1108_v52 = vmul.f32 %v2071_v30, %v1089_v41  ;;  %v926_v53 = vadd.f32 %v1662_v26, %v878_v50  ;;  %860 = vst.msk [vmem:[#allocation2 + $0x10] sm:$0xff] %vm486_vm0, %v843_v45  ;;  %v777_v56 = vpop.f32.mrf.mxu2  ;;  %v1045_v57 = vmul.f32 %v2020_v46, %v933_v48  ;;  %v1678_v46 = vunpack.c.h.bf16 %v2050_v13 }
  0xc1   : > { %v826_v61 = vpop.f32.mrf.mxu3 }
  0xc2   : > { %v1128_v63 = vmul.f32 %v2077_v33, %v1108_v52  ;;  %v1038_v0 = vmul.f32 %v1995_v36, %v926_v53  ;;  %v827_v1 = vadd.f32 %v826_v61, %v777_v56  ;;  %v759_v2 = vpop.f32.mrf.mxu0  ;;  %v1065_v3 = vadd.f32 %v2055_v14, %v1045_v57  ;;  %v2103_v36 = vpop.permute.xlu0 %1255  ;;  %v507_v61 = vld [vmem:[#allocation2 + $0x20] sm:$0xff] }
  0xc3   : > { %v808_v7 = vpop.f32.mrf.mxu1  ;;  %v1666_v56 = vunpack.c.h.bf16 %v2089_v54 }
  0xc4   : > { %v1148_v8 = vadd.f32 %v2084_v51, %v1128_v63  ;;  %v1058_v9 = vadd.f32 %v2055_v14, %v1038_v0  ;;  %v851_v10 = vadd.f32 %v827_v1, %v513_v60  ;;  %v809_v12 = vadd.f32 %v808_v7, %v759_v2 }
  0xc5   : > { %v886_v15 = vld [vmem:[#allocation2 + $0x48] sm:$0xff]  ;;  %v1097_v16 = vsub.f32 %v1065_v3, %v2065_v21  ;;  %v2136_v3 = vpop.permute.xlu1 %1260 }
  0xc6   : > { %vm1164_vm4 = vcmp.ge.f32.partialorder %v1148_v8, 0.0  ;;  %v1180_v17 = vmul.f32 0.01, %v1148_v8  ;;  %v1090_v19 = vsub.f32 %v1058_v9, %v2065_v21  ;;  %868 = vst.msk [vmem:[#allocation2 + $0x50] sm:$0xff] %vm486_vm0, %v851_v10  ;;  %v844_v20 = vadd.f32 %v809_v12, %v506_v6 }
  0xc7   : > { %v879_v13 = vld [vmem:[#allocation2 + $0x10] sm:$0xff]  ;;  %v934_v22 = vadd.f32 %v1678_v46, %v886_v15  ;;  %v1116_v23 = vmul.f32 %v2071_v30, %v1097_v16 }
  0xc8   : > { %v1196_v25 = vsel %vm1164_vm4, %v1148_v8, %v1180_v17  ;;  %v1109_v26 = vmul.f32 %v2071_v30, %v1090_v19  ;;  %v927_v28 = vadd.f32 %v1665_v5, %v879_v13  ;;  %861 = vst.msk [vmem:[#allocation2 + $0x18] sm:$0xff] %vm486_vm0, %v844_v20  ;;  %v779_v29 = vpop.f32.mrf.mxu2 }
  0xc9   : > { %v1308_v31 = vmul.f32 %v2060_v18, %v1196_v25  ;;  %v1046_v32 = vmul.f32 %v2018_v44, %v934_v22  ;;  %v1136_v34 = vmul.f32 %v2077_v33, %v1116_v23  ;;  %v828_v41 = vpop.f32.mrf.mxu3  ;;  %v1681_v18 = vunpack.c.l.bf16 %v2110_v24  ;;  %v2127_v44 = vpop.permute.xlu2 %1250  ;;  %v2145_v22 = vld [vmem:[%s2034_s18 + $0x10] sm:$0xff]  }
  0xca   : > { %v1129_v45 = vmul.f32 %v2077_v33, %v1109_v26  ;;  %v1039_v48 = vmul.f32 %v1986_v35, %v927_v28  ;;  %v829_v50 = vadd.f32 %v828_v41, %v779_v29  ;;  %v762_v52 = vpop.f32.mrf.mxu0  ;;  %v1271_v12 = vpop.permute.xlu0 %1270  ;;  %v1682_v28 = vunpack.c.h.bf16 %v2110_v24 }
  0xcb   : > { %v1324_v53 = vpack.c.bf16 %v1308_v31, %v1308_v31  ;;  %v1066_v57 = vadd.f32 %v2055_v14, %v1046_v32  ;;  %v1156_v60 = vadd.f32 %v2084_v51, %v1136_v34  ;;  %v811_v63 = vpop.f32.mrf.mxu1  ;;  %v515_v31 = vld [vmem:[#allocation2 + $0x60] sm:$0xff] }
  0xcc   : > { %v1149_v0 = vadd.f32 %v2084_v51, %v1129_v45  ;;  %v1059_v1 = vadd.f32 %v2055_v14, %v1039_v48  ;;  %v852_v35 = vadd.f32 %v829_v50, %v514_v39  ;;  %v812_v2 = vadd.f32 %v811_v63, %v762_v52 }
  0xcd   : > { %1341 = vst.msk [vmem:[%s2122_s26] sm:$0xf] %vm1340_vm5, %v1324_v53  ;;  %v1098_v5 = vsub.f32 %v1066_v57, %v2065_v21  ;;  %vm1172_vm6 = vcmp.ge.f32.partialorder %v1156_v60, 0.0  ;;  %v1188_v54 = vmul.f32 0.01, %v1156_v60  ;;  %v887_v6 = vld [vmem:[#allocation2 + $0x50] sm:$0xff]  ;;  %v1669_v52 = vunpack.c.l.bf16 %v2145_v22 }
  0xce   : > { %vm1165_vm7 = vcmp.ge.f32.partialorder %v1149_v0, 0.0  ;;  %v1181_v7 = vmul.f32 0.01, %v1149_v0  ;;  %v1091_v46 = vsub.f32 %v1059_v1, %v2065_v21  ;;  %869 = vst.msk [vmem:[#allocation2 + $0x58] sm:$0xff] %vm486_vm0, %v852_v35  ;;  %v845_v8 = vadd.f32 %v812_v2, %v507_v61 }
  0xcf   : > { %v880_v9 = vld [vmem:[#allocation2 + $0x18] sm:$0xff]  ;;  %v1117_v10 = vmul.f32 %v2071_v30, %v1098_v5  ;;  %v1204_v15 = vsel %vm1172_vm6, %v1156_v60, %v1188_v54  ;;  %v935_v16 = vadd.f32 %v1681_v18, %v887_v6  ;;  %v2168_v5 = vld [vmem:[%s2034_s18 + $0x30] sm:$0xff]   ;;  %v1276_v54 = vpop.permute.xlu1 %1275 }
  0xd0   : > { %v1197_v17 = vsel %vm1165_vm7, %v1149_v0, %v1181_v7  ;;  %v1110_v19 = vmul.f32 %v2071_v30, %v1091_v46  ;;  %v928_v20 = vadd.f32 %v1666_v56, %v880_v9  ;;  %v1316_v13 = vmul.f32 %v1271_v12, %v1204_v15  ;;  %862 = vst.msk [vmem:[#allocation2 + $0x20] sm:$0xff] %vm486_vm0, %v845_v8  ;;  %v782_v23 = vpop.f32.mrf.mxu2  ;;  %v508_v56 = vld [vmem:[#allocation2 + $0x28] sm:$0xff] }
  0xd1   : > { %v1309_v25 = vmul.f32 %v2092_v59, %v1197_v17  ;;  %v1137_v26 = vmul.f32 %v2077_v33, %v1117_v10  ;;  %v1047_v29 = vmul.f32 %v2022_v47, %v935_v16  ;;  %v831_v32 = vpop.f32.mrf.mxu3  ;;  %v2160_v60 = vpop.permute.xlu2 %1265 }
  0xd2   : > { %v1130_v34 = vmul.f32 %v2077_v33, %v1110_v19  ;;  %v1040_v39 = vmul.f32 %v2002_v38, %v928_v20  ;;  %v1332_v41 = vpack.c.bf16 %v1316_v13, %v1316_v13  ;;  %v832_v45 = vadd.f32 %v831_v32, %v782_v23  ;;  %v764_v48 = vpop.f32.mrf.mxu0  ;;  %v516_v23 = vld [vmem:[#allocation2 + $0x68] sm:$0xff] }
  0xd3   : > { %v1325_v50 = vpack.c.bf16 %v1309_v25, %v1309_v25  ;;  %v1157_v59 = vadd.f32 %v2084_v51, %v1137_v26  ;;  %v1067_v24 = vadd.f32 %v2055_v14, %v1047_v29  ;;  %v813_v18 = vpop.f32.mrf.mxu1  ;;  %v1685_v13 = vunpack.c.l.bf16 %v2168_v5 }
  0xd4   : > { %v1150_v47 = vadd.f32 %v2084_v51, %v1130_v34  ;;  %v1060_v53 = vadd.f32 %v2055_v14, %v1040_v39  ;;  %1349 = vst.msk [vmem:[%s2122_s26 + $0x20] sm:$0xf] %vm1340_vm5, %v1332_v41  ;;  %v853_v38 = vadd.f32 %v832_v45, %v515_v31  ;;  %v814_v57 = vadd.f32 %v813_v18, %v764_v48 }
  0xd5   : > { %1342 = vst.msk [vmem:[%s2122_s26 + $0x4] sm:$0xf] %vm1340_vm5, %v1325_v50  ;;  %vm1173_vm8 = vcmp.ge.f32.partialorder %v1157_v59, 0.0  ;;  %v1189_v61 = vmul.f32 0.01, %v1157_v59  ;;  %v888_v63 = vld [vmem:[#allocation2 + $0x58] sm:$0xff]  ;;  %v1099_v0 = vsub.f32 %v1067_v24, %v2065_v21  ;;  %v1670_v18 = vunpack.c.h.bf16 %v2145_v22 }
  0xd6   : > { %vm1166_vm9 = vcmp.ge.f32.partialorder %v1150_v47, 0.0  ;;  %v1182_v1 = vmul.f32 0.01, %v1150_v47  ;;  %v1092_v35 = vsub.f32 %v1060_v53, %v2065_v21  ;;  %v936_v2 = vadd.f32 %v1682_v28, %v888_v63  ;;  %870 = vst.msk [vmem:[#allocation2 + $0x60] sm:$0xff] %vm486_vm0, %v853_v38  ;;  %v509_v50 = vld [vmem:[#allocation2 + $0x30] sm:$0xff] }
  0xd7   : > { %v1205_v6 = vsel %vm1173_vm8, %v1157_v59, %v1189_v61  ;;  %v881_v7 = vld [vmem:[#allocation2 + $0x20] sm:$0xff]  ;;  %v1118_v46 = vmul.f32 %v2071_v30, %v1099_v0  ;;  %v846_v8 = vadd.f32 %v814_v57, %v508_v56 }
  0xd8   : > { %v1198_v9 = vsel %vm1166_vm9, %v1150_v47, %v1182_v1  ;;  %v1111_v10 = vmul.f32 %v2071_v30, %v1092_v35  ;;  %v1317_v12 = vmul.f32 %v1276_v54, %v1205_v6  ;;  %v929_v15 = vadd.f32 %v1669_v52, %v881_v7  ;;  %v784_v16 = vpop.f32.mrf.mxu2 }
  0xd9   : > { %v1310_v17 = vmul.f32 %v2069_v27, %v1198_v9  ;;  %v1048_v19 = vmul.f32 %v2027_v55, %v936_v2  ;;  %v1138_v20 = vmul.f32 %v2077_v33, %v1118_v46  ;;  %863 = vst.msk [vmem:[#allocation2 + $0x28] sm:$0xff] %vm486_vm0, %v846_v8  ;;  %v833_v25 = vpop.f32.mrf.mxu3  ;;  %v1281_v56 = vpop.permute.xlu2 %1280  ;;  %v1686_v8 = vunpack.c.h.bf16 %v2168_v5  ;;  %v517_v9 = vld [vmem:[#allocation2 + $0x70] sm:$0xff] }
  0xda   : > { %v1131_v26 = vmul.f32 %v2077_v33, %v1111_v10  ;;  %v1333_v28 = vpack.c.bf16 %v1317_v12, %v1317_v12  ;;  %v1041_v29 = vmul.f32 %v1998_v37, %v929_v15  ;;  %v834_v31 = vadd.f32 %v833_v25, %v784_v16  ;;  %v767_v32 = vpop.f32.mrf.mxu0  ;;  %v2201_v16 = vld [vmem:[%s2034_s18 + $0x18] sm:$0xff]  }
  0xdb   : > { %v1326_v27 = vpack.c.bf16 %v1310_v17, %v1310_v17  ;;  %v1068_v55 = vadd.f32 %v2055_v14, %v1048_v19  ;;  %v1158_v34 = vadd.f32 %v2084_v51, %v1138_v20  ;;  %v816_v39 = vpop.f32.mrf.mxu1 }
  0xdc   : > { %v1151_v41 = vadd.f32 %v2084_v51, %v1131_v26  ;;  %1350 = vst.msk [vmem:[%s2122_s26 + $0x24] sm:$0xf] %vm1340_vm5, %v1333_v28  ;;  %v1061_v45 = vadd.f32 %v2055_v14, %v1041_v29  ;;  %v854_v48 = vadd.f32 %v834_v31, %v516_v23  ;;  %v817_v59 = vadd.f32 %v816_v39, %v767_v32  ;;  %v510_v28 = vld [vmem:[#allocation2 + $0x38] sm:$0xff] }
  0xdd   : > { %1343 = vst.msk [vmem:[%s2122_s26 + $0x8] sm:$0xf] %vm1340_vm5, %v1326_v27  ;;  %v1100_v37 = vsub.f32 %v1068_v55, %v2065_v21  ;;  %vm1174_vm10 = vcmp.ge.f32.partialorder %v1158_v34, 0.0  ;;  %v1190_v52 = vmul.f32 0.01, %v1158_v34  ;;  %v889_v24 = vld [vmem:[#allocation2 + $0x60] sm:$0xff] }
  0xde   : > { %vm1167_vm11 = vcmp.ge.f32.partialorder %v1151_v41, 0.0  ;;  %v1183_v47 = vmul.f32 0.01, %v1151_v41  ;;  %v1093_v53 = vsub.f32 %v1061_v45, %v2065_v21  ;;  %v937_v38 = vadd.f32 %v1685_v13, %v889_v24  ;;  %871 = vst.msk [vmem:[#allocation2 + $0x68] sm:$0xff] %vm486_vm0, %v854_v48  ;;  %v1286_v45 = vpop.permute.xlu0 %1285 }
  0xdf   : > { %v1119_v57 = vmul.f32 %v2071_v30, %v1100_v37  ;;  %v1206_v61 = vsel %vm1174_vm10, %v1158_v34, %v1190_v52  ;;  %v847_v63 = vadd.f32 %v817_v59, %v509_v50 }
  0xe0   : > { %v1199_v0 = vsel %vm1167_vm11, %v1151_v41, %v1183_v47  ;;  %v1112_v1 = vmul.f32 %v2071_v30, %v1093_v53  ;;  %v1318_v35 = vmul.f32 %v1281_v56, %v1206_v61  ;;  %v1049_v2 = vmul.f32 %v2024_v49, %v937_v38  ;;  %v882_v22 = vld [vmem:[#allocation2 + $0x28] sm:$0xff]  ;;  %v787_v54 = vpop.f32.mrf.mxu2  ;;  %v2216_v41 = vld [vmem:[%s2034_s18 + $0x38] sm:$0xff]  }
  0xe1   : > { %v1311_v6 = vmul.f32 %v2097_v4, %v1199_v0  ;;  %v1139_v7 = vmul.f32 %v2077_v33, %v1119_v57  ;;  %v930_v46 = vadd.f32 %v1670_v18, %v882_v22  ;;  %864 = vst.msk [vmem:[#allocation2 + $0x30] sm:$0xff] %vm486_vm0, %v847_v63  ;;  %v836_v10 = vpop.f32.mrf.mxu3  ;;  %v1689_v61 = vunpack.c.l.bf16 %v2216_v41  ;;  %v518_v63 = vld [vmem:[#allocation2 + $0x78] sm:$0xff] }
  0xe2   : > { %v1132_v12 = vmul.f32 %v2077_v33, %v1112_v1  ;;  %v1334_v15 = vpack.c.bf16 %v1318_v35, %v1318_v35  ;;  %v1069_v49 = vadd.f32 %v2055_v14, %v1049_v2  ;;  %v837_v17 = vadd.f32 %v836_v10, %v787_v54  ;;  %v769_v4 = vpop.f32.mrf.mxu0 }
  0xe3   : > { %v1327_v19 = vpack.c.bf16 %v1311_v6, %v1311_v6  ;;  %v1159_v20 = vadd.f32 %v2084_v51, %v1139_v7  ;;  %v1042_v13 = vmul.f32 %v2014_v42, %v930_v46  ;;  %v818_v5 = vpop.f32.mrf.mxu1  ;;  %v1673_v42 = vunpack.c.l.bf16 %v2201_v16 }
  0xe4   : > { %v1152_v23 = vadd.f32 %v2084_v51, %v1132_v12  ;;  %1351 = vst.msk [vmem:[%s2122_s26 + $0x28] sm:$0xf] %vm1340_vm5, %v1334_v15  ;;  %v1101_v25 = vsub.f32 %v1069_v49, %v2065_v21  ;;  %v855_v26 = vadd.f32 %v837_v17, %v517_v9  ;;  %v819_v29 = vadd.f32 %v818_v5, %v769_v4  ;;  %v1291_v15 = vpop.permute.xlu1 %1290 }
  0xe5   : > { %1344 = vst.msk [vmem:[%s2122_s26 + $0xc] sm:$0xf] %vm1340_vm5, %v1327_v19  ;;  %vm1175_vm12 = vcmp.ge.f32.partialorder %v1159_v20, 0.0  ;;  %v1191_v31 = vmul.f32 0.01, %v1159_v20  ;;  %v1062_v32 = vadd.f32 %v2055_v14, %v1042_v13  ;;  %v890_v27 = vld [vmem:[#allocation2 + $0x68] sm:$0xff]  ;;  %v1674_v12 = vunpack.c.h.bf16 %v2201_v16 }
  0xe6   : > { %vm1168_vm13 = vcmp.ge.f32.partialorder %v1152_v23, 0.0  ;;  %v1184_v55 = vmul.f32 0.01, %v1152_v23  ;;  %v1120_v34 = vmul.f32 %v2071_v30, %v1101_v25  ;;  %v938_v39 = vadd.f32 %v1686_v8, %v890_v27  ;;  %872 = vst.msk [vmem:[#allocation2 + $0x70] sm:$0xff] %vm486_vm0, %v855_v26 }
  0xe7   : > { %v1207_v48 = vsel %vm1175_vm12, %v1159_v20, %v1191_v31  ;;  %v1094_v50 = vsub.f32 %v1062_v32, %v2065_v21  ;;  %v848_v59 = vadd.f32 %v819_v29, %v510_v28  ;;  %v1690_v27 = vunpack.c.h.bf16 %v2216_v41 }
  0xe8   : > { %v1200_v37 = vsel %vm1168_vm13, %v1152_v23, %v1184_v55  ;;  %v1319_v52 = vmul.f32 %v1286_v45, %v1207_v48  ;;  %v1140_v24 = vmul.f32 %v2077_v33, %v1120_v34  ;;  %v1050_v18 = vmul.f32 %v2036_v58, %v938_v39  ;;  %v883_v47 = vld [vmem:[#allocation2 + $0x30] sm:$0xff]  ;;  %v789_v53 = vpop.f32.mrf.mxu2 }
  0xe9   : > { %v1312_v38 = vmul.f32 %v2127_v44, %v1200_v37  ;;  %v1113_v56 = vmul.f32 %v2071_v30, %v1094_v50  ;;  %v931_v57 = vadd.f32 %v1673_v42, %v883_v47  ;;  %865 = vst.msk [vmem:[#allocation2 + $0x38] sm:$0xff] %vm486_vm0, %v848_v59  ;;  %v838_v0 = vpop.f32.mrf.mxu3  ;;  %v1296_v50 = vpop.permute.xlu2 %1295 }
  0xea   : > { %v1335_v1 = vpack.c.bf16 %v1319_v52, %v1319_v52  ;;  %v1160_v35 = vadd.f32 %v2084_v51, %v1140_v24  ;;  %v1070_v58 = vadd.f32 %v2055_v14, %v1050_v18  ;;  %v839_v2 = vadd.f32 %v838_v0, %v789_v53 }
  0xeb   : > { %v1328_v22 = vpack.c.bf16 %v1312_v38, %v1312_v38  ;;  %v1133_v54 = vmul.f32 %v2077_v33, %v1113_v56  ;;  %v1043_v44 = vmul.f32 %v2012_v40, %v931_v57 }
  0xec   : > { %1352 = vst.msk [vmem:[%s2122_s26 + $0x2c] sm:$0xf] %vm1340_vm5, %v1335_v1  ;;  %vm1176_vm14 = vcmp.ge.f32.partialorder %v1160_v35, 0.0  ;;  %v1192_v6 = vmul.f32 0.01, %v1160_v35  ;;  %v1102_v7 = vsub.f32 %v1070_v58, %v2065_v21  ;;  %v856_v46 = vadd.f32 %v839_v2, %v518_v63  ;;  %v1301_v2 = vpop.permute.xlu0 %1300 }
  0xed   : > { %1345 = vst.msk [vmem:[%s2122_s26 + $0x10] sm:$0xf] %vm1340_vm5, %v1328_v22  ;;  %v1153_v8 = vadd.f32 %v2084_v51, %v1133_v54  ;;  %v1063_v9 = vadd.f32 %v2055_v14, %v1043_v44  ;;  %v891_v10 = vld [vmem:[#allocation2 + $0x70] sm:$0xff] }
  0xee   : > { %v1208_v49 = vsel %vm1176_vm14, %v1160_v35, %v1192_v6  ;;  %v1121_v40 = vmul.f32 %v2071_v30, %v1102_v7  ;;  %v939_v17 = vadd.f32 %v1689_v61, %v891_v10  ;;  %873 = vst.msk [vmem:[#allocation2 + $0x78] sm:$0xff] %vm486_vm0, %v856_v46  ;;  %v1306_v10 = vpop.permute.xlu1 %1305 }
  0xef   : > { %v1320_v4 = vmul.f32 %v1291_v15, %v1208_v49  ;;  %vm1169_vm15 = vcmp.ge.f32.partialorder %v1153_v8, 0.0  ;;  %v1185_v19 = vmul.f32 0.01, %v1153_v8  ;;  %v1095_v20 = vsub.f32 %v1063_v9, %v2065_v21 }
  0xf0   : > { %v1141_v13 = vmul.f32 %v2077_v33, %v1121_v40  ;;  %v1051_v5 = vmul.f32 %v2047_v11, %v939_v17  ;;  %v884_v23 = vld [vmem:[#allocation2 + $0x38] sm:$0xff] }
  0xf1   : > { %v1336_v25 = vpack.c.bf16 %v1320_v4, %v1320_v4  ;;  %v1201_v16 = vsel %vm1169_vm15, %v1153_v8, %v1185_v19  ;;  %v1114_v26 = vmul.f32 %v2071_v30, %v1095_v20  ;;  %v932_v28 = vadd.f32 %v1674_v12, %v884_v23 }
  0xf2   : > { %v1313_v29 = vmul.f32 %v2103_v36, %v1201_v16  ;;  %v1161_v31 = vadd.f32 %v2084_v51, %v1141_v13  ;;  %v1071_v32 = vadd.f32 %v2055_v14, %v1051_v5 }
  0xf3   : > { %1353 = vst.msk [vmem:[%s2122_s26 + $0x30] sm:$0xf] %vm1340_vm5, %v1336_v25  ;;  %v1134_v42 = vmul.f32 %v2077_v33, %v1114_v26  ;;  %v1044_v11 = vmul.f32 %v2016_v43, %v932_v28 }
  0xf4   : > { %v1329_v55 = vpack.c.bf16 %v1313_v29, %v1313_v29  ;;  %vm1177_vm0 = vcmp.ge.f32.partialorder %v1161_v31, 0.0  ;;  %v1193_v34 = vmul.f32 0.01, %v1161_v31  ;;  %v1103_v39 = vsub.f32 %v1071_v32, %v2065_v21 }
  0xf5   : > { %v1154_v45 = vadd.f32 %v2084_v51, %v1134_v42  ;;  %v1064_v36 = vadd.f32 %v2055_v14, %v1044_v11  ;;  %v892_v48 = vld [vmem:[#allocation2 + $0x78] sm:$0xff] }
  0xf6   : > { %1346 = vst.msk [vmem:[%s2122_s26 + $0x14] sm:$0xf] %vm1340_vm5, %v1329_v55  ;;  %v1209_v41 = vsel %vm1177_vm0, %v1161_v31, %v1193_v34  ;;  %v1122_v59 = vmul.f32 %v2071_v30, %v1103_v39  ;;  %v940_v37 = vadd.f32 %v1690_v27, %v892_v48 }
  0xf7   : > { %v1321_v52 = vmul.f32 %v1296_v50, %v1209_v41  ;;  %vm1170_vm1 = vcmp.ge.f32.partialorder %v1154_v45, 0.0  ;;  %v1186_v43 = vmul.f32 0.01, %v1154_v45  ;;  %v1096_v24 = vsub.f32 %v1064_v36, %v2065_v21 }
  0xf8   : > { %v1142_v18 = vmul.f32 %v2077_v33, %v1122_v59  ;;  %v1052_v47 = vmul.f32 %v2040_v62, %v940_v37 }
  0xf9   : > { %v1337_v53 = vpack.c.bf16 %v1321_v52, %v1321_v52  ;;  %v1202_v38 = vsel %vm1170_vm1, %v1154_v45, %v1186_v43  ;;  %v1115_v56 = vmul.f32 %v2071_v30, %v1096_v24 }
  0xfa   : > { %v1314_v57 = vmul.f32 %v2136_v3, %v1202_v38  ;;  %v1162_v61 = vadd.f32 %v2084_v51, %v1142_v18  ;;  %v1072_v63 = vadd.f32 %v2055_v14, %v1052_v47 }
  0xfb   : > { %1354 = vst.msk [vmem:[%s2122_s26 + $0x34] sm:$0xf] %vm1340_vm5, %v1337_v53  ;;  %v1135_v0 = vmul.f32 %v2077_v33, %v1115_v56 }
  0xfc   : > { %v1330_v1 = vpack.c.bf16 %v1314_v57, %v1314_v57  ;;  %vm1178_vm2 = vcmp.ge.f32.partialorder %v1162_v61, 0.0  ;;  %v1194_v35 = vmul.f32 0.01, %v1162_v61  ;;  %v1104_v62 = vsub.f32 %v1072_v63, %v2065_v21 }
  0xfd   : > { %v1155_v58 = vadd.f32 %v2084_v51, %v1135_v0 }
  0xfe   : > { %1347 = vst.msk [vmem:[%s2122_s26 + $0x18] sm:$0xf] %vm1340_vm5, %v1330_v1  ;;  %v1210_v3 = vsel %vm1178_vm2, %v1162_v61, %v1194_v35  ;;  %v1123_v22 = vmul.f32 %v2071_v30, %v1104_v62 }
  0xff   : > { %v1322_v14 = vmul.f32 %v1301_v2, %v1210_v3  ;;  %vm1171_vm3 = vcmp.ge.f32.partialorder %v1155_v58, 0.0  ;;  %v1187_v54 = vmul.f32 0.01, %v1155_v58 }
 0x100   : > { %v1143_v44 = vmul.f32 %v2077_v33, %v1123_v22 }
 0x101   : > { %v1338_v6 = vpack.c.bf16 %v1322_v14, %v1322_v14  ;;  %v1203_v7 = vsel %vm1171_vm3, %v1155_v58, %v1187_v54 }
 0x102   : > { %v1315_v46 = vmul.f32 %v2160_v60, %v1203_v7  ;;  %v1163_v21 = vadd.f32 %v2084_v51, %v1143_v44 }
 0x103   : > { %1355 = vst.msk [vmem:[%s2122_s26 + $0x38] sm:$0xf] %vm1340_vm5, %v1338_v6 }
 0x104   : > { %v1331_v8 = vpack.c.bf16 %v1315_v46, %v1315_v46  ;;  %vm1179_vm4 = vcmp.ge.f32.partialorder %v1163_v21, 0.0  ;;  %v1195_v9 = vmul.f32 0.01, %v1163_v21 }
 0x106   : > { %1348 = vst.msk [vmem:[%s2122_s26 + $0x1c] sm:$0xf] %vm1340_vm5, %v1331_v8  ;;  %v1211_v30 = vsel %vm1179_vm4, %v1163_v21, %v1195_v9 }
 0x107   : > { %v1323_v12 = vmul.f32 %v1306_v10, %v1211_v30 }
 0x109   : > { %v1339_v15 = vpack.c.bf16 %v1323_v12, %v1323_v12 }
 0x10b   : > { %1356 = vst.msk [vmem:[%s2122_s26 + $0x3c] sm:$0xf] %vm1340_vm5, %v1339_v15 }
 0x10c PF: > { %s20_s15 = sadd.s32 1, %s1771_s15   ;;  %s2303_s13 = smov %s1767_s14 }
 0x10d   : > { %p17_p5 = scmp.ge.s32.totalorder %s20_s15, 4   ;;  %s2304_s14 = smov %s2306_s16 }
 0x10f   :  { %19 = sbr.rel (!%p17_p5) target bundleno = 2 (0x2), region = 110 }

// kernel: seal_forward.14
= control target key start
LH: loop header
LB: loop body
LE: loop exit
PB: predicated region body
PF: predicated region fallthrough
CT: control target
= control target key end

     0   :  { %s1541_s21 = smov 0   ;;  %s1543_s22 = smov 0   ;;  %s1871_s0 = inlined_call_operand.vmem [shape: bf16[256,256], index: 0, kind: input, shape index: {}]   ;;  %s1872_s1 = inlined_call_operand.vmem [shape: bf16[256,8], index: 1, kind: input, shape index: {}, may-alias: {1,2}]   ;;  %s1873_s2 = inlined_call_operand.vmem [shape: bf16[256,8], index: 2, kind: input, shape index: {}, may-alias: {1,2}]   ;;  %s1874_s3 = inlined_call_operand.vmem [shape: f32[256,1], index: 3, kind: input, shape index: {}]   ;;  %s1875_s4 = inlined_call_operand.vmem [shape: f32[1,8], index: 4, kind: input, shape index: {}]   ;;  %s1876_s5 = inlined_call_operand.vmem [shape: f32[256,1], index: 5, kind: input, shape index: {}]   ;;  %s1877_s6 = inlined_call_operand.vmem [shape: f32[256,8], index: 6, kind: output, shape index: {}]  }
   0x1   :  { %s1545_s23 = smov 0  }
   0x2 LB: > { %s28_s24 = sadd.s32 1, %s1498_s22  ;;  %p1220_p0 = scmp.ge.s32.totalorder %s1502_s23, 1  ;;  %s1502_s23 = sphi %s1545_s23, %s16_s23   ;;  %s1498_s22 = sphi %s1543_s22, %s1879_s22   ;;  %s1494_s21 = sphi %s1541_s21, %s1878_s21  }
   0x3   : > { %p30_p1 = scmp.ge.s32.totalorder %s28_s24, 2  ;;  %p277_p2 = scmp.lt.s32.totalorder %s1502_s23, 3 }
   0x5   : > { %s1881_s24 = smov (%p30_p1, %s28_s24), 0  ;;  %p278_p3 = pnand %p1220_p0, %p277_p2 }
   0x6   : > { %s1221_s29 = sshll.u32 (!%p278_p3), %s1494_s21, 4 }
   0x7   : > { %281 = sbr.rel (%p278_p3) target bundleno = 256 (0x100), region = 44  ;;  %p334_p4 = scmp.lt.s32.totalorder (!%p278_p3), %s1221_s29, 31 }
   0xc   : > { %v1386_v0 = vld [vmem:[%s1872_s1 + $0x38] sm:$0xff]  ;;  %v1504_v2 = vmov 0   ;;  %v1385_v3 = vld [vmem:[%s1872_s1 + $0x30] sm:$0xff]  ;;  %s1883_s29 = smov (!%p334_p4, %s1221_s29), 31  ;;  %v1384_v5 = vld [vmem:[%s1872_s1 + $0x28] sm:$0xff]  ;;  %vm378_vm0 = vcmask 64512  }
   0xd   : > { %v1394_v1 = vld [vmem:[%s1872_s1 + $0x78] sm:$0xff]  ;;  %1478 = vset.pattern.permute.xlu2 %v1504_v2  ;;  %1477 = vset.pattern.permute.xlu1 %v1504_v2  ;;  %v1393_v4 = vld [vmem:[%s1872_s1 + $0x70] sm:$0xff]  ;;  %s1574_s10 = sshll.u32 %s1883_s29, 3  ;;  %v1392_v6 = vld [vmem:[%s1872_s1 + $0x68] sm:$0xff] }
   0xe   : > { %635 = vmatpush.bf16.msra.mxu0 %v1386_v0  ;;  %1434 = vmatpush.bf16.msra.mxu2 %v1386_v0  ;;  %s1580_s13 = scalar_lea.vmem %s1874_s3, %s1574_s10  ;;  %v1383_v10 = vld [vmem:[%s1872_s1 + $0x20] sm:$0xff]  ;;  %v1382_v15 = vld [vmem:[%s1872_s1 + $0x18] sm:$0xff]  ;;  %v1381_v17 = vld [vmem:[%s1872_s1 + $0x10] sm:$0xff]  ;;  %s1622_s16 = scalar_lea.vmem %s1871_s0, %s1574_s10 }
   0xf   : > { %684 = vmatpush.bf16.msra.mxu1 %v1394_v1  ;;  %1442 = vmatpush.bf16.msra.mxu3 %v1394_v1  ;;  %v837_v7 = vld [vmem:[%s1580_s13 + $0x20] sm:$0xff]  ;;  %v835_v8 = vld [vmem:[%s1580_s13 + $0x10] sm:$0xff]  ;;  %v838_v12 = vld [vmem:[%s1580_s13 + $0x28] sm:$0xff]  ;;  %s1651_s28 = scalar_lea.vmem %s1876_s5, %s1574_s10  ;;  %s1765_s14 = scalar_lea.vmem %s1877_s6, %s1574_s10 }
  0x10   : > { %1476 = vset.pattern.permute.xlu0 %v1504_v2  ;;  %v833_v9 = vld [vmem:[%s1580_s13] sm:$0xff]  ;;  %871 = vperm.xlu2 %1478, %v837_v7   ;;  %v836_v13 = vld [vmem:[%s1580_s13 + $0x18] sm:$0xff]  ;;  %v834_v14 = vld [vmem:[%s1580_s13 + $0x8] sm:$0xff] }
  0x11   : > { %861 = vperm.xlu1 %1477, %v835_v8   ;;  %851 = vperm.xlu0 %1476, %v833_v9   ;;  %v1391_v11 = vld [vmem:[%s1872_s1 + $0x60] sm:$0xff]  ;;  %v1390_v16 = vld [vmem:[%s1872_s1 + $0x58] sm:$0xff]  ;;  %v1389_v18 = vld [vmem:[%s1872_s1 + $0x50] sm:$0xff] }
  0x12   : > { %636 = vmatpush.bf16.msra.mxu0 %v1385_v3  ;;  %1435 = vmatpush.bf16.msra.mxu2 %v1385_v3  ;;  %v841_v19 = vld [vmem:[%s1580_s13 + $0x40] sm:$0xff]  ;;  %v840_v20 = vld [vmem:[%s1580_s13 + $0x38] sm:$0xff]  ;;  %v839_v21 = vld [vmem:[%s1580_s13 + $0x30] sm:$0xff] }
  0x13   : > { %685 = vmatpush.bf16.msra.mxu1 %v1393_v4  ;;  %1443 = vmatpush.bf16.msra.mxu3 %v1393_v4  ;;  %v1380_v22 = vld [vmem:[%s1872_s1 + $0x8] sm:$0xff]  ;;  %v1379_v24 = vld [vmem:[%s1872_s1] sm:$0xff]  ;;  %v844_v34 = vld [vmem:[%s1580_s13 + $0x58] sm:$0xff] }
  0x14   : > { %v1388_v23 = vld [vmem:[%s1872_s1 + $0x48] sm:$0xff]  ;;  %v1387_v25 = vld [vmem:[%s1872_s1 + $0x40] sm:$0xff]  ;;  %v843_v35 = vld [vmem:[%s1580_s13 + $0x50] sm:$0xff] }
  0x15   : > { %v1234_v26 = vld [vmem:[%s1622_s16] sm:$0xf]  ;;  %v1364_v27 = vld [vmem:[%s1622_s16 + $0x4] sm:$0xf0]  ;;  %v1363_v30 = vld [vmem:[%s1622_s16 + $0x4] sm:$0xf] }
  0x16   : > { %637 = vmatpush.bf16.msra.mxu0 %v1384_v5  ;;  %1436 = vmatpush.bf16.msra.mxu2 %v1384_v5  ;;  %v1266_v28 = vld [vmem:[%s1622_s16 + $0x40] sm:$0xf]  ;;  %v1372_v29 = vld [vmem:[%s1622_s16 + $0x44] sm:$0xf0]  ;;  %v1236_v31 = vld [vmem:[%s1622_s16 + $0x8] sm:$0xf0]  ;;  %v1235_v36 = vor.u32 %v1364_v27, %v1234_v26 }
  0x17   : > { %686 = vmatpush.bf16.msra.mxu1 %v1392_v6  ;;  %1444 = vmatpush.bf16.msra.mxu3 %v1392_v6  ;;  %v1371_v32 = vld [vmem:[%s1622_s16 + $0x44] sm:$0xf]  ;;  %v1268_v33 = vld [vmem:[%s1622_s16 + $0x48] sm:$0xf0]  ;;  %v1267_v38 = vor.u32 %v1372_v29, %v1266_v28  ;;  %v1239_v39 = vor.u32 %v1363_v30, %v1236_v31  ;;  %v847_v41 = vld [vmem:[%s1580_s13 + $0x70] sm:$0xff] }
  0x18   : > { %876 = vperm.xlu2 %1478, %v838_v12   ;;  %v842_v37 = vld [vmem:[%s1580_s13 + $0x48] sm:$0xff]  ;;  %v1271_v40 = vor.u32 %v1371_v32, %v1268_v33  ;;  %v845_v43 = vld [vmem:[%s1580_s13 + $0x60] sm:$0xff]  ;;  %v1242_v44 = vld [vmem:[%s1622_s16 + $0x10] sm:$0xf] }
  0x19   : > { %866 = vperm.xlu1 %1477, %v836_v13   ;;  %856 = vperm.xlu0 %1476, %v834_v14   ;;  %v846_v42 = vld [vmem:[%s1580_s13 + $0x68] sm:$0xff]  ;;  %v1366_v45 = vld [vmem:[%s1622_s16 + $0x14] sm:$0xf0]  ;;  %v1274_v46 = vld [vmem:[%s1622_s16 + $0x50] sm:$0xf] }
  0x1a   : > { %638 = vmatpush.bf16.msra.mxu0 %v1383_v10  ;;  %1437 = vmatpush.bf16.msra.mxu2 %v1383_v10  ;;  %v1374_v47 = vld [vmem:[%s1622_s16 + $0x54] sm:$0xf0]  ;;  %v1365_v48 = vld [vmem:[%s1622_s16 + $0x14] sm:$0xf]  ;;  %v1244_v49 = vld [vmem:[%s1622_s16 + $0x18] sm:$0xf0]  ;;  %v1243_v54 = vor.u32 %v1366_v45, %v1242_v44 }
  0x1b   : > { %687 = vmatpush.bf16.msra.mxu1 %v1391_v11  ;;  %1445 = vmatpush.bf16.msra.mxu3 %v1391_v11  ;;  %v1373_v50 = vld [vmem:[%s1622_s16 + $0x54] sm:$0xf]  ;;  %v1276_v51 = vld [vmem:[%s1622_s16 + $0x58] sm:$0xf0]  ;;  %v966_v52 = vld [vmem:[%s1651_s28 + $0x8] sm:$0xff]  ;;  %v1275_v56 = vor.u32 %v1374_v47, %v1274_v46  ;;  %v1247_v57 = vor.u32 %v1365_v48, %v1244_v49 }
  0x1c   : > { %v965_v53 = vld [vmem:[%s1651_s28] sm:$0xff]  ;;  %v848_v55 = vld [vmem:[%s1580_s13 + $0x78] sm:$0xff]  ;;  %v1279_v58 = vor.u32 %v1373_v50, %v1276_v51  ;;  %v967_v61 = vld [vmem:[%s1651_s28 + $0x10] sm:$0xff]  ;;  %s1225_s13 = sshll.u32 %s1883_s29, 2 }
  0x1d   : > { %v969_v59 = vld [vmem:[%s1651_s28 + $0x20] sm:$0xff]  ;;  %v968_v60 = vld [vmem:[%s1651_s28 + $0x18] sm:$0xff]  ;;  %v1368_v63 = vld [vmem:[%s1622_s16 + $0x24] sm:$0xf0]  ;;  %s1742_s8 = scalar_lea.vmem %s1873_s2, %s1225_s13 }
  0x1e   : > { %639 = vmatpush.bf16.msra.mxu0 %v1382_v15  ;;  %1438 = vmatpush.bf16.msra.mxu2 %v1382_v15  ;;  %v1250_v62 = vld [vmem:[%s1622_s16 + $0x20] sm:$0xf]  ;;  %v1376_v1 = vld [vmem:[%s1622_s16 + $0x64] sm:$0xf0]  ;;  %v1367_v2 = vld [vmem:[%s1622_s16 + $0x24] sm:$0xf] }
  0x1f   : > { %688 = vmatpush.bf16.msra.mxu1 %v1390_v16  ;;  %1446 = vmatpush.bf16.msra.mxu3 %v1390_v16  ;;  %v1282_v0 = vld [vmem:[%s1622_s16 + $0x60] sm:$0xf]  ;;  %v1252_v3 = vld [vmem:[%s1622_s16 + $0x28] sm:$0xf0]  ;;  %v1375_v4 = vld [vmem:[%s1622_s16 + $0x64] sm:$0xf]  ;;  %v1251_v8 = vor.u32 %v1368_v63, %v1250_v62 }
  0x20   : > { %891 = vperm.xlu2 %1478, %v841_v19   ;;  %v1284_v5 = vld [vmem:[%s1622_s16 + $0x68] sm:$0xf0]  ;;  %v972_v6 = vld [vmem:[%s1651_s28 + $0x38] sm:$0xff]  ;;  %v971_v7 = vld [vmem:[%s1651_s28 + $0x30] sm:$0xff]  ;;  %v1283_v10 = vor.u32 %v1376_v1, %v1282_v0  ;;  %v1255_v11 = vor.u32 %v1367_v2, %v1252_v3 }
  0x21   : > { %886 = vperm.xlu1 %1477, %v840_v20   ;;  %881 = vperm.xlu0 %1476, %v839_v21   ;;  %v970_v9 = vld [vmem:[%s1651_s28 + $0x28] sm:$0xff]  ;;  %v1287_v12 = vor.u32 %v1375_v4, %v1284_v5  ;;  %v975_v13 = vld [vmem:[%s1651_s28 + $0x50] sm:$0xff]  ;;  %v973_v15 = vld [vmem:[%s1651_s28 + $0x40] sm:$0xff] }
  0x22   : > { %640 = vmatpush.bf16.msra.mxu0 %v1381_v17  ;;  %1439 = vmatpush.bf16.msra.mxu2 %v1381_v17  ;;  %v974_v14 = vld [vmem:[%s1651_s28 + $0x48] sm:$0xff]  ;;  %v1258_v16 = vld [vmem:[%s1622_s16 + $0x30] sm:$0xf]  ;;  %v1370_v17 = vld [vmem:[%s1622_s16 + $0x34] sm:$0xf0] }
  0x23   : > { %689 = vmatpush.bf16.msra.mxu1 %v1389_v18  ;;  %1447 = vmatpush.bf16.msra.mxu3 %v1389_v18  ;;  %v1290_v18 = vld [vmem:[%s1622_s16 + $0x70] sm:$0xf]  ;;  %v1378_v19 = vld [vmem:[%s1622_s16 + $0x74] sm:$0xf0]  ;;  %v1369_v20 = vld [vmem:[%s1622_s16 + $0x34] sm:$0xf]  ;;  %v1259_v26 = vor.u32 %v1370_v17, %v1258_v16 }
  0x24   : > { %v1260_v21 = vld [vmem:[%s1622_s16 + $0x38] sm:$0xf0]  ;;  %v1291_v28 = vor.u32 %v1378_v19, %v1290_v18  ;;  %v979_v32 = vld [vmem:[%s1651_s28 + $0x70] sm:$0xff] }
  0x25   : > { %v976_v27 = vld [vmem:[%s1651_s28 + $0x58] sm:$0xff]  ;;  %v1263_v29 = vor.u32 %v1369_v20, %v1260_v21 }
  0x26   : > { %641 = vmatpush.bf16.msra.mxu0 %v1380_v22  ;;  %1440 = vmatpush.bf16.msra.mxu2 %v1380_v22  ;;  %v1377_v22 = vld [vmem:[%s1622_s16 + $0x74] sm:$0xf]  ;;  %v980_v31 = vld [vmem:[%s1651_s28 + $0x78] sm:$0xff] }
  0x27   : > { %690 = vmatpush.bf16.msra.mxu1 %v1388_v23  ;;  %1448 = vmatpush.bf16.msra.mxu3 %v1388_v23  ;;  %v1292_v23 = vld [vmem:[%s1622_s16 + $0x78] sm:$0xf0] }
  0x28   : > { %906 = vperm.xlu2 %1478, %v844_v34   ;;  %v1295_v30 = vor.u32 %v1377_v22, %v1292_v23 }
  0x29   : > { %901 = vperm.xlu1 %1477, %v843_v35   ;;  %896 = vperm.xlu0 %1476, %v842_v37  }
  0x2a   : > { %642 = vmatpush.bf16.msra.mxu0 %v1379_v24  ;;  %1441 = vmatpush.bf16.msra.mxu2 %v1379_v24  ;;  %v978_v24 = vld [vmem:[%s1651_s28 + $0x68] sm:$0xff] }
  0x2b   : > { %691 = vmatpush.bf16.msra.mxu1 %v1387_v25  ;;  %1449 = vmatpush.bf16.msra.mxu3 %v1387_v25  ;;  %v977_v25 = vld [vmem:[%s1651_s28 + $0x60] sm:$0xff] }
  0x2d   : > { %643 = vmatmul.bf16.vlgmr.msra.gmra.mxu0 %v1235_v36  ;;  %663 = vmatmul.bf16.vlgmr.msra.gmra.mxu2 %v1267_v38  ;;  %v1505_v36 = vmov 0.0  }
  0x2e   : > { %692 = vmatmul.bf16.vlgmr.msra.gmra.mxu1 %v1239_v39  ;;  %712 = vmatmul.bf16.vlgmr.msra.gmra.mxu3 %v1271_v40  ;;  %379 = vst.msk [vmem:[#allocation2] sm:$0xff] %vm378_vm0, %v1505_v36 }
  0x2f   : > { %380 = vst.msk [vmem:[#allocation2 + $0x8] sm:$0xff] %vm378_vm0, %v1505_v36 }
  0x30   : > { %921 = vperm.xlu2 %1478, %v847_v41   ;;  %381 = vst.msk [vmem:[#allocation2 + $0x10] sm:$0xff] %vm378_vm0, %v1505_v36 }
  0x31   : > { %916 = vperm.xlu1 %1477, %v846_v42   ;;  %911 = vperm.xlu0 %1476, %v845_v43   ;;  %382 = vst.msk [vmem:[#allocation2 + $0x18] sm:$0xff] %vm378_vm0, %v1505_v36 }
  0x32   : > { %383 = vst.msk [vmem:[#allocation2 + $0x20] sm:$0xff] %vm378_vm0, %v1505_v36 }
  0x33   : > { %384 = vst.msk [vmem:[#allocation2 + $0x28] sm:$0xff] %vm378_vm0, %v1505_v36 }
  0x34   : > { %385 = vst.msk [vmem:[#allocation2 + $0x30] sm:$0xff] %vm378_vm0, %v1505_v36 }
  0x35   : > { %386 = vst.msk [vmem:[#allocation2 + $0x38] sm:$0xff] %vm378_vm0, %v1505_v36  ;;  %v395_v50 = vld [vmem:[#allocation2] sm:$0xff] }
  0x36   : > { %387 = vst.msk [vmem:[#allocation2 + $0x40] sm:$0xff] %vm378_vm0, %v1505_v36  ;;  %v396_v62 = vld [vmem:[#allocation2 + $0x8] sm:$0xff] }
  0x37   : > { %388 = vst.msk [vmem:[#allocation2 + $0x48] sm:$0xff] %vm378_vm0, %v1505_v36  ;;  %v397_v17 = vld [vmem:[#allocation2 + $0x10] sm:$0xff] }
  0x38   : > { %988 = vperm.xlu2 %1478, %v966_v52   ;;  %389 = vst.msk [vmem:[#allocation2 + $0x50] sm:$0xff] %vm378_vm0, %v1505_v36 }
  0x39   : > { %983 = vperm.xlu1 %1477, %v965_v53   ;;  %926 = vperm.xlu0 %1476, %v848_v55   ;;  %390 = vst.msk [vmem:[#allocation2 + $0x58] sm:$0xff] %vm378_vm0, %v1505_v36 }
  0x3a   : > { %391 = vst.msk [vmem:[#allocation2 + $0x60] sm:$0xff] %vm378_vm0, %v1505_v36 }
  0x3b   : > { %392 = vst.msk [vmem:[#allocation2 + $0x68] sm:$0xff] %vm378_vm0, %v1505_v36 }
  0x3c   : > { %393 = vst.msk [vmem:[#allocation2 + $0x70] sm:$0xff] %vm378_vm0, %v1505_v36 }
  0x3d   : > { %648 = vmatmul.bf16.gmra.mxu0 %v1243_v54  ;;  %668 = vmatmul.bf16.gmra.mxu2 %v1275_v56  ;;  %394 = vst.msk [vmem:[#allocation2 + $0x78] sm:$0xff] %vm378_vm0, %v1505_v36  ;;  %v1396_v56 = vld [vmem:[%s1742_s8] sm:$0xff]   ;;  %v1427_v36 = vld [vmem:[%s1742_s8 + $0x8] sm:$0xff]  }
  0x3e   : > { %697 = vmatmul.bf16.gmra.mxu1 %v1247_v57  ;;  %717 = vmatmul.bf16.gmra.mxu3 %v1279_v58  ;;  %v403_v58 = vld [vmem:[#allocation2 + $0x40] sm:$0xff]  ;;  %v1397_v0 = vunpack.c.l.bf16 %v1396_v56  ;;  %v1398_v20 = vunpack.c.h.bf16 %v1396_v56  ;;  %v398_v56 = vld [vmem:[#allocation2 + $0x18] sm:$0xff] }
  0x40   : > { %1003 = vperm.xlu2 %1478, %v969_v59  }
  0x41   : > { %998 = vperm.xlu1 %1477, %v968_v60   ;;  %993 = vperm.xlu0 %1476, %v967_v61  }
  0x48   : > { %1018 = vperm.xlu2 %1478, %v972_v6  }
  0x49   : > { %1013 = vperm.xlu1 %1477, %v971_v7   ;;  %1008 = vperm.xlu0 %1476, %v970_v9  }
  0x4d   : > { %653 = vmatmul.bf16.gmra.mxu0 %v1251_v8  ;;  %673 = vmatmul.bf16.gmra.mxu2 %v1283_v10  ;;  %v1756_v8 = vld [vmem:[%s1875_s4] ss:$0 sm:$0xff] }
  0x4e   : > { %702 = vmatmul.bf16.gmra.mxu1 %v1255_v11  ;;  %722 = vmatmul.bf16.gmra.mxu3 %v1287_v12  ;;  %v1430_v10 = vld [vmem:[%s1742_s8 + $0x20] sm:$0xff]  }
  0x4f   : > { %v1413_v19 = vunpack.c.l.bf16 %v1430_v10 }
  0x50   : > { %1033 = vperm.xlu2 %1478, %v975_v13   ;;  %v404_v13 = vld [vmem:[#allocation2 + $0x48] sm:$0xff] }
  0x51   : > { %1028 = vperm.xlu1 %1477, %v974_v14   ;;  %1023 = vperm.xlu0 %1476, %v973_v15  }
  0x58   : > { %1048 = vperm.xlu2 %1478, %v978_v24  }
  0x59   : > { %1043 = vperm.xlu1 %1477, %v977_v25   ;;  %1038 = vperm.xlu0 %1476, %v976_v27  }
  0x5d   : > { %658 = vmatmul.bf16.gmra.mxu0 %v1259_v26  ;;  %678 = vmatmul.bf16.gmra.mxu2 %v1291_v28 }
  0x5e   : > { %707 = vmatmul.bf16.gmra.mxu1 %v1263_v29  ;;  %727 = vmatmul.bf16.gmra.mxu3 %v1295_v30 }
  0x61   : > { %1058 = vperm.xlu1 %1477, %v980_v31   ;;  %1053 = vperm.xlu0 %1476, %v979_v32  }
  0x6a   : > { %v1694_v33 = vpop.permute.xlu2 %871 }
  0x72   : > { %v1704_v37 = vpop.permute.xlu2 %876 }
  0x7a   : > { %v1722_v41 = vpop.permute.xlu2 %891 }
  0x82   : > { %v1730_v45 = vpop.permute.xlu2 %906 }
  0x83   : > { %v1696_v34 = vpop.permute.xlu1 %861  ;;  %v852_v35 = vpop.permute.xlu0 %851 }
  0x8a   : > { %v1736_v49 = vpop.permute.xlu2 %921 }
  0x8b   : > { %v1707_v38 = vpop.permute.xlu1 %866  ;;  %v1710_v39 = vpop.permute.xlu0 %856 }
  0x92   : > { %v989_v2 = vpop.permute.xlu2 %988 }
  0x93   : > { %v1719_v40 = vpop.permute.xlu1 %886  ;;  %v1724_v42 = vpop.permute.xlu0 %881 }
  0x9a   : > { %v1767_v27 = vpop.permute.xlu2 %1003 }
  0x9b   : > { %v1726_v43 = vpop.permute.xlu1 %901  ;;  %v1728_v44 = vpop.permute.xlu0 %896 }
  0xa3   : > { %v1732_v46 = vpop.permute.xlu1 %916  ;;  %v1734_v47 = vpop.permute.xlu0 %911 }
  0xaa   : > { %v644_v48 = vpop.f32.mrf.mxu0 }
  0xab   : > { %v693_v51 = vpop.f32.mrf.mxu1  ;;  %v984_v54 = vpop.permute.xlu1 %983 }
  0xac   : > { %v694_v52 = vadd.f32 %v693_v51, %v644_v48  ;;  %v1744_v55 = vpop.permute.xlu0 %926 }
  0xae   : > { %v733_v53 = vadd.f32 %v694_v52, %v395_v50  ;;  %v405_v50 = vld [vmem:[#allocation2 + $0x50] sm:$0xff] }
  0xb0   : > { %750 = vst.msk [vmem:[#allocation2] sm:$0xff] %vm378_vm0, %v733_v53  ;;  %v664_v57 = vpop.f32.mrf.mxu2 }
  0xb1   : > { %v713_v59 = vpop.f32.mrf.mxu3 }
  0xb2   : > { %v646_v60 = vpop.f32.mrf.mxu0  ;;  %v714_v61 = vadd.f32 %v713_v59, %v664_v57 }
  0xb3   : > { %v695_v63 = vpop.f32.mrf.mxu1  ;;  %v1749_v6 = vpop.permute.xlu1 %998 }
  0xb4   : > { %v696_v1 = vadd.f32 %v695_v63, %v646_v60  ;;  %v741_v3 = vadd.f32 %v714_v61, %v403_v58  ;;  %v1751_v7 = vpop.permute.xlu0 %993  ;;  %v1414_v58 = vunpack.c.h.bf16 %v1430_v10  ;;  %v1401_v61 = vunpack.c.l.bf16 %v1427_v36  ;;  %v1786_v10 = vpop.permute.xlu2 %1018 }
  0xb6   : > { %v734_v4 = vadd.f32 %v696_v1, %v396_v62  ;;  %758 = vst.msk [vmem:[#allocation2 + $0x40] sm:$0xff] %vm378_vm0, %v741_v3 }
  0xb7   : > { %v769_v5 = vld [vmem:[#allocation2] sm:$0xff] }
  0xb8   : > { %v817_v9 = vadd.f32 %v1397_v0, %v769_v5  ;;  %751 = vst.msk [vmem:[#allocation2 + $0x8] sm:$0xff] %vm378_vm0, %v734_v4  ;;  %v666_v11 = vpop.f32.mrf.mxu2 }
  0xb9   : > { %v715_v14 = vpop.f32.mrf.mxu3 }
  0xba   : > { %v929_v12 = vmul.f32 %v852_v35, %v817_v9  ;;  %v649_v15 = vpop.f32.mrf.mxu0  ;;  %v716_v16 = vadd.f32 %v715_v14, %v666_v11  ;;  %v1431_v9 = vld [vmem:[%s1742_s8 + $0x28] sm:$0xff]  }
  0xbb   : > { %v698_v18 = vpop.f32.mrf.mxu1  ;;  %v1775_v32 = vpop.permute.xlu1 %1013 }
  0xbc   : > { %v949_v21 = vadd.f32 %v1756_v8, %v929_v12  ;;  %v699_v22 = vadd.f32 %v698_v18, %v649_v15  ;;  %v742_v23 = vadd.f32 %v716_v16, %v404_v13  ;;  %v1770_v29 = vpop.permute.xlu0 %1008  ;;  %v406_v13 = vld [vmem:[#allocation2 + $0x58] sm:$0xff] }
  0xbd   : > { %v777_v26 = vld [vmem:[#allocation2 + $0x40] sm:$0xff] }
  0xbe   : > { %v1061_v24 = vmul.f32 %v984_v54, %v949_v21  ;;  %v735_v25 = vadd.f32 %v699_v22, %v397_v17  ;;  %759 = vst.msk [vmem:[#allocation2 + $0x48] sm:$0xff] %vm378_vm0, %v742_v23  ;;  %v825_v30 = vadd.f32 %v1413_v19, %v777_v26  ;;  %v399_v19 = vld [vmem:[#allocation2 + $0x20] sm:$0xff]  ;;  %v1417_v21 = vunpack.c.l.bf16 %v1431_v9 }
  0xbf   : > { %v770_v28 = vld [vmem:[#allocation2 + $0x8] sm:$0xff] }
  0xc0   : > { %1077 = vst.msk [vmem:[%s1765_s14] sm:$0xff] %vm378_vm0, %v1061_v24  ;;  %v818_v31 = vadd.f32 %v1398_v20, %v770_v28  ;;  %v669_v35 = vpop.f32.mrf.mxu2  ;;  %v937_v53 = vmul.f32 %v1722_v41, %v825_v30  ;;  %v1402_v24 = vunpack.c.h.bf16 %v1427_v36  ;;  %v407_v36 = vld [vmem:[#allocation2 + $0x60] sm:$0xff] }
  0xc1   : > { %752 = vst.msk [vmem:[#allocation2 + $0x10] sm:$0xff] %vm378_vm0, %v735_v25  ;;  %v718_v51 = vpop.f32.mrf.mxu3 }
  0xc2   : > { %v930_v48 = vmul.f32 %v1710_v39, %v818_v31  ;;  %v651_v52 = vpop.f32.mrf.mxu0  ;;  %v719_v54 = vadd.f32 %v718_v51, %v669_v35  ;;  %v957_v1 = vadd.f32 %v1756_v8, %v937_v53 }
  0xc3   : > { %v700_v57 = vpop.f32.mrf.mxu1  ;;  %v1029_v22 = vpop.permute.xlu1 %1028 }
  0xc4   : > { %v950_v59 = vadd.f32 %v1756_v8, %v930_v48  ;;  %v701_v60 = vadd.f32 %v700_v57, %v651_v52  ;;  %v743_v62 = vadd.f32 %v719_v54, %v405_v50  ;;  %v1024_v3 = vpop.permute.xlu0 %1023  ;;  %v1428_v54 = vld [vmem:[%s1742_s8 + $0x10] sm:$0xff]  }
  0xc5   : > { %v778_v39 = vld [vmem:[#allocation2 + $0x48] sm:$0xff]  ;;  %v1069_v5 = vmul.f32 %v1024_v3, %v957_v1 }
  0xc6   : > { %v1062_v63 = vmul.f32 %v989_v2, %v950_v59  ;;  %v736_v0 = vadd.f32 %v701_v60, %v398_v56  ;;  %760 = vst.msk [vmem:[#allocation2 + $0x50] sm:$0xff] %vm378_vm0, %v743_v62  ;;  %v826_v41 = vadd.f32 %v1414_v58, %v778_v39  ;;  %v400_v58 = vld [vmem:[#allocation2 + $0x28] sm:$0xff]  ;;  %v1034_v60 = vpop.permute.xlu2 %1033  ;;  %v1405_v39 = vunpack.c.l.bf16 %v1428_v54 }
  0xc7   : > { %1085 = vst.msk [vmem:[%s1765_s14 + $0x40] sm:$0xff] %vm378_vm0, %v1069_v5 }
  0xc8   : > { %1078 = vst.msk [vmem:[%s1765_s14 + $0x8] sm:$0xff] %vm378_vm0, %v1062_v63  ;;  %v771_v4 = vld [vmem:[#allocation2 + $0x10] sm:$0xff]  ;;  %v938_v2 = vmul.f32 %v1728_v44, %v826_v41  ;;  %v671_v12 = vpop.f32.mrf.mxu2 }
  0xc9   : > { %v819_v11 = vadd.f32 %v1401_v61, %v771_v4  ;;  %753 = vst.msk [vmem:[#allocation2 + $0x18] sm:$0xff] %vm378_vm0, %v736_v0  ;;  %v720_v14 = vpop.f32.mrf.mxu3  ;;  %v1418_v61 = vunpack.c.h.bf16 %v1431_v9  ;;  %v1432_v4 = vld [vmem:[%s1742_s8 + $0x30] sm:$0xff]  }
  0xca   : > { %v654_v15 = vpop.f32.mrf.mxu0  ;;  %v958_v17 = vadd.f32 %v1756_v8, %v938_v2  ;;  %v721_v18 = vadd.f32 %v720_v14, %v671_v12  ;;  %v408_v12 = vld [vmem:[#allocation2 + $0x68] sm:$0xff] }
  0xcb   : > { %v931_v16 = vmul.f32 %v1696_v34, %v819_v11  ;;  %v703_v20 = vpop.f32.mrf.mxu1 }
  0xcc   : > { %v704_v23 = vadd.f32 %v703_v20, %v654_v15  ;;  %v1070_v25 = vmul.f32 %v1029_v22, %v958_v17  ;;  %v744_v26 = vadd.f32 %v721_v18, %v406_v13  ;;  %v401_v15 = vld [vmem:[#allocation2 + $0x30] sm:$0xff] }
  0xcd   : > { %v951_v44 = vadd.f32 %v1756_v8, %v931_v16  ;;  %v779_v30 = vld [vmem:[#allocation2 + $0x50] sm:$0xff] }
  0xce   : > { %v737_v28 = vadd.f32 %v704_v23, %v399_v19  ;;  %1086 = vst.msk [vmem:[%s1765_s14 + $0x48] sm:$0xff] %vm378_vm0, %v1070_v25  ;;  %v827_v34 = vadd.f32 %v1417_v21, %v779_v30  ;;  %v1421_v19 = vunpack.c.l.bf16 %v1432_v4  ;;  %v1039_v21 = vpop.permute.xlu0 %1038 }
  0xcf   : > { %v1063_v31 = vmul.f32 %v1751_v7, %v951_v44  ;;  %761 = vst.msk [vmem:[#allocation2 + $0x58] sm:$0xff] %vm378_vm0, %v744_v26  ;;  %v1406_v44 = vunpack.c.h.bf16 %v1428_v54 }
  0xd0   : > { %v772_v35 = vld [vmem:[#allocation2 + $0x18] sm:$0xff]  ;;  %v939_v50 = vmul.f32 %v1726_v43, %v827_v34  ;;  %v674_v51 = vpop.f32.mrf.mxu2  ;;  %754 = vst.msk [vmem:[#allocation2 + $0x20] sm:$0xff] %vm378_vm0, %v737_v28 }
  0xd1   : > { %1079 = vst.msk [vmem:[%s1765_s14 + $0x10] sm:$0xff] %vm378_vm0, %v1063_v31  ;;  %v820_v48 = vadd.f32 %v1402_v24, %v772_v35  ;;  %v723_v52 = vpop.f32.mrf.mxu3  ;;  %v1429_v31 = vld [vmem:[%s1742_s8 + $0x18] sm:$0xff]  }
  0xd2   : > { %v656_v53 = vpop.f32.mrf.mxu0  ;;  %v959_v56 = vadd.f32 %v1756_v8, %v939_v50  ;;  %v724_v57 = vadd.f32 %v723_v52, %v674_v51 }
  0xd3   : > { %v932_v7 = vmul.f32 %v1707_v38, %v820_v48  ;;  %v705_v59 = vpop.f32.mrf.mxu1  ;;  %v409_v48 = vld [vmem:[#allocation2 + $0x70] sm:$0xff] }
  0xd4   : > { %v706_v43 = vadd.f32 %v705_v59, %v656_v53  ;;  %v1071_v63 = vmul.f32 %v1034_v60, %v959_v56  ;;  %v745_v0 = vadd.f32 %v724_v57, %v407_v36  ;;  %v1422_v36 = vunpack.c.h.bf16 %v1432_v4  ;;  %v1044_v57 = vpop.permute.xlu1 %1043 }
  0xd5   : > { %v952_v62 = vadd.f32 %v1756_v8, %v932_v7 }
  0xd6   : > { %v738_v1 = vadd.f32 %v706_v43, %v400_v58  ;;  %v780_v3 = vld [vmem:[#allocation2 + $0x58] sm:$0xff]  ;;  %1087 = vst.msk [vmem:[%s1765_s14 + $0x50] sm:$0xff] %vm378_vm0, %v1071_v63  ;;  %v1409_v58 = vunpack.c.l.bf16 %v1429_v31 }
  0xd7   : > { %v1064_v41 = vmul.f32 %v1749_v6, %v952_v62  ;;  %v828_v38 = vadd.f32 %v1418_v61, %v780_v3  ;;  %762 = vst.msk [vmem:[#allocation2 + $0x60] sm:$0xff] %vm378_vm0, %v745_v0  ;;  %v773_v5 = vld [vmem:[#allocation2 + $0x20] sm:$0xff]  ;;  %v1433_v63 = vld [vmem:[%s1742_s8 + $0x38] sm:$0xff]  }
  0xd8   : > { %v676_v9 = vpop.f32.mrf.mxu2  ;;  %v821_v11 = vadd.f32 %v1405_v39, %v773_v5  ;;  %755 = vst.msk [vmem:[#allocation2 + $0x28] sm:$0xff] %vm378_vm0, %v738_v1  ;;  %v410_v3 = vld [vmem:[#allocation2 + $0x78] sm:$0xff] }
  0xd9   : > { %1080 = vst.msk [vmem:[%s1765_s14 + $0x18] sm:$0xff] %vm378_vm0, %v1064_v41  ;;  %v940_v2 = vmul.f32 %v1730_v45, %v828_v38  ;;  %v725_v13 = vpop.f32.mrf.mxu3 }
  0xda   : > { %v659_v14 = vpop.f32.mrf.mxu0  ;;  %v726_v6 = vadd.f32 %v725_v13, %v676_v9  ;;  %v933_v17 = vmul.f32 %v1694_v33, %v821_v11  ;;  %v1425_v9 = vunpack.c.l.bf16 %v1433_v63 }
  0xdb   : > { %v708_v16 = vpop.f32.mrf.mxu1  ;;  %v960_v18 = vadd.f32 %v1756_v8, %v940_v2 }
  0xdc   : > { %v709_v20 = vadd.f32 %v708_v16, %v659_v14  ;;  %v746_v22 = vadd.f32 %v726_v6, %v408_v12  ;;  %v953_v45 = vadd.f32 %v1756_v8, %v933_v17  ;;  %v1410_v12 = vunpack.c.h.bf16 %v1429_v31 }
  0xdd   : > { %v1072_v23 = vmul.f32 %v1039_v21, %v960_v18  ;;  %v1426_v21 = vunpack.c.h.bf16 %v1433_v63 }
  0xde   : > { %v739_v24 = vadd.f32 %v709_v20, %v401_v15  ;;  %v781_v25 = vld [vmem:[#allocation2 + $0x60] sm:$0xff]  ;;  %763 = vst.msk [vmem:[#allocation2 + $0x68] sm:$0xff] %vm378_vm0, %v746_v22  ;;  %v1065_v26 = vmul.f32 %v1767_v27, %v953_v45  ;;  %v402_v27 = vld [vmem:[#allocation2 + $0x38] sm:$0xff]  ;;  %v1054_v20 = vpop.permute.xlu0 %1053 }
  0xdf   : > { %1088 = vst.msk [vmem:[%s1765_s14 + $0x58] sm:$0xff] %vm378_vm0, %v1072_v23  ;;  %v829_v33 = vadd.f32 %v1421_v19, %v781_v25  ;;  %v774_v28 = vld [vmem:[#allocation2 + $0x28] sm:$0xff]  ;;  %v1059_v25 = vpop.permute.xlu1 %1058 }
  0xe0   : > { %756 = vst.msk [vmem:[#allocation2 + $0x30] sm:$0xff] %vm378_vm0, %v739_v24  ;;  %v679_v30 = vpop.f32.mrf.mxu2  ;;  %v822_v35 = vadd.f32 %v1406_v44, %v774_v28 }
  0xe1   : > { %1081 = vst.msk [vmem:[%s1765_s14 + $0x20] sm:$0xff] %vm378_vm0, %v1065_v26  ;;  %v941_v34 = vmul.f32 %v1734_v47, %v829_v33  ;;  %v728_v50 = vpop.f32.mrf.mxu3 }
  0xe2   : > { %v661_v51 = vpop.f32.mrf.mxu0  ;;  %v729_v52 = vadd.f32 %v728_v50, %v679_v30  ;;  %v934_v7 = vmul.f32 %v1704_v37, %v822_v35 }
  0xe3   : > { %v710_v53 = vpop.f32.mrf.mxu1  ;;  %v961_v54 = vadd.f32 %v1756_v8, %v941_v34 }
  0xe4   : > { %v711_v56 = vadd.f32 %v710_v53, %v661_v51  ;;  %v747_v59 = vadd.f32 %v729_v52, %v409_v48  ;;  %v954_v60 = vadd.f32 %v1756_v8, %v934_v7 }
  0xe5   : > { %v1073_v47 = vmul.f32 %v1044_v57, %v961_v54  ;;  %v782_v61 = vld [vmem:[#allocation2 + $0x68] sm:$0xff] }
  0xe6   : > { %v740_v43 = vadd.f32 %v711_v56, %v402_v27  ;;  %v830_v62 = vadd.f32 %v1422_v36, %v782_v61  ;;  %764 = vst.msk [vmem:[#allocation2 + $0x70] sm:$0xff] %vm378_vm0, %v747_v59  ;;  %v1066_v0 = vmul.f32 %v1770_v29, %v954_v60  ;;  %v1049_v29 = vpop.permute.xlu2 %1048 }
  0xe7   : > { %1089 = vst.msk [vmem:[%s1765_s14 + $0x60] sm:$0xff] %vm378_vm0, %v1073_v47  ;;  %v775_v39 = vld [vmem:[#allocation2 + $0x30] sm:$0xff] }
  0xe8   : > { %v942_v37 = vmul.f32 %v1732_v46, %v830_v62  ;;  %v823_v1 = vadd.f32 %v1409_v58, %v775_v39  ;;  %757 = vst.msk [vmem:[#allocation2 + $0x38] sm:$0xff] %vm378_vm0, %v740_v43  ;;  %v681_v41 = vpop.f32.mrf.mxu2 }
  0xe9   : > { %1082 = vst.msk [vmem:[%s1765_s14 + $0x28] sm:$0xff] %vm378_vm0, %v1066_v0  ;;  %v730_v38 = vpop.f32.mrf.mxu3 }
  0xea   : > { %v962_v4 = vadd.f32 %v1756_v8, %v942_v37  ;;  %v935_v5 = vmul.f32 %v1724_v42, %v823_v1  ;;  %v731_v11 = vadd.f32 %v730_v38, %v681_v41 }
  0xec   : > { %v1074_v2 = vmul.f32 %v1049_v29, %v962_v4  ;;  %v955_v46 = vadd.f32 %v1756_v8, %v935_v5  ;;  %v748_v13 = vadd.f32 %v731_v11, %v410_v3 }
  0xed   : > { %v783_v14 = vld [vmem:[#allocation2 + $0x70] sm:$0xff] }
  0xee   : > { %1090 = vst.msk [vmem:[%s1765_s14 + $0x68] sm:$0xff] %vm378_vm0, %v1074_v2  ;;  %v1067_v6 = vmul.f32 %v1775_v32, %v955_v46  ;;  %v831_v15 = vadd.f32 %v1425_v9, %v783_v14 }
  0xef   : > { %v776_v16 = vld [vmem:[#allocation2 + $0x38] sm:$0xff]  ;;  %765 = vst.msk [vmem:[#allocation2 + $0x78] sm:$0xff] %vm378_vm0, %v748_v13 }
  0xf0   : > { %1083 = vst.msk [vmem:[%s1765_s14 + $0x30] sm:$0xff] %vm378_vm0, %v1067_v6  ;;  %v943_v42 = vmul.f32 %v1736_v49, %v831_v15  ;;  %v824_v17 = vadd.f32 %v1410_v12, %v776_v16 }
  0xf2   : > { %v963_v18 = vadd.f32 %v1756_v8, %v943_v42  ;;  %v936_v19 = vmul.f32 %v1719_v40, %v824_v17 }
  0xf4   : > { %v1075_v22 = vmul.f32 %v1054_v20, %v963_v18  ;;  %v956_v32 = vadd.f32 %v1756_v8, %v936_v19 }
  0xf6   : > { %1091 = vst.msk [vmem:[%s1765_s14 + $0x70] sm:$0xff] %vm378_vm0, %v1075_v22  ;;  %v1068_v45 = vmul.f32 %v1786_v10, %v956_v32  ;;  %v784_v23 = vld [vmem:[#allocation2 + $0x78] sm:$0xff] }
  0xf7   : > { %v832_v44 = vadd.f32 %v1426_v21, %v784_v23 }
  0xf8   : > { %1084 = vst.msk [vmem:[%s1765_s14 + $0x38] sm:$0xff] %vm378_vm0, %v1068_v45 }
  0xf9   : > { %v944_v49 = vmul.f32 %v1744_v55, %v832_v44 }
  0xfb   : > { %v964_v24 = vadd.f32 %v1756_v8, %v944_v49 }
  0xfd   : > { %v1076_v26 = vmul.f32 %v1059_v25, %v964_v24 }
  0xff   : > { %1092 = vst.msk [vmem:[%s1765_s14 + $0x78] sm:$0xff] %vm378_vm0, %v1076_v26 }
 0x100 PF: > { %s16_s23 = sadd.s32 1, %s1502_s23   ;;  %s1878_s21 = smov %s1498_s22 }
 0x101   : > { %p13_p5 = scmp.ge.s32.totalorder %s16_s23, 4   ;;  %s1879_s22 = smov %s1881_s24 }
 0x103   :  { %15 = sbr.rel (!%p13_p5) target bundleno = 2 (0x2), region = 94 }

// kernel: seal_forward.15
= control target key start
LH: loop header
LB: loop body
LE: loop exit
PB: predicated region body
PF: predicated region fallthrough
CT: control target
= control target key end

     0   :  { %vm21_vm0 = vcmask 64512   ;;  %v539_v37 = vmov 0.0   ;;  %s815_s1 = inlined_call_operand.vmem [shape: f32[256,8], index: 1, kind: input, shape index: {}]   ;;  %s816_s0 = inlined_call_operand.vmem [shape: bf16[8,256], index: 0, kind: input, shape index: {}]   ;;  %s817_s2 = inlined_call_operand.vmem [shape: f32[128,8], index: 2, kind: input, shape index: {}]   ;;  %s818_s3 = inlined_call_operand.vmem [shape: f32[128,8], index: 3, kind: input, shape index: {}]   ;;  %s819_s4 = inlined_call_operand.vmem [shape: f32[1,128], index: 4, kind: output, shape index: {}]  }
   0x1   :  { %v40_v0 = vld [vmem:[%s815_s1 + $0x78] sm:$0xff]  ;;  %v39_v2 = vld [vmem:[%s815_s1 + $0x70] sm:$0xff]  ;;  %v38_v4 = vld [vmem:[%s815_s1 + $0x68] sm:$0xff]  ;;  %22 = vst.msk [vmem:[#allocation2] sm:$0xff] %vm21_vm0, %v539_v37 }
   0x2   :  { %v56_v1 = vld [vmem:[%s815_s1 + $0xf8] sm:$0xff]  ;;  %64 = vmatpush.msra.mxu0 %v40_v0  ;;  %v55_v3 = vld [vmem:[%s815_s1 + $0xf0] sm:$0xff]  ;;  %v54_v5 = vld [vmem:[%s815_s1 + $0xe8] sm:$0xff] }
   0x3   :  { %85 = vmatpush.msra.mxu1 %v56_v1  ;;  %v37_v6 = vld [vmem:[%s815_s1 + $0x60] sm:$0xff]  ;;  %v36_v8 = vld [vmem:[%s815_s1 + $0x58] sm:$0xff]  ;;  %v35_v10 = vld [vmem:[%s815_s1 + $0x50] sm:$0xff] }
   0x4   :  { %65 = vmatpush.msra.mxu0 %v39_v2  ;;  %v53_v7 = vld [vmem:[%s815_s1 + $0xe0] sm:$0xff]  ;;  %v52_v9 = vld [vmem:[%s815_s1 + $0xd8] sm:$0xff]  ;;  %v51_v11 = vld [vmem:[%s815_s1 + $0xd0] sm:$0xff] }
   0x5   :  { %86 = vmatpush.msra.mxu1 %v55_v3  ;;  %v34_v12 = vld [vmem:[%s815_s1 + $0x48] sm:$0xff]  ;;  %v33_v14 = vld [vmem:[%s815_s1 + $0x40] sm:$0xff]  ;;  %v32_v16 = vld [vmem:[%s815_s1 + $0x38] sm:$0xff] }
   0x6   :  { %66 = vmatpush.msra.mxu0 %v38_v4  ;;  %v50_v13 = vld [vmem:[%s815_s1 + $0xc8] sm:$0xff]  ;;  %v49_v15 = vld [vmem:[%s815_s1 + $0xc0] sm:$0xff]  ;;  %v48_v17 = vld [vmem:[%s815_s1 + $0xb8] sm:$0xff] }
   0x7   :  { %87 = vmatpush.msra.mxu1 %v54_v5  ;;  %v31_v18 = vld [vmem:[%s815_s1 + $0x30] sm:$0xff]  ;;  %v30_v20 = vld [vmem:[%s815_s1 + $0x28] sm:$0xff]  ;;  %v29_v22 = vld [vmem:[%s815_s1 + $0x20] sm:$0xff] }
   0x8   :  { %67 = vmatpush.msra.mxu0 %v37_v6  ;;  %v47_v19 = vld [vmem:[%s815_s1 + $0xb0] sm:$0xff]  ;;  %v46_v21 = vld [vmem:[%s815_s1 + $0xa8] sm:$0xff]  ;;  %v45_v23 = vld [vmem:[%s815_s1 + $0xa0] sm:$0xff] }
   0x9   :  { %88 = vmatpush.msra.mxu1 %v53_v7  ;;  %v24_v24 = vld [vmem:[%s816_s0] sm:$0xff]  ;;  %v28_v25 = vld [vmem:[%s815_s1 + $0x18] sm:$0xff]  ;;  %v27_v27 = vld [vmem:[%s815_s1 + $0x10] sm:$0xff] }
   0xa   :  { %68 = vmatpush.msra.mxu0 %v36_v8  ;;  %v44_v26 = vld [vmem:[%s815_s1 + $0x98] sm:$0xff]  ;;  %v43_v28 = vld [vmem:[%s815_s1 + $0x90] sm:$0xff]  ;;  %v58_v29 = vunpack.c.l.b16 %v24_v24  ;;  %v59_v30 = vunpack.c.h.b16 %v24_v24  ;;  %v26_v31 = vld [vmem:[%s815_s1 + $0x8] sm:$0xff] }
   0xb   :  { %89 = vmatpush.msra.mxu1 %v52_v9  ;;  %v42_v32 = vld [vmem:[%s815_s1 + $0x88] sm:$0xff]  ;;  %v25_v33 = vld [vmem:[%s815_s1] sm:$0xff]  ;;  %v116_v45 = vld [vmem:[%s817_s2 + $0x18] sm:$0xff] }
   0xc   :  { %69 = vmatpush.msra.mxu0 %v35_v10  ;;  %v41_v34 = vld [vmem:[%s815_s1 + $0x80] sm:$0xff]  ;;  %v60_v35 = vpack.c.b16 %v58_v29, %v58_v29  ;;  %v61_v36 = vpack.c.b16 %v59_v30, %v59_v30  ;;  %v245_v47 = vld [vmem:[%s818_s3 + $0x18] sm:$0xff]  ;;  %v118_v50 = vld [vmem:[%s817_s2 + $0x28] sm:$0xff] }
   0xd   :  { %90 = vmatpush.msra.mxu1 %v51_v11  ;;  %v23_v39 = vld [vmem:[#allocation2] sm:$0xff]  ;;  %v247_v51 = vld [vmem:[%s818_s3 + $0x28] sm:$0xff]  ;;  %v119_v52 = vld [vmem:[%s817_s2 + $0x30] sm:$0xff] }
   0xe   :  { %70 = vmatpush.msra.mxu0 %v34_v12  ;;  %v117_v48 = vld [vmem:[%s817_s2 + $0x20] sm:$0xff]  ;;  %v248_v53 = vld [vmem:[%s818_s3 + $0x30] sm:$0xff]  ;;  %v120_v54 = vld [vmem:[%s817_s2 + $0x38] sm:$0xff] }
   0xf   :  { %91 = vmatpush.msra.mxu1 %v50_v13  ;;  %v246_v49 = vld [vmem:[%s818_s3 + $0x20] sm:$0xff]  ;;  %v249_v55 = vld [vmem:[%s818_s3 + $0x38] sm:$0xff]  ;;  %v122_v58 = vld [vmem:[%s817_s2 + $0x48] sm:$0xff] }
  0x10   :  { %71 = vmatpush.msra.mxu0 %v33_v14  ;;  %v121_v56 = vld [vmem:[%s817_s2 + $0x40] sm:$0xff]  ;;  %v251_v59 = vld [vmem:[%s818_s3 + $0x48] sm:$0xff]  ;;  %v123_v60 = vld [vmem:[%s817_s2 + $0x50] sm:$0xff] }
  0x11   :  { %92 = vmatpush.msra.mxu1 %v49_v15  ;;  %v250_v57 = vld [vmem:[%s818_s3 + $0x40] sm:$0xff]  ;;  %v252_v61 = vld [vmem:[%s818_s3 + $0x50] sm:$0xff]  ;;  %v124_v63 = vld [vmem:[%s817_s2 + $0x58] sm:$0xff] }
  0x12   :  { %72 = vmatpush.msra.mxu0 %v32_v16  ;;  %v113_v62 = vld [vmem:[%s817_s2] sm:$0xff]  ;;  %v253_v0 = vld [vmem:[%s818_s3 + $0x58] sm:$0xff]  ;;  %v114_v1 = vld [vmem:[%s817_s2 + $0x8] sm:$0xff] }
  0x13   :  { %93 = vmatpush.msra.mxu1 %v48_v17  ;;  %v125_v2 = vld [vmem:[%s817_s2 + $0x60] sm:$0xff]  ;;  %v115_v4 = vld [vmem:[%s817_s2 + $0x10] sm:$0xff]  ;;  %v126_v5 = vld [vmem:[%s817_s2 + $0x68] sm:$0xff] }
  0x14   :  { %73 = vmatpush.msra.mxu0 %v31_v18  ;;  %v254_v3 = vld [vmem:[%s818_s3 + $0x60] sm:$0xff]  ;;  %v255_v6 = vld [vmem:[%s818_s3 + $0x68] sm:$0xff]  ;;  %v127_v8 = vld [vmem:[%s817_s2 + $0x70] sm:$0xff] }
  0x15   :  { %94 = vmatpush.msra.mxu1 %v47_v19  ;;  %v242_v7 = vld [vmem:[%s818_s3] sm:$0xff]  ;;  %v256_v9 = vld [vmem:[%s818_s3 + $0x70] sm:$0xff]  ;;  %v243_v10 = vld [vmem:[%s818_s3 + $0x8] sm:$0xff] }
  0x16   :  { %74 = vmatpush.msra.mxu0 %v30_v20  ;;  %v128_v11 = vld [vmem:[%s817_s2 + $0x78] sm:$0xff]  ;;  %v244_v13 = vld [vmem:[%s818_s3 + $0x10] sm:$0xff] }
  0x17   :  { %95 = vmatpush.msra.mxu1 %v46_v21  ;;  %v257_v12 = vld [vmem:[%s818_s3 + $0x78] sm:$0xff] }
  0x18   :  { %75 = vmatpush.msra.mxu0 %v29_v22 }
  0x19   :  { %96 = vmatpush.msra.mxu1 %v45_v23 }
  0x1a   :  { %76 = vmatpush.msra.mxu0 %v28_v25 }
  0x1b   :  { %97 = vmatpush.msra.mxu1 %v44_v26 }
  0x1c   :  { %77 = vmatpush.msra.mxu0 %v27_v27 }
  0x1d   :  { %98 = vmatpush.msra.mxu1 %v43_v28 }
  0x1e   :  { %78 = vmatpush.msra.mxu0 %v26_v31 }
  0x1f   :  { %99 = vmatpush.msra.mxu1 %v42_v32 }
  0x20   :  { %79 = vmatpush.msra.mxu0 %v25_v33 }
  0x21   :  { %100 = vmatpush.msra.mxu1 %v41_v34  ;;  %80 = vmatmul.bf16.vlgmr.msra.gmra.mxu0 %v60_v35 }
  0x22   :  { %101 = vmatmul.bf16.vlgmr.msra.gmra.mxu1 %v61_v36 }
  0x9e   :  { %v81_v38 = vpop.f32.mrf.mxu0 }
  0x9f   :  { %v102_v40 = vpop.f32.mrf.mxu1 }
  0xa0   :  { %v103_v41 = vadd.f32 %v102_v40, %v81_v38 }
  0xa2   :  { %v106_v42 = vadd.f32 %v103_v41, %v23_v39 }
  0xa4   :  { %108 = vst.msk [vmem:[#allocation2] sm:$0xff] %vm21_vm0, %v106_v42 }
  0xa6   :  { %v83_v43 = vpop.f32.mrf.mxu0 }
  0xa7   :  { %v104_v44 = vpop.f32.mrf.mxu1 }
  0xab   :  { %v112_v46 = vld [vmem:[#allocation2] sm:$0xff] }
  0xac   :  { %192 = vmatpush.msrb.mxu1 %v112_v46  ;;  %531 = vmatpush.msra.mxu2 %v112_v46 }
  0xad   :  { %532 = vmatpush.msra.mxu3 %v112_v46  ;;  %485 = vmatmul.msk.f32.vlgmr.msra.gmra.mxu2 %vm21_vm0, %v116_v45 }
  0xae   :  { %321 = vmatpush.msra.mxu1 %v112_v46  ;;  %501 = vmatmul.msk.f32.vlgmr.msra.gmra.mxu3 %vm21_vm0, %v245_v47 }
  0xaf   :  { %482 = vmatmul.msk.f32.vlgmr.msrb.gmra.mxu1 %vm21_vm0, %v113_v62  ;;  %v540_v62 = vmov 1.0  }
  0xb5   :  { %486 = vmatmul.msk.f32.gmra.mxu2 %vm21_vm0, %v117_v48 }
  0xb6   :  { %502 = vmatmul.msk.f32.gmra.mxu3 %vm21_vm0, %v246_v49 }
  0xb7   :  { %483 = vmatmul.msk.f32.gmra.mxu1 %vm21_vm0, %v114_v1 }
  0xbd   :  { %487 = vmatmul.msk.f32.gmra.mxu2 %vm21_vm0, %v118_v50 }
  0xbe   :  { %503 = vmatmul.msk.f32.gmra.mxu3 %vm21_vm0, %v247_v51 }
  0xbf   :  { %484 = vmatmul.msk.f32.gmra.mxu1 %vm21_vm0, %v115_v4 }
  0xc5   :  { %488 = vmatmul.msk.f32.gmra.mxu2 %vm21_vm0, %v119_v52 }
  0xc6   :  { %504 = vmatmul.msk.f32.gmra.mxu3 %vm21_vm0, %v248_v53 }
  0xc7   :  { %498 = vmatmul.msk.f32.vlgmr.msra.gmra.mxu1 %vm21_vm0, %v242_v7 }
  0xcd   :  { %489 = vmatmul.msk.f32.gmra.mxu2 %vm21_vm0, %v120_v54 }
  0xce   :  { %505 = vmatmul.msk.f32.gmra.mxu3 %vm21_vm0, %v249_v55 }
  0xcf   :  { %499 = vmatmul.msk.f32.gmra.mxu1 %vm21_vm0, %v243_v10 }
  0xd5   :  { %490 = vmatmul.msk.f32.gmra.mxu2 %vm21_vm0, %v121_v56 }
  0xd6   :  { %506 = vmatmul.msk.f32.gmra.mxu3 %vm21_vm0, %v250_v57 }
  0xd7   :  { %500 = vmatmul.msk.f32.gmra.mxu1 %vm21_vm0, %v244_v13 }
  0xdd   :  { %491 = vmatmul.msk.f32.gmra.mxu2 %vm21_vm0, %v122_v58 }
  0xde   :  { %507 = vmatmul.msk.f32.gmra.mxu3 %vm21_vm0, %v251_v59 }
  0xe5   :  { %492 = vmatmul.msk.f32.gmra.mxu2 %vm21_vm0, %v123_v60 }
  0xe6   :  { %508 = vmatmul.msk.f32.gmra.mxu3 %vm21_vm0, %v252_v61 }
  0xed   :  { %493 = vmatmul.msk.f32.gmra.mxu2 %vm21_vm0, %v124_v63 }
  0xee   :  { %509 = vmatmul.msk.f32.gmra.mxu3 %vm21_vm0, %v253_v0 }
  0xf5   :  { %494 = vmatmul.msk.f32.gmra.mxu2 %vm21_vm0, %v125_v2 }
  0xf6   :  { %510 = vmatmul.msk.f32.gmra.mxu3 %vm21_vm0, %v254_v3 }
  0xfd   :  { %495 = vmatmul.msk.f32.gmra.mxu2 %vm21_vm0, %v126_v5 }
  0xfe   :  { %511 = vmatmul.msk.f32.gmra.mxu3 %vm21_vm0, %v255_v6 }
 0x105   :  { %496 = vmatmul.msk.f32.gmra.mxu2 %vm21_vm0, %v127_v8 }
 0x106   :  { %512 = vmatmul.msk.f32.gmra.mxu3 %vm21_vm0, %v256_v9 }
 0x10d   :  { %497 = vmatmul.msk.f32.gmra.mxu2 %vm21_vm0, %v128_v11 }
 0x10e   :  { %513 = vmatmul.msk.f32.gmra.mxu3 %vm21_vm0, %v257_v12 }
 0x12c   :  { %v194_v46 = vpop.f32.mrf.mxu1 }
 0x130   :  { %v203_v14 = vpop.f32.mrf.mxu2 }
 0x131   :  { %v332_v15 = vpop.f32.mrf.mxu3 }
 0x132   :  { %v374_v16 = vmul.f32 %v332_v15, %v203_v14 }
 0x134   :  { %v197_v51 = vpop.f32.mrf.mxu1 }
 0x138   :  { %v206_v17 = vpop.f32.mrf.mxu2 }
 0x139   :  { %v335_v18 = vpop.f32.mrf.mxu3 }
 0x13a   :  { %v375_v19 = vmul.f32 %v335_v18, %v206_v17 }
 0x13c   :  { %v200_v54 = vpop.f32.mrf.mxu1 }
 0x140   :  { %v209_v20 = vpop.f32.mrf.mxu2 }
 0x141   :  { %v338_v21 = vpop.f32.mrf.mxu3 }
 0x142   :  { %v376_v22 = vmul.f32 %v338_v21, %v209_v20 }
 0x144   :  { %v323_v56 = vpop.f32.mrf.mxu1 }
 0x145   :  { %v371_v61 = vmul.f32 %v323_v56, %v194_v46 }
 0x148   :  { %v212_v23 = vpop.f32.mrf.mxu2 }
 0x149   :  { %v341_v24 = vpop.f32.mrf.mxu3 }
 0x14a   :  { %v377_v25 = vmul.f32 %v341_v24, %v212_v23 }
 0x14c   :  { %v326_v57 = vpop.f32.mrf.mxu1 }
 0x14d   :  { %v372_v60 = vmul.f32 %v326_v57, %v197_v51 }
 0x150   :  { %v215_v26 = vpop.f32.mrf.mxu2 }
 0x151   :  { %v344_v27 = vpop.f32.mrf.mxu3 }
 0x152   :  { %v378_v28 = vmul.f32 %v344_v27, %v215_v26 }
 0x154   :  { %v329_v58 = vpop.f32.mrf.mxu1 }
 0x155   :  { %v373_v59 = vmul.f32 %v329_v58, %v200_v54 }
 0x158   :  { %v218_v29 = vpop.f32.mrf.mxu2 }
 0x159   :  { %v347_v30 = vpop.f32.mrf.mxu3 }
 0x15a   :  { %v379_v31 = vmul.f32 %v347_v30, %v218_v29 }
 0x160   :  { %v221_v32 = vpop.f32.mrf.mxu2 }
 0x161   :  { %v350_v33 = vpop.f32.mrf.mxu3 }
 0x162   :  { %v380_v34 = vmul.f32 %v350_v33, %v221_v32 }
 0x168   :  { %v224_v35 = vpop.f32.mrf.mxu2 }
 0x169   :  { %v353_v36 = vpop.f32.mrf.mxu3 }
 0x16a   :  { %v381_v55 = vmul.f32 %v353_v36, %v224_v35 }
 0x170   :  { %v227_v37 = vpop.f32.mrf.mxu2 }
 0x171   :  { %v356_v38 = vpop.f32.mrf.mxu3 }
 0x172   :  { %v382_v53 = vmul.f32 %v356_v38, %v227_v37 }
 0x178   :  { %v230_v39 = vpop.f32.mrf.mxu2 }
 0x179   :  { %v359_v40 = vpop.f32.mrf.mxu3 }
 0x17a   :  { %v383_v52 = vmul.f32 %v359_v40, %v230_v39 }
 0x180   :  { %v233_v41 = vpop.f32.mrf.mxu2 }
 0x181   :  { %v362_v42 = vpop.f32.mrf.mxu3 }
 0x182   :  { %v384_v50 = vmul.f32 %v362_v42, %v233_v41 }
 0x188   :  { %v236_v43 = vpop.f32.mrf.mxu2 }
 0x189   :  { %v365_v44 = vpop.f32.mrf.mxu3 }
 0x18a   :  { %v385_v49 = vmul.f32 %v365_v44, %v236_v43 }
 0x190   :  { %v239_v45 = vpop.f32.mrf.mxu2 }
 0x191   :  { %v368_v47 = vpop.f32.mrf.mxu3 }
 0x192   :  { %v386_v48 = vmul.f32 %v368_v47, %v239_v45 }
 0x194   :  { %514 = vmatpush.xpose.msk.msrb.mxu0 %vm21_vm0, %v386_v48 }
 0x198   :  { %515 = vmatpush.xpose.msk.msrb.mxu0 %vm21_vm0, %v385_v49 }
 0x19c   :  { %516 = vmatpush.xpose.msk.msrb.mxu0 %vm21_vm0, %v384_v50 }
 0x1a0   :  { %517 = vmatpush.xpose.msk.msrb.mxu0 %vm21_vm0, %v383_v52 }
 0x1a4   :  { %518 = vmatpush.xpose.msk.msrb.mxu0 %vm21_vm0, %v382_v53 }
 0x1a8   :  { %519 = vmatpush.xpose.msk.msrb.mxu0 %vm21_vm0, %v381_v55 }
 0x1ac   :  { %520 = vmatpush.xpose.msk.msrb.mxu0 %vm21_vm0, %v380_v34 }
 0x1b0   :  { %521 = vmatpush.xpose.msk.msrb.mxu0 %vm21_vm0, %v379_v31 }
 0x1b4   :  { %522 = vmatpush.xpose.msk.msrb.mxu0 %vm21_vm0, %v378_v28 }
 0x1b8   :  { %523 = vmatpush.xpose.msk.msrb.mxu0 %vm21_vm0, %v377_v25 }
 0x1bc   :  { %524 = vmatpush.xpose.msk.msrb.mxu0 %vm21_vm0, %v376_v22 }
 0x1c0   :  { %525 = vmatpush.xpose.msk.msrb.mxu0 %vm21_vm0, %v375_v19 }
 0x1c4   :  { %526 = vmatpush.xpose.msk.msrb.mxu0 %vm21_vm0, %v374_v16 }
 0x1c8   :  { %527 = vmatpush.xpose.msk.msrb.mxu0 %vm21_vm0, %v373_v59 }
 0x1cc   :  { %528 = vmatpush.xpose.msk.msrb.mxu0 %vm21_vm0, %v372_v60 }
 0x1d0   :  { %529 = vmatpush.xpose.msk.msrb.mxu0 %vm21_vm0, %v371_v61 }
 0x1d3   :  { %530 = vmatmul.msk.f32.vlgmr.msrb.gmra.mxu0 %vm21_vm0, %v540_v62 }
 0x250   :  { %v455_v63 = vpop.f32.mrf.mxu0 }
 0x251   :  { %v458_v0 = vsub.f32 0.0, %v455_v63 }
 0x253   :  { %v459_v1 = vmul.f32 1.442695, %v458_v0 }
 0x255   :  { %535 = vpow2.f32 %v459_v1 }
 0x25b   :  { %v536_v2 = vpop.eup %535 }
 0x25c   :  { %v461_v3 = vadd.f32 1.0, %v536_v2 }
 0x25e   :  { %537 = vrcp.f32 %v461_v3  ;;  %v473_v7 = vand.u32 2147483648, %v461_v3  ;;  %v471_v9 = vand.u32 2147483647, %v461_v3  ;;  %vm467_vm2 = vweird.f32 %v461_v3 }
 0x260   :  { %v474_v11 = vor.u32 1.1754944e-38, %v473_v7  ;;  %vm472_vm4 = vcmp.eq.f32.partialorder %v471_v9, 8.507059e+37 }
 0x264   :  { %v538_v4 = vpop.eup %537 }
 0x265   :  { %v463_v5 = vmul.f32 %v538_v4, %v461_v3  ;;  %vm468_vm1 = vweird.f32 %v538_v4 }
 0x266   :  { %vm469_vm3 = vmor %vm467_vm2, %vm468_vm1 }
 0x267   :  { %v464_v6 = vsub.f32 1.0, %v463_v5 }
 0x269   :  { %v465_v8 = vmul.f32 %v538_v4, %v464_v6 }
 0x26b   :  { %v466_v10 = vadd.f32 %v538_v4, %v465_v8 }
 0x26d   :  { %v470_v12 = vsel %vm469_vm3, %v538_v4, %v466_v10 }
 0x26e   :  { %v475_v13 = vsel %vm472_vm4, %v474_v11, %v470_v12 }
 0x26f   :  { %477 = vst [vmem:[%s819_s4] sm:$0x1] %v475_v13 }

</bundles_post_ra>
